<compile_context>
chip_gen: v5e
topology: v5e:2x2
jax: 0.10.0
libtpu: 0.0.40
codegen_flags: <defaults>
</compile_context>

<pallas_src>
import functools

import jax
import jax.numpy as jnp
from jax import lax
from jax.experimental import pallas as pl
from jax.experimental.pallas import tpu as pltpu


@functools.lru_cache(maxsize=None)
def _vmem_limit_bytes():
    """Generation-aware scoped-VMEM limit: ~3/4 of physical VMEM.

    v7x has only 64 MiB VMEM per TensorCore (vs 128 MiB on v5e/v6e), so never
    request all of it (double buffers / semaphores / Mosaic scratch need
    headroom); on v5e/v6e this also raises the small default scoped limit so
    the large row tiles below fit.
    """
    try:
        cap = pltpu.get_tpu_info().vmem_capacity_bytes
        return int(cap * 3 // 4)
    except Exception:  # interpret mode / older jax: safe-everywhere fallback
        return 48 * 1024 * 1024


def _compiler_params(*semantics):
    return pltpu.CompilerParams(
        dimension_semantics=semantics,
        vmem_limit_bytes=_vmem_limit_bytes(),
    )


# ----------------------------- Pallas kernels ------------------------------

def _linear_bias_kernel(x_ref, w_ref, b_ref, o_ref):
    # x: (TM, Cin) bf16, w: (Cin, Cout) bf16 pre-transposed, b: (1, Cout) f32.
    acc = jnp.dot(x_ref[...], w_ref[...], preferred_element_type=jnp.float32)
    o_ref[...] = (acc + b_ref[...]).astype(o_ref.dtype)


def _linear_nobias_kernel(x_ref, w_ref, o_ref):
    o_ref[...] = jnp.dot(
        x_ref[...], w_ref[...], preferred_element_type=jnp.float32
    ).astype(o_ref.dtype)


def _ln_kv_kernel(x_ref, g_ref, beta_ref, w_ref, o_ref, *, eps):
    # Fused LayerNorm(C) + kv Linear(C -> 2C) (qkv_bias=False). LN math in f32,
    # matmul in bf16 with f32 accumulation.
    x = x_ref[...].astype(jnp.float32)
    mu = jnp.mean(x, axis=-1, keepdims=True)
    var = jnp.mean((x - mu) ** 2, axis=-1, keepdims=True)
    xn = (x - mu) * lax.rsqrt(var + eps) * g_ref[...] + beta_ref[...]
    o_ref[...] = jnp.dot(
        xn.astype(w_ref.dtype), w_ref[...], preferred_element_type=jnp.float32
    ).astype(o_ref.dtype)


def _fused_attn_kernel(x_ref, wq_ref, k_ref, v_ref, wp_ref, pb_ref, o_ref,
                       q_scr, o_scr, *, num_heads, head_dim):
    # Grid: (B, num_q_tiles). One step = full attention for a (TQ, C) query
    # slab of one batch element.
    #   x:  (TQ, C) bf16          wq/wp: (C, C) bf16 (scale folded into wq)
    #   k/v:(nH, Nk, d) bf16      pb:    (1, C) f32
    x = x_ref[...]

    # Full-C q projection once per tile (MXU-friendly dims; same FLOPs as the
    # per-head version but >=128-wide contraction/output).
    q_scr[...] = jnp.dot(
        x, wq_ref[...], preferred_element_type=jnp.float32
    ).astype(q_scr.dtype)

    for h in range(num_heads):                      # static, unrolled
        col = pl.ds(h * head_dim, head_dim)
        q_h = q_scr[:, col]                                         # (TQ, d)
        # Scores: contract last dims -> no k transpose / XLU relayout.
        s = lax.dot_general(q_h, k_ref[h],
                            dimension_numbers=(((1,), (1,)), ((), ())),
                            preferred_element_type=jnp.float32)     # (TQ, Nk)
        m = jnp.max(s, axis=-1, keepdims=True)
        p = jnp.exp(s - m)
        inv_l = 1.0 / jnp.sum(p, axis=-1, keepdims=True)            # (TQ, 1)
        o_h = jnp.dot(p.astype(v_ref.dtype), v_ref[h],
                      preferred_element_type=jnp.float32) * inv_l   # (TQ, d)
        o_scr[:, col] = o_h.astype(o_scr.dtype)

    # Single full-C out-projection + bias (f32) and one lane-dense writeback.
    out = jnp.dot(o_scr[...], wp_ref[...],
                  preferred_element_type=jnp.float32) + pb_ref[...]
    o_ref[...] = out.astype(o_ref.dtype)


# ------------------------------ wrappers -----------------------------------

def pallas_linear(x, w_t, b=None, *, tm=1024):
    """x: (M, Cin) @ w_t: (Cin, Cout) [+ b]. Row-tiled, auto-pipelined."""
    M, Cin = x.shape
    Cout = w_t.shape[1]
    tm = min(tm, M)
    in_specs = [
        pl.BlockSpec((tm, Cin), lambda i: (i, 0)),
        pl.BlockSpec((Cin, Cout), lambda i: (0, 0)),
    ]
    args = [x, w_t]
    if b is not None:
        in_specs.append(pl.BlockSpec((1, Cout), lambda i: (0, 0)))
        args.append(b.reshape(1, Cout).astype(jnp.float32))
        kern = _linear_bias_kernel
    else:
        kern = _linear_nobias_kernel
    return pl.pallas_call(
        kern,
        out_shape=jax.ShapeDtypeStruct((M, Cout), x.dtype),
        grid=(pl.cdiv(M, tm),),
        in_specs=in_specs,
        out_specs=pl.BlockSpec((tm, Cout), lambda i: (i, 0)),
        compiler_params=_compiler_params("parallel"),
    )(*args)


def pallas_ln_kv(x, gamma, beta, w_kv_t, *, eps=1e-5, tm=1024):
    """LayerNorm(C) then Linear(C, 2C), fused and row-tiled."""
    M, C = x.shape
    C2 = w_kv_t.shape[1]
    tm = min(tm, M)
    kern = functools.partial(_ln_kv_kernel, eps=eps)
    return pl.pallas_call(
        kern,
        out_shape=jax.ShapeDtypeStruct((M, C2), x.dtype),
        grid=(pl.cdiv(M, tm),),
        in_specs=[
            pl.BlockSpec((tm, C), lambda i: (i, 0)),
            pl.BlockSpec((1, C), lambda i: (0, 0)),
            pl.BlockSpec((1, C), lambda i: (0, 0)),
            pl.BlockSpec((C, C2), lambda i: (0, 0)),
        ],
        out_specs=pl.BlockSpec((tm, C2), lambda i: (i, 0)),
        compiler_params=_compiler_params("parallel"),
    )(x, gamma.reshape(1, C).astype(jnp.float32),
      beta.reshape(1, C).astype(jnp.float32), w_kv_t)


def pallas_fused_attention(x, wq, k, v, wp, proj_b, *, num_heads, out_dtype,
                           tq=512):
    """Fused q-proj + multi-head attention + out-proj.

    x: (B, N, C) bf16   wq/wp: (C, C) bf16 (scale folded into wq)
    k/v: (B, nH, Nk, d) bf16   -> (B, N, C) in out_dtype.
    """
    B, N, C = x.shape
    d = C // num_heads
    Nk = k.shape[2]
    tq = min(tq, N)
    nq = pl.cdiv(N, tq)
    kern = functools.partial(_fused_attn_kernel,
                             num_heads=num_heads, head_dim=d)
    return pl.pallas_call(
        kern,
        out_shape=jax.ShapeDtypeStruct((B, N, C), out_dtype),
        grid=(B, nq),
        in_specs=[
            pl.BlockSpec((None, tq, C), lambda b, qi: (b, qi, 0)),       # x
            pl.BlockSpec((C, C), lambda b, qi: (0, 0)),                  # wq (resident)
            pl.BlockSpec((None, num_heads, Nk, d),
                         lambda b, qi: (b, 0, 0, 0)),                    # k
            pl.BlockSpec((None, num_heads, Nk, d),
                         lambda b, qi: (b, 0, 0, 0)),                    # v
            pl.BlockSpec((C, C), lambda b, qi: (0, 0)),                  # wp (resident)
            pl.BlockSpec((1, C), lambda b, qi: (0, 0)),                  # proj bias (f32)
        ],
        out_specs=pl.BlockSpec((None, tq, C), lambda b, qi: (b, qi, 0)),
        scratch_shapes=[pltpu.VMEM((tq, C), x.dtype),   # q_all
                        pltpu.VMEM((tq, C), x.dtype)],  # concat head outputs
        compiler_params=_compiler_params("parallel", "parallel"),
    )(x, wq, k, v, wp, proj_b.reshape(1, C).astype(jnp.float32))


def attention_forward(x, params, *, H, W, num_heads, sr_ratio,
                      compute_dtype=jnp.bfloat16):
    """Mirrors Attention.forward (eval mode: dropouts are identity)."""
    B, N, C = x.shape
    d = C // num_heads
    scale = d ** (-0.5)
    out_dtype = x.dtype
    cd = compute_dtype

    xc = x.astype(cd)
    # Weights cast to bf16 once; attention scale folded into Wq (one tiny
    # (C,C) op instead of a per-head activation-sized multiply in-kernel).
    wq = (params["q_w_t"] * scale).astype(cd)
    wkv = params["kv_w_t"].astype(cd)
    wp = params["proj_w_t"].astype(cd)

    # ---- k / v path -------------------------------------------------------
    if sr_ratio > 1:
        ksz = sr_ratio
        Hs, Ws = H // ksz, W // ksz
        # sr conv (kernel=stride=sr_ratio) == patchify + matmul; patches ordered
        # (C, kh, kw) to match PyTorch conv weight flattening.
        # TODO(synk): fuse this patchify relayout into the sr-conv kernel's
        # BlockSpec (in-VMEM relayout) to remove the XLA transpose round trip.
        xp = xc.reshape(B, Hs, ksz, Ws, ksz, C)
        xp = xp.transpose(0, 1, 3, 5, 2, 4)            # (B, Hs, Ws, C, k, k)
        patches = xp.reshape(B * Hs * Ws, C * ksz * ksz)
        x_ = pallas_linear(patches, params["sr_w_t"].astype(cd), params["sr_b"])
        kv = pallas_ln_kv(x_, params["norm_g"], params["norm_b"], wkv)
        Nk = Hs * Ws
    else:
        # sr_ratio == 1: no sr conv and (matching the reference) no LayerNorm.
        kv = pallas_linear(xc.reshape(B * N, C), wkv)   # qkv_bias=False
        Nk = N

    # kv is the (sr-reduced) small tensor; this reshape/transpose is cheap
    # relative to the N-sized activations that the fused kernel keeps in place.
    kv = kv.reshape(B, Nk, 2, num_heads, d).transpose(2, 0, 3, 1, 4)
    k, v = kv[0], kv[1]                                 # (B, nH, Nk, d) bf16

    return pallas_fused_attention(xc, wq, k, v, wp, params["proj_b"],
                                  num_heads=num_heads, out_dtype=out_dtype)


# --------------------------- reference (pure JAX) ---------------------------

def attention_reference(x, params, *, H, W, num_heads, sr_ratio):
    B, N, C = x.shape
    d = C // num_heads
    scale = d ** (-0.5)
    q = x.reshape(B * N, C) @ params["q_w_t"]
    q = q.reshape(B, N, num_heads, d).transpose(0, 2, 1, 3)
    if sr_ratio > 1:
        ksz = sr_ratio
        Hs, Ws = H // ksz, W // ksz
        xp = x.reshape(B, Hs, ksz, Ws, ksz, C)
        xp = xp.transpose(0, 1, 3, 5, 2, 4).reshape(B * Hs * Ws, C * ksz * ksz)
        x_ = xp @ params["sr_w_t"] + params["sr_b"]
        mu = x_.mean(-1, keepdims=True)
        var = ((x_ - mu) ** 2).mean(-1, keepdims=True)
        x_ = (x_ - mu) / jnp.sqrt(var + 1e-5) * params["norm_g"] + params["norm_b"]
        kv = x_ @ params["kv_w_t"]
        Nk = Hs * Ws
    else:
        kv = x.reshape(B * N, C) @ params["kv_w_t"]
        Nk = N
    kv = kv.reshape(B, Nk, 2, num_heads, d).transpose(2, 0, 3, 1, 4)
    k, v = kv[0], kv[1]
    attn = jnp.einsum("bhqd,bhkd->bhqk", q, k) * scale
    attn = jax.nn.softmax(attn, axis=-1)
    o = jnp.einsum("bhqk,bhkd->bhqd", attn, v).transpose(0, 2, 1, 3)
    o = o.reshape(B * N, C)
    return (o @ params["proj_w_t"] + params["proj_b"]).reshape(B, N, C)


# ---------------------------------- main ------------------------------------

if __name__ == "__main__":
    B, H, W = 2, 16, 16
    N = H * W
    C = 32
    num_heads = 2
    sr_ratio = 2

    key = jax.random.PRNGKey(0)
    ks = jax.random.split(key, 8)
    f32 = jnp.float32

    # Deterministic synthetic parameters (shapes follow the nn.Module __init__).
    # Weights stored pre-transposed as (in, out) for straight MXU matmuls.
    params = {
        "q_w_t":    0.1 * jax.random.normal(ks[0], (C, C), f32),        # Linear(C,C), no bias
        "kv_w_t":   0.1 * jax.random.normal(ks[1], (C, 2 * C), f32),    # Linear(C,2C), no bias
        "sr_w_t":   0.1 * jax.random.normal(
            ks[2], (C * sr_ratio * sr_ratio, C), f32),                  # Conv2d(C,C,k,k) flattened
        "sr_b":     0.05 * jax.random.normal(ks[3], (C,), f32),
        "norm_g":   jnp.ones((C,), f32),
        "norm_b":   jnp.zeros((C,), f32),
        "proj_w_t": 0.1 * jax.random.normal(ks[4], (C, C), f32),        # Linear(C,C)
        "proj_b":   0.05 * jax.random.normal(ks[5], (C,), f32),
    }

    x = jax.random.normal(ks[6], (B, N, C), f32)

    # Static hyper-params bound via partial (not traced jit args).
    fwd = jax.jit(functools.partial(
        attention_forward, H=H, W=W, num_heads=num_heads, sr_ratio=sr_ratio))
    out = jax.block_until_ready(fwd(x, params))

    ref = attention_reference(x, params, H=H, W=W,
                              num_heads=num_heads, sr_ratio=sr_ratio)
    max_diff = float(jnp.max(jnp.abs(out.astype(f32) - ref)))
    assert out.shape == (B, N, C)
    # bf16 matmul datapath (f32 accumulation) vs pure-f32 reference.
    assert max_diff < 3e-2, f"mismatch vs reference: {max_diff}"

    print("KERNEL_OK")
</pallas_src>

<mosaic_0001>
module attributes {stable_mosaic.version = 11 : i64} {
  func.func @_ln_kv_kernel(%arg0: i32, %arg1: memref<128x32xbf16, #tpu.memory_space<vmem>>, %arg2: memref<1x32xf32, #tpu.memory_space<vmem>>, %arg3: memref<1x32xf32, #tpu.memory_space<vmem>>, %arg4: memref<32x64xbf16, #tpu.memory_space<vmem>>, %arg5: memref<128x64xbf16, #tpu.memory_space<vmem>>) attributes {dimension_semantics = [#tpu.dimension_semantics<parallel>], iteration_bounds = array<i64: 1>, scalar_prefetch = 0 : i64, scratch_operands = 0 : i64, tpu.core_type = #tpu.core_type<tc>, window_params = [{transform_indices = @transform_0, window_bounds = array<i64: 128, 32>}, {pipeline_mode = #tpu.pipeline_mode<synchronous>, transform_indices = @transform_1, window_bounds = array<i64: 1, 32>}, {pipeline_mode = #tpu.pipeline_mode<synchronous>, transform_indices = @transform_2, window_bounds = array<i64: 1, 32>}, {pipeline_mode = #tpu.pipeline_mode<synchronous>, transform_indices = @transform_3, window_bounds = array<i64: 32, 64>}, {transform_indices = @transform_4, window_bounds = array<i64: 128, 64>}]} {
    %c0 = arith.constant 0 : index
    %c0_0 = arith.constant 0 : index
    %0 = vector.load %arg1[%c0, %c0_0] : memref<128x32xbf16, #tpu.memory_space<vmem>>, vector<128x32xbf16>
    %1 = arith.extf %0 : vector<128x32xbf16> to vector<128x32xf32>
    %cst = arith.constant dense<0.000000e+00> : vector<128xf32>
    %2 = vector.multi_reduction <add>, %1, %cst [1] : vector<128x32xf32> to vector<128xf32>
    %3 = vector.shape_cast %2 : vector<128xf32> to vector<128x1xf32>
    %cst_1 = arith.constant 3.200000e+01 : f32
    %4 = vector.broadcast %cst_1 : f32 to vector<128x1xf32>
    %5 = arith.divf %3, %4 : vector<128x1xf32>
    %6 = vector.broadcast %5 : vector<128x1xf32> to vector<128x32xf32>
    %7 = arith.subf %1, %6 : vector<128x32xf32>
    %8 = arith.mulf %7, %7 : vector<128x32xf32>
    %cst_2 = arith.constant dense<0.000000e+00> : vector<128xf32>
    %9 = vector.multi_reduction <add>, %8, %cst_2 [1] : vector<128x32xf32> to vector<128xf32>
    %10 = vector.shape_cast %9 : vector<128xf32> to vector<128x1xf32>
    %cst_3 = arith.constant 3.200000e+01 : f32
    %11 = vector.broadcast %cst_3 : f32 to vector<128x1xf32>
    %12 = arith.divf %10, %11 : vector<128x1xf32>
    %13 = vector.broadcast %5 : vector<128x1xf32> to vector<128x32xf32>
    %14 = arith.subf %1, %13 : vector<128x32xf32>
    %cst_4 = arith.constant 9.99999974E-6 : f32
    %15 = vector.broadcast %cst_4 : f32 to vector<128x1xf32>
    %16 = arith.addf %12, %15 : vector<128x1xf32>
    %17 = math.rsqrt %16 : vector<128x1xf32>
    %18 = vector.broadcast %17 : vector<128x1xf32> to vector<128x32xf32>
    %19 = arith.mulf %14, %18 : vector<128x32xf32>
    %c0_5 = arith.constant 0 : index
    %c0_6 = arith.constant 0 : index
    %20 = vector.load %arg2[%c0_5, %c0_6] : memref<1x32xf32, #tpu.memory_space<vmem>>, vector<1x32xf32>
    %21 = vector.broadcast %20 : vector<1x32xf32> to vector<128x32xf32>
    %22 = arith.mulf %19, %21 : vector<128x32xf32>
    %c0_7 = arith.constant 0 : index
    %c0_8 = arith.constant 0 : index
    %23 = vector.load %arg3[%c0_7, %c0_8] : memref<1x32xf32, #tpu.memory_space<vmem>>, vector<1x32xf32>
    %24 = vector.broadcast %23 : vector<1x32xf32> to vector<128x32xf32>
    %25 = arith.addf %22, %24 : vector<128x32xf32>
    %26 = arith.truncf %25 : vector<128x32xf32> to vector<128x32xbf16>
    %c0_9 = arith.constant 0 : index
    %c0_10 = arith.constant 0 : index
    %27 = vector.load %arg4[%c0_9, %c0_10] : memref<32x64xbf16, #tpu.memory_space<vmem>>, vector<32x64xbf16>
    %cst_11 = arith.constant dense<0.000000e+00> : vector<128x64xf32>
    %28 = tpu.matmul %26, %27, %cst_11 {dimension_numbers = #tpu.dot_dimension_numbers<[1], [0], [0], [1], [0, 0, 1, 1], [], []>} : vector<128x32xbf16>, vector<32x64xbf16>, vector<128x64xf32> -> vector<128x64xf32>
    %29 = arith.truncf %28 : vector<128x64xf32> to vector<128x64xbf16>
    %c0_12 = arith.constant 0 : index
    %c0_13 = arith.constant 0 : index
    %30 = vector.load %arg5[%c0_12, %c0_13] : memref<128x64xbf16, #tpu.memory_space<vmem>>, vector<128x64xbf16>
    tpu.vector_store %arg5[%c0_12, %c0_13], %29 {strides = array<i32>} : memref<128x64xbf16, #tpu.memory_space<vmem>>, vector<128x64xbf16>,
    return
  }
  func.func @transform_0(%arg0: i32) -> (i32, i32) {
    %c0_i32 = arith.constant 0 : i32
    %c0_i32_0 = arith.constant 0 : i32
    return %arg0, %c0_i32 : i32, i32
  }
  func.func @transform_1(%arg0: i32) -> (i32, i32) {
    %c0_i32 = arith.constant 0 : i32
    %c0_i32_0 = arith.constant 0 : i32
    %c0_i32_1 = arith.constant 0 : i32
    return %c0_i32, %c0_i32_0 : i32, i32
  }
  func.func @transform_2(%arg0: i32) -> (i32, i32) {
    %c0_i32 = arith.constant 0 : i32
    %c0_i32_0 = arith.constant 0 : i32
    %c0_i32_1 = arith.constant 0 : i32
    return %c0_i32, %c0_i32_0 : i32, i32
  }
  func.func @transform_3(%arg0: i32) -> (i32, i32) {
    %c0_i32 = arith.constant 0 : i32
    %c0_i32_0 = arith.constant 0 : i32
    %c0_i32_1 = arith.constant 0 : i32
    return %c0_i32, %c0_i32_0 : i32, i32
  }
  func.func @transform_4(%arg0: i32) -> (i32, i32) {
    %c0_i32 = arith.constant 0 : i32
    %c0_i32_0 = arith.constant 0 : i32
    return %arg0, %c0_i32 : i32, i32
  }
}

module attributes {stable_mosaic.version = 11 : i64} {
  func.func @_linear_bias_kernel(%arg0: i32, %arg1: memref<128x128xbf16, #tpu.memory_space<vmem>>, %arg2: memref<128x32xbf16, #tpu.memory_space<vmem>>, %arg3: memref<1x32xf32, #tpu.memory_space<vmem>>, %arg4: memref<128x32xbf16, #tpu.memory_space<vmem>>) attributes {dimension_semantics = [#tpu.dimension_semantics<parallel>], iteration_bounds = array<i64: 1>, scalar_prefetch = 0 : i64, scratch_operands = 0 : i64, tpu.core_type = #tpu.core_type<tc>, window_params = [{transform_indices = @transform_0, window_bounds = array<i64: 128, 128>}, {pipeline_mode = #tpu.pipeline_mode<synchronous>, transform_indices = @transform_1, window_bounds = array<i64: 128, 32>}, {pipeline_mode = #tpu.pipeline_mode<synchronous>, transform_indices = @transform_2, window_bounds = array<i64: 1, 32>}, {transform_indices = @transform_3, window_bounds = array<i64: 128, 32>}]} {
    %c0 = arith.constant 0 : index
    %c0_0 = arith.constant 0 : index
    %0 = vector.load %arg1[%c0, %c0_0] : memref<128x128xbf16, #tpu.memory_space<vmem>>, vector<128x128xbf16>
    %c0_1 = arith.constant 0 : index
    %c0_2 = arith.constant 0 : index
    %1 = vector.load %arg2[%c0_1, %c0_2] : memref<128x32xbf16, #tpu.memory_space<vmem>>, vector<128x32xbf16>
    %cst = arith.constant dense<0.000000e+00> : vector<128x32xf32>
    %2 = tpu.matmul %0, %1, %cst {dimension_numbers = #tpu.dot_dimension_numbers<[1], [0], [0], [1], [0, 0, 1, 1], [], []>} : vector<128x128xbf16>, vector<128x32xbf16>, vector<128x32xf32> -> vector<128x32xf32>
    %c0_3 = arith.constant 0 : index
    %c0_4 = arith.constant 0 : index
    %3 = vector.load %arg3[%c0_3, %c0_4] : memref<1x32xf32, #tpu.memory_space<vmem>>, vector<1x32xf32>
    %4 = vector.broadcast %3 : vector<1x32xf32> to vector<128x32xf32>
    %5 = arith.addf %2, %4 : vector<128x32xf32>
    %6 = arith.truncf %5 : vector<128x32xf32> to vector<128x32xbf16>
    %c0_5 = arith.constant 0 : index
    %c0_6 = arith.constant 0 : index
    %7 = vector.load %arg4[%c0_5, %c0_6] : memref<128x32xbf16, #tpu.memory_space<vmem>>, vector<128x32xbf16>
    tpu.vector_store %arg4[%c0_5, %c0_6], %6 {strides = array<i32>} : memref<128x32xbf16, #tpu.memory_space<vmem>>, vector<128x32xbf16>,
    return
  }
  func.func @transform_0(%arg0: i32) -> (i32, i32) {
    %c0_i32 = arith.constant 0 : i32
    %c0_i32_0 = arith.constant 0 : i32
    return %arg0, %c0_i32 : i32, i32
  }
  func.func @transform_1(%arg0: i32) -> (i32, i32) {
    %c0_i32 = arith.constant 0 : i32
    %c0_i32_0 = arith.constant 0 : i32
    %c0_i32_1 = arith.constant 0 : i32
    return %c0_i32, %c0_i32_0 : i32, i32
  }
  func.func @transform_2(%arg0: i32) -> (i32, i32) {
    %c0_i32 = arith.constant 0 : i32
    %c0_i32_0 = arith.constant 0 : i32
    %c0_i32_1 = arith.constant 0 : i32
    return %c0_i32, %c0_i32_0 : i32, i32
  }
  func.func @transform_3(%arg0: i32) -> (i32, i32) {
    %c0_i32 = arith.constant 0 : i32
    %c0_i32_0 = arith.constant 0 : i32
    return %arg0, %c0_i32 : i32, i32
  }
}

module attributes {stable_mosaic.version = 11 : i64} {
  func.func @_fused_attn_kernel(%arg0: i32, %arg1: i32, %arg2: memref<1x256x32xbf16, #tpu.memory_space<vmem>>, %arg3: memref<32x32xbf16, #tpu.memory_space<vmem>>, %arg4: memref<1x2x64x16xbf16, #tpu.memory_space<vmem>>, %arg5: memref<1x2x64x16xbf16, #tpu.memory_space<vmem>>, %arg6: memref<32x32xbf16, #tpu.memory_space<vmem>>, %arg7: memref<1x32xf32, #tpu.memory_space<vmem>>, %arg8: memref<1x256x32xf32, #tpu.memory_space<vmem>>, %arg9: memref<256x32xbf16, #tpu.memory_space<vmem>>, %arg10: memref<256x32xbf16, #tpu.memory_space<vmem>>) attributes {dimension_semantics = [#tpu.dimension_semantics<parallel>, #tpu.dimension_semantics<parallel>], iteration_bounds = array<i64: 2, 1>, scalar_prefetch = 0 : i64, scratch_operands = 2 : i64, tpu.core_type = #tpu.core_type<tc>, window_params = [{transform_indices = @transform_0, window_bounds = array<i64: 1, 256, 32>}, {pipeline_mode = #tpu.pipeline_mode<synchronous>, transform_indices = @transform_1, window_bounds = array<i64: 32, 32>}, {transform_indices = @transform_2, window_bounds = array<i64: 1, 2, 64, 16>}, {transform_indices = @transform_3, window_bounds = array<i64: 1, 2, 64, 16>}, {pipeline_mode = #tpu.pipeline_mode<synchronous>, transform_indices = @transform_4, window_bounds = array<i64: 32, 32>}, {pipeline_mode = #tpu.pipeline_mode<synchronous>, transform_indices = @transform_5, window_bounds = array<i64: 1, 32>}, {transform_indices = @transform_6, window_bounds = array<i64: 1, 256, 32>}]} {
    %c0 = arith.constant 0 : index
    %c0_0 = arith.constant 0 : index
    %c0_1 = arith.constant 0 : index
    %0 = vector.load %arg2[%c0, %c0_0, %c0_1] : memref<1x256x32xbf16, #tpu.memory_space<vmem>>, vector<1x256x32xbf16>
    %1 = vector.shape_cast %0 : vector<1x256x32xbf16> to vector<256x32xbf16>
    %c0_2 = arith.constant 0 : index
    %c0_3 = arith.constant 0 : index
    %2 = vector.load %arg3[%c0_2, %c0_3] : memref<32x32xbf16, #tpu.memory_space<vmem>>, vector<32x32xbf16>
    %cst = arith.constant dense<0.000000e+00> : vector<256x32xf32>
    %3 = tpu.matmul %1, %2, %cst {dimension_numbers = #tpu.dot_dimension_numbers<[1], [0], [0], [1], [0, 0, 1, 1], [], []>} : vector<256x32xbf16>, vector<32x32xbf16>, vector<256x32xf32> -> vector<256x32xf32>
    %4 = arith.truncf %3 : vector<256x32xf32> to vector<256x32xbf16>
    %c0_4 = arith.constant 0 : index
    %c0_5 = arith.constant 0 : index
    %5 = vector.load %arg9[%c0_4, %c0_5] : memref<256x32xbf16, #tpu.memory_space<vmem>>, vector<256x32xbf16>
    tpu.vector_store %arg9[%c0_4, %c0_5], %4 {strides = array<i32>} : memref<256x32xbf16, #tpu.memory_space<vmem>>, vector<256x32xbf16>,
    %c0_6 = arith.constant 0 : index
    %c0_7 = arith.constant 0 : index
    %6 = vector.load %arg9[%c0_6, %c0_7] : memref<256x32xbf16, #tpu.memory_space<vmem>>, vector<256x16xbf16>
    %c0_8 = arith.constant 0 : index
    %c0_9 = arith.constant 0 : index
    %c0_10 = arith.constant 0 : index
    %c0_11 = arith.constant 0 : index
    %7 = vector.load %arg4[%c0_8, %c0_9, %c0_10, %c0_11] : memref<1x2x64x16xbf16, #tpu.memory_space<vmem>>, vector<1x1x64x16xbf16>
    %8 = vector.shape_cast %7 : vector<1x1x64x16xbf16> to vector<64x16xbf16>
    %cst_12 = arith.constant dense<0.000000e+00> : vector<256x64xf32>
    %9 = tpu.matmul %6, %8, %cst_12 {dimension_numbers = #tpu.dot_dimension_numbers<[1], [1], [0], [0], [0, 0, 1, 0], [], []>} : vector<256x16xbf16>, vector<64x16xbf16>, vector<256x64xf32> -> vector<256x64xf32>
    %cst_13 = arith.constant dense<0xFF800000> : vector<256xf32>
    %10 = vector.multi_reduction <maximumf>, %9, %cst_13 [1] : vector<256x64xf32> to vector<256xf32>
    %11 = vector.shape_cast %10 : vector<256xf32> to vector<256x1xf32>
    %12 = vector.broadcast %11 : vector<256x1xf32> to vector<256x64xf32>
    %13 = arith.subf %9, %12 : vector<256x64xf32>
    %14 = math.exp %13 : vector<256x64xf32>
    %cst_14 = arith.constant dense<0.000000e+00> : vector<256xf32>
    %15 = vector.multi_reduction <add>, %14, %cst_14 [1] : vector<256x64xf32> to vector<256xf32>
    %16 = vector.shape_cast %15 : vector<256xf32> to vector<256x1xf32>
    %cst_15 = arith.constant 1.000000e+00 : f32
    %17 = vector.broadcast %cst_15 : f32 to vector<256x1xf32>
    %18 = arith.divf %17, %16 : vector<256x1xf32>
    %19 = arith.truncf %14 : vector<256x64xf32> to vector<256x64xbf16>
    %c0_16 = arith.constant 0 : index
    %c0_17 = arith.constant 0 : index
    %c0_18 = arith.constant 0 : index
    %c0_19 = arith.constant 0 : index
    %20 = vector.load %arg5[%c0_16, %c0_17, %c0_18, %c0_19] : memref<1x2x64x16xbf16, #tpu.memory_space<vmem>>, vector<1x1x64x16xbf16>
    %21 = vector.shape_cast %20 : vector<1x1x64x16xbf16> to vector<64x16xbf16>
    %cst_20 = arith.constant dense<0.000000e+00> : vector<256x16xf32>
    %22 = tpu.matmul %19, %21, %cst_20 {dimension_numbers = #tpu.dot_dimension_numbers<[1], [0], [0], [1], [0, 0, 1, 1], [], []>} : vector<256x64xbf16>, vector<64x16xbf16>, vector<256x16xf32> -> vector<256x16xf32>
    %23 = vector.broadcast %18 : vector<256x1xf32> to vector<256x16xf32>
    %24 = arith.mulf %22, %23 : vector<256x16xf32>
    %25 = arith.truncf %24 : vector<256x16xf32> to vector<256x16xbf16>
    %c0_21 = arith.constant 0 : index
    %c0_22 = arith.constant 0 : index
    %26 = vector.load %arg10[%c0_21, %c0_22] : memref<256x32xbf16, #tpu.memory_space<vmem>>, vector<256x16xbf16>
    tpu.vector_store %arg10[%c0_21, %c0_22], %25 {strides = array<i32>} : memref<256x32xbf16, #tpu.memory_space<vmem>>, vector<256x16xbf16>,
    %c0_23 = arith.constant 0 : index
    %c16 = arith.constant 16 : index
    %27 = vector.load %arg9[%c0_23, %c16] : memref<256x32xbf16, #tpu.memory_space<vmem>>, vector<256x16xbf16>
    %c0_24 = arith.constant 0 : index
    %c1 = arith.constant 1 : index
    %c0_25 = arith.constant 0 : index
    %c0_26 = arith.constant 0 : index
    %28 = vector.load %arg4[%c0_24, %c1, %c0_25, %c0_26] : memref<1x2x64x16xbf16, #tpu.memory_space<vmem>>, vector<1x1x64x16xbf16>
    %29 = vector.shape_cast %28 : vector<1x1x64x16xbf16> to vector<64x16xbf16>
    %cst_27 = arith.constant dense<0.000000e+00> : vector<256x64xf32>
    %30 = tpu.matmul %27, %29, %cst_27 {dimension_numbers = #tpu.dot_dimension_numbers<[1], [1], [0], [0], [0, 0, 1, 0], [], []>} : vector<256x16xbf16>, vector<64x16xbf16>, vector<256x64xf32> -> vector<256x64xf32>
    %cst_28 = arith.constant dense<0xFF800000> : vector<256xf32>
    %31 = vector.multi_reduction <maximumf>, %30, %cst_28 [1] : vector<256x64xf32> to vector<256xf32>
    %32 = vector.shape_cast %31 : vector<256xf32> to vector<256x1xf32>
    %33 = vector.broadcast %32 : vector<256x1xf32> to vector<256x64xf32>
    %34 = arith.subf %30, %33 : vector<256x64xf32>
    %35 = math.exp %34 : vector<256x64xf32>
    %cst_29 = arith.constant dense<0.000000e+00> : vector<256xf32>
    %36 = vector.multi_reduction <add>, %35, %cst_29 [1] : vector<256x64xf32> to vector<256xf32>
    %37 = vector.shape_cast %36 : vector<256xf32> to vector<256x1xf32>
    %cst_30 = arith.constant 1.000000e+00 : f32
    %38 = vector.broadcast %cst_30 : f32 to vector<256x1xf32>
    %39 = arith.divf %38, %37 : vector<256x1xf32>
    %40 = arith.truncf %35 : vector<256x64xf32> to vector<256x64xbf16>
    %c0_31 = arith.constant 0 : index
    %c1_32 = arith.constant 1 : index
    %c0_33 = arith.constant 0 : index
    %c0_34 = arith.constant 0 : index
    %41 = vector.load %arg5[%c0_31, %c1_32, %c0_33, %c0_34] : memref<1x2x64x16xbf16, #tpu.memory_space<vmem>>, vector<1x1x64x16xbf16>
    %42 = vector.shape_cast %41 : vector<1x1x64x16xbf16> to vector<64x16xbf16>
    %cst_35 = arith.constant dense<0.000000e+00> : vector<256x16xf32>
    %43 = tpu.matmul %40, %42, %cst_35 {dimension_numbers = #tpu.dot_dimension_numbers<[1], [0], [0], [1], [0, 0, 1, 1], [], []>} : vector<256x64xbf16>, vector<64x16xbf16>, vector<256x16xf32> -> vector<256x16xf32>
    %44 = vector.broadcast %39 : vector<256x1xf32> to vector<256x16xf32>
    %45 = arith.mulf %43, %44 : vector<256x16xf32>
    %46 = arith.truncf %45 : vector<256x16xf32> to vector<256x16xbf16>
    %c0_36 = arith.constant 0 : index
    %c16_37 = arith.constant 16 : index
    %47 = vector.load %arg10[%c0_36, %c16_37] : memref<256x32xbf16, #tpu.memory_space<vmem>>, vector<256x16xbf16>
    tpu.vector_store %arg10[%c0_36, %c16_37], %46 {strides = array<i32>} : memref<256x32xbf16, #tpu.memory_space<vmem>>, vector<256x16xbf16>,
    %c0_38 = arith.constant 0 : index
    %c0_39 = arith.constant 0 : index
    %48 = vector.load %arg10[%c0_38, %c0_39] : memref<256x32xbf16, #tpu.memory_space<vmem>>, vector<256x32xbf16>
    %c0_40 = arith.constant 0 : index
    %c0_41 = arith.constant 0 : index
    %49 = vector.load %arg6[%c0_40, %c0_41] : memref<32x32xbf16, #tpu.memory_space<vmem>>, vector<32x32xbf16>
    %cst_42 = arith.constant dense<0.000000e+00> : vector<256x32xf32>
    %50 = tpu.matmul %48, %49, %cst_42 {dimension_numbers = #tpu.dot_dimension_numbers<[1], [0], [0], [1], [0, 0, 1, 1], [], []>} : vector<256x32xbf16>, vector<32x32xbf16>, vector<256x32xf32> -> vector<256x32xf32>
    %c0_43 = arith.constant 0 : index
    %c0_44 = arith.constant 0 : index
    %51 = vector.load %arg7[%c0_43, %c0_44] : memref<1x32xf32, #tpu.memory_space<vmem>>, vector<1x32xf32>
    %52 = vector.broadcast %51 : vector<1x32xf32> to vector<256x32xf32>
    %53 = arith.addf %50, %52 : vector<256x32xf32>
    %c0_45 = arith.constant 0 : index
    %c0_46 = arith.constant 0 : index
    %c0_47 = arith.constant 0 : index
    %54 = vector.load %arg8[%c0_45, %c0_46, %c0_47] : memref<1x256x32xf32, #tpu.memory_space<vmem>>, vector<1x256x32xf32>
    %55 = vector.shape_cast %54 : vector<1x256x32xf32> to vector<256x32xf32>
    %56 = vector.shape_cast %53 : vector<256x32xf32> to vector<1x256x32xf32>
    tpu.vector_store %arg8[%c0_45, %c0_46, %c0_47], %56 {strides = array<i32>} : memref<1x256x32xf32, #tpu.memory_space<vmem>>, vector<1x256x32xf32>,
    return
  }
  func.func @transform_0(%arg0: i32, %arg1: i32) -> (i32, i32, i32) {
    %c0_i32 = arith.constant 0 : i32
    %c0_i32_0 = arith.constant 0 : i32
    return %arg0, %arg1, %c0_i32 : i32, i32, i32
  }
  func.func @transform_1(%arg0: i32, %arg1: i32) -> (i32, i32) {
    %c0_i32 = arith.constant 0 : i32
    %c0_i32_0 = arith.constant 0 : i32
    %c0_i32_1 = arith.constant 0 : i32
    return %c0_i32, %c0_i32_0 : i32, i32
  }
  func.func @transform_2(%arg0: i32, %arg1: i32) -> (i32, i32, i32, i32) {
    %c0_i32 = arith.constant 0 : i32
    %c0_i32_0 = arith.constant 0 : i32
    %c0_i32_1 = arith.constant 0 : i32
    %c0_i32_2 = arith.constant 0 : i32
    return %arg0, %c0_i32, %c0_i32_0, %c0_i32_1 : i32, i32, i32, i32
  }
  func.func @transform_3(%arg0: i32, %arg1: i32) -> (i32, i32, i32, i32) {
    %c0_i32 = arith.constant 0 : i32
    %c0_i32_0 = arith.constant 0 : i32
    %c0_i32_1 = arith.constant 0 : i32
    %c0_i32_2 = arith.constant 0 : i32
    return %arg0, %c0_i32, %c0_i32_0, %c0_i32_1 : i32, i32, i32, i32
  }
  func.func @transform_4(%arg0: i32, %arg1: i32) -> (i32, i32) {
    %c0_i32 = arith.constant 0 : i32
    %c0_i32_0 = arith.constant 0 : i32
    %c0_i32_1 = arith.constant 0 : i32
    return %c0_i32, %c0_i32_0 : i32, i32
  }
  func.func @transform_5(%arg0: i32, %arg1: i32) -> (i32, i32) {
    %c0_i32 = arith.constant 0 : i32
    %c0_i32_0 = arith.constant 0 : i32
    %c0_i32_1 = arith.constant 0 : i32
    return %c0_i32, %c0_i32_0 : i32, i32
  }
  func.func @transform_6(%arg0: i32, %arg1: i32) -> (i32, i32, i32) {
    %c0_i32 = arith.constant 0 : i32
    %c0_i32_0 = arith.constant 0 : i32
    return %arg0, %arg1, %c0_i32 : i32, i32, i32
  }
}

</mosaic_0001>

<bundles_post_ra>
// kernel: attention_forward.3
= control target key start
LH: loop header
LB: loop body
LE: loop exit
PB: predicated region body
PF: predicated region fallthrough
CT: control target
= control target key end

     0   :  { %vm211_vm0 = vcmask 257024   ;;  %s472_s1 = inlined_call_operand.vmem [shape: bf16[128,32], index: 1, kind: input, shape index: {}]   ;;  %s473_s2 = inlined_call_operand.vmem [shape: f32[1,32], index: 2, kind: input, shape index: {}]   ;;  %s474_s0 = inlined_call_operand.vmem [shape: bf16[128,128], index: 0, kind: input, shape index: {}]   ;;  %s475_s3 = inlined_call_operand.vmem [shape: bf16[128,32], index: 3, kind: output, shape index: {}]  }
   0x1   :  { %v311_v0 = vld [vmem:[%s472_s1 + $0x38] sm:$0xff]  ;;  %v310_v1 = vld [vmem:[%s472_s1 + $0x30] sm:$0xff]  ;;  %v309_v2 = vld [vmem:[%s472_s1 + $0x28] sm:$0xff] }
   0x2   :  { %146 = vmatpush.bf16.msra.mxu0 %v311_v0  ;;  %312 = vmatpush.bf16.msra.mxu1 %v311_v0  ;;  %v308_v3 = vld [vmem:[%s472_s1 + $0x20] sm:$0xff]  ;;  %v307_v4 = vld [vmem:[%s472_s1 + $0x18] sm:$0xff]  ;;  %v306_v5 = vld [vmem:[%s472_s1 + $0x10] sm:$0xff] }
   0x3   :  { %313 = vmatpush.bf16.msra.mxu2 %v311_v0  ;;  %314 = vmatpush.bf16.msra.mxu3 %v311_v0  ;;  %v305_v6 = vld [vmem:[%s472_s1 + $0x8] sm:$0xff]  ;;  %v304_v7 = vld [vmem:[%s472_s1] sm:$0xff]  ;;  %v298_v9 = vld [vmem:[%s474_s0 + $0x10] sm:$0xff] }
   0x4   :  { %v296_v8 = vld [vmem:[%s474_s0] sm:$0xff]  ;;  %v302_v11 = vld [vmem:[%s474_s0 + $0x30] sm:$0xff]  ;;  %v297_v12 = vld [vmem:[%s474_s0 + $0x8] sm:$0xff] }
   0x5   :  { %v300_v10 = vld [vmem:[%s474_s0 + $0x20] sm:$0xff]  ;;  %v299_v13 = vld [vmem:[%s474_s0 + $0x18] sm:$0xff]  ;;  %v301_v14 = vld [vmem:[%s474_s0 + $0x28] sm:$0xff] }
   0x6   :  { %147 = vmatpush.bf16.msra.mxu0 %v310_v1  ;;  %315 = vmatpush.bf16.msra.mxu1 %v310_v1  ;;  %v303_v15 = vld [vmem:[%s474_s0 + $0x38] sm:$0xff]  ;;  %v336_v16 = vld [vmem:[%s473_s2] ss:$0 sm:$0xff] }
   0x7   :  { %316 = vmatpush.bf16.msra.mxu2 %v310_v1  ;;  %317 = vmatpush.bf16.msra.mxu3 %v310_v1 }
   0xa   :  { %148 = vmatpush.bf16.msra.mxu0 %v309_v2  ;;  %318 = vmatpush.bf16.msra.mxu1 %v309_v2 }
   0xb   :  { %319 = vmatpush.bf16.msra.mxu2 %v309_v2  ;;  %320 = vmatpush.bf16.msra.mxu3 %v309_v2 }
   0xe   :  { %149 = vmatpush.bf16.msra.mxu0 %v308_v3  ;;  %321 = vmatpush.bf16.msra.mxu1 %v308_v3 }
   0xf   :  { %322 = vmatpush.bf16.msra.mxu2 %v308_v3  ;;  %323 = vmatpush.bf16.msra.mxu3 %v308_v3 }
  0x12   :  { %150 = vmatpush.bf16.msra.mxu0 %v307_v4  ;;  %324 = vmatpush.bf16.msra.mxu1 %v307_v4 }
  0x13   :  { %325 = vmatpush.bf16.msra.mxu2 %v307_v4  ;;  %326 = vmatpush.bf16.msra.mxu3 %v307_v4 }
  0x16   :  { %151 = vmatpush.bf16.msra.mxu0 %v306_v5  ;;  %327 = vmatpush.bf16.msra.mxu1 %v306_v5 }
  0x17   :  { %328 = vmatpush.bf16.msra.mxu2 %v306_v5  ;;  %329 = vmatpush.bf16.msra.mxu3 %v306_v5 }
  0x1a   :  { %152 = vmatpush.bf16.msra.mxu0 %v305_v6  ;;  %330 = vmatpush.bf16.msra.mxu1 %v305_v6 }
  0x1b   :  { %331 = vmatpush.bf16.msra.mxu2 %v305_v6  ;;  %332 = vmatpush.bf16.msra.mxu3 %v305_v6 }
  0x1e   :  { %153 = vmatpush.bf16.msra.mxu0 %v304_v7  ;;  %333 = vmatpush.bf16.msra.mxu1 %v304_v7 }
  0x1f   :  { %334 = vmatpush.bf16.msra.mxu2 %v304_v7  ;;  %335 = vmatpush.bf16.msra.mxu3 %v304_v7 }
  0x21   :  { %154 = vmatmul.bf16.vlgmr.msra.gmra.mxu0 %v296_v8  ;;  %164 = vmatmul.bf16.vlgmr.msra.gmra.mxu1 %v298_v9 }
  0x22   :  { %174 = vmatmul.bf16.vlgmr.msra.gmra.mxu2 %v300_v10  ;;  %184 = vmatmul.bf16.vlgmr.msra.gmra.mxu3 %v302_v11 }
  0x31   :  { %159 = vmatmul.bf16.gmra.mxu0 %v297_v12  ;;  %169 = vmatmul.bf16.gmra.mxu1 %v299_v13 }
  0x32   :  { %179 = vmatmul.bf16.gmra.mxu2 %v301_v14  ;;  %189 = vmatmul.bf16.gmra.mxu3 %v303_v15 }
  0x9e   :  { %v155_v17 = vpop.f32.mrf.mxu0  ;;  %v165_v18 = vpop.f32.mrf.mxu1 }
  0x9f   :  { %v156_v19 = vadd.f32 %v336_v16, %v155_v17  ;;  %v166_v20 = vadd.f32 %v336_v16, %v165_v18 }
  0xa1   :  { %v195_v21 = vpack.c.bf16 %v156_v19, %v156_v19  ;;  %v199_v22 = vpack.c.bf16 %v166_v20, %v166_v20 }
  0xa3   :  { %212 = vst.msk [vmem:[%s475_s3] sm:$0xf] %vm211_vm0, %v195_v21 }
  0xa4   :  { %216 = vst.msk [vmem:[%s475_s3 + $0x10] sm:$0xf] %vm211_vm0, %v199_v22 }
  0xa5   :  { %v175_v23 = vpop.f32.mrf.mxu2  ;;  %v185_v24 = vpop.f32.mrf.mxu3 }
  0xa6   :  { %v176_v25 = vadd.f32 %v336_v16, %v175_v23  ;;  %v186_v26 = vadd.f32 %v336_v16, %v185_v24  ;;  %v157_v27 = vpop.f32.mrf.mxu0  ;;  %v167_v28 = vpop.f32.mrf.mxu1 }
  0xa7   :  { %v158_v29 = vadd.f32 %v336_v16, %v157_v27  ;;  %v168_v30 = vadd.f32 %v336_v16, %v167_v28 }
  0xa8   :  { %v203_v31 = vpack.c.bf16 %v176_v25, %v176_v25  ;;  %v207_v32 = vpack.c.bf16 %v186_v26, %v186_v26 }
  0xa9   :  { %v196_v33 = vpack.c.bf16 %v158_v29, %v158_v29  ;;  %v200_v34 = vpack.c.bf16 %v168_v30, %v168_v30 }
  0xaa   :  { %220 = vst.msk [vmem:[%s475_s3 + $0x20] sm:$0xf] %vm211_vm0, %v203_v31 }
  0xab   :  { %224 = vst.msk [vmem:[%s475_s3 + $0x30] sm:$0xf] %vm211_vm0, %v207_v32 }
  0xac   :  { %213 = vst.msk [vmem:[%s475_s3 + $0x4] sm:$0xf] %vm211_vm0, %v196_v33 }
  0xad   :  { %217 = vst.msk [vmem:[%s475_s3 + $0x14] sm:$0xf] %vm211_vm0, %v200_v34  ;;  %v177_v35 = vpop.f32.mrf.mxu2  ;;  %v187_v36 = vpop.f32.mrf.mxu3 }
  0xae   :  { %v178_v37 = vadd.f32 %v336_v16, %v177_v35  ;;  %v188_v38 = vadd.f32 %v336_v16, %v187_v36  ;;  %v160_v39 = vpop.f32.mrf.mxu0  ;;  %v170_v40 = vpop.f32.mrf.mxu1 }
  0xaf   :  { %v161_v41 = vadd.f32 %v336_v16, %v160_v39  ;;  %v171_v42 = vadd.f32 %v336_v16, %v170_v40 }
  0xb0   :  { %v204_v43 = vpack.c.bf16 %v178_v37, %v178_v37  ;;  %v208_v44 = vpack.c.bf16 %v188_v38, %v188_v38 }
  0xb1   :  { %v197_v45 = vpack.c.bf16 %v161_v41, %v161_v41  ;;  %v201_v46 = vpack.c.bf16 %v171_v42, %v171_v42 }
  0xb2   :  { %221 = vst.msk [vmem:[%s475_s3 + $0x24] sm:$0xf] %vm211_vm0, %v204_v43 }
  0xb3   :  { %225 = vst.msk [vmem:[%s475_s3 + $0x34] sm:$0xf] %vm211_vm0, %v208_v44 }
  0xb4   :  { %214 = vst.msk [vmem:[%s475_s3 + $0x8] sm:$0xf] %vm211_vm0, %v197_v45 }
  0xb5   :  { %218 = vst.msk [vmem:[%s475_s3 + $0x18] sm:$0xf] %vm211_vm0, %v201_v46  ;;  %v180_v47 = vpop.f32.mrf.mxu2  ;;  %v190_v48 = vpop.f32.mrf.mxu3 }
  0xb6   :  { %v181_v49 = vadd.f32 %v336_v16, %v180_v47  ;;  %v191_v50 = vadd.f32 %v336_v16, %v190_v48  ;;  %v162_v51 = vpop.f32.mrf.mxu0  ;;  %v172_v52 = vpop.f32.mrf.mxu1 }
  0xb7   :  { %v163_v53 = vadd.f32 %v336_v16, %v162_v51  ;;  %v173_v54 = vadd.f32 %v336_v16, %v172_v52 }
  0xb8   :  { %v205_v55 = vpack.c.bf16 %v181_v49, %v181_v49  ;;  %v209_v56 = vpack.c.bf16 %v191_v50, %v191_v50 }
  0xb9   :  { %v198_v57 = vpack.c.bf16 %v163_v53, %v163_v53  ;;  %v202_v58 = vpack.c.bf16 %v173_v54, %v173_v54 }
  0xba   :  { %222 = vst.msk [vmem:[%s475_s3 + $0x28] sm:$0xf] %vm211_vm0, %v205_v55 }
  0xbb   :  { %226 = vst.msk [vmem:[%s475_s3 + $0x38] sm:$0xf] %vm211_vm0, %v209_v56 }
  0xbc   :  { %215 = vst.msk [vmem:[%s475_s3 + $0xc] sm:$0xf] %vm211_vm0, %v198_v57 }
  0xbd   :  { %219 = vst.msk [vmem:[%s475_s3 + $0x1c] sm:$0xf] %vm211_vm0, %v202_v58  ;;  %v182_v59 = vpop.f32.mrf.mxu2  ;;  %v192_v60 = vpop.f32.mrf.mxu3 }
  0xbe   :  { %v183_v61 = vadd.f32 %v336_v16, %v182_v59  ;;  %v193_v62 = vadd.f32 %v336_v16, %v192_v60 }
  0xc0   :  { %v206_v63 = vpack.c.bf16 %v183_v61, %v183_v61  ;;  %v210_v0 = vpack.c.bf16 %v193_v62, %v193_v62 }
  0xc2   :  { %223 = vst.msk [vmem:[%s475_s3 + $0x2c] sm:$0xf] %vm211_vm0, %v206_v63 }
  0xc3   :  { %227 = vst.msk [vmem:[%s475_s3 + $0x3c] sm:$0xf] %vm211_vm0, %v210_v0 }

// kernel: attention_forward.4
= control target key start
LH: loop header
LB: loop body
LE: loop exit
PB: predicated region body
PF: predicated region fallthrough
CT: control target
= control target key end

     0   :  { %vm50_vm0 = vcmask 261120   ;;  %v684_v40 = vmov 32.0   ;;  %s1357_s0 = inlined_call_operand.vmem [shape: bf16[128,32], index: 0, kind: input, shape index: {}]   ;;  %s1358_s1 = inlined_call_operand.vmem [shape: f32[1,32], index: 1, kind: input, shape index: {}]   ;;  %s1359_s2 = inlined_call_operand.vmem [shape: f32[1,32], index: 2, kind: input, shape index: {}]   ;;  %s1360_s3 = inlined_call_operand.vmem [shape: bf16[32,64], index: 3, kind: input, shape index: {}]   ;;  %s1361_s4 = inlined_call_operand.vmem [shape: bf16[128,64], index: 4, kind: output, shape index: {}]  }
   0x1   :  { %v713_v0 = vld [vmem:[%s1357_s0 + $0x30] sm:$0xff]   ;;  %v718_v1 = vld [vmem:[%s1357_s0 + $0x20] sm:$0xff]   ;;  %v757_v16 = vld [vmem:[%s1357_s0 + $0x28] sm:$0xff]   ;;  %650 = vrcp.f32 %v684_v40 }
   0x2   :  { %v723_v2 = vld [vmem:[%s1357_s0] sm:$0xff]   ;;  %v628_v3 = vunpack.c.l.bf16 %v713_v0  ;;  %v620_v4 = vunpack.c.l.bf16 %v718_v1  ;;  %v629_v9 = vunpack.c.h.bf16 %v713_v0  ;;  %v621_v10 = vunpack.c.h.bf16 %v718_v1  ;;  %v752_v15 = vld [vmem:[%s1357_s0 + $0x10] sm:$0xff]   ;;  %v774_v23 = vld [vmem:[%s1357_s0 + $0x38] sm:$0xff]  }
   0x3   :  { %v604_v5 = vunpack.c.l.bf16 %v723_v2  ;;  %v605_v11 = vunpack.c.h.bf16 %v723_v2  ;;  %v612_v17 = vunpack.c.l.bf16 %v752_v15  ;;  %v613_v18 = vunpack.c.h.bf16 %v752_v15  ;;  %v791_v30 = vld [vmem:[%s1357_s0 + $0x8] sm:$0xff]   ;;  %v796_v31 = vld [vmem:[%s1357_s0 + $0x18] sm:$0xff]  }
   0x4   :  { %v87_v6 = vsel %vm50_vm0, %v628_v3, 0.0  ;;  %v75_v7 = vsel %vm50_vm0, %v620_v4, 0.0  ;;  %v90_v12 = vsel %vm50_vm0, %v629_v9, 0.0  ;;  %v78_v13 = vsel %vm50_vm0, %v621_v10, 0.0 }
   0x5   :  { %v51_v8 = vsel %vm50_vm0, %v604_v5, 0.0  ;;  %88 = vadd.xlane.f32.xlu1 %v87_v6  ;;  %76 = vadd.xlane.f32.xlu0 %v75_v7  ;;  %v54_v14 = vsel %vm50_vm0, %v605_v11, 0.0  ;;  %v624_v19 = vunpack.c.l.bf16 %v757_v16  ;;  %v63_v20 = vsel %vm50_vm0, %v612_v17, 0.0 }
   0x6   :  { %52 = vadd.xlane.f32.xlu2 %v51_v8  ;;  %v66_v21 = vsel %vm50_vm0, %v613_v18, 0.0  ;;  %v625_v24 = vunpack.c.h.bf16 %v757_v16  ;;  %v632_v25 = vunpack.c.l.bf16 %v774_v23  ;;  %v633_v26 = vunpack.c.h.bf16 %v774_v23 }
   0x7   :  { %v81_v22 = vsel %vm50_vm0, %v624_v19, 0.0  ;;  %v608_v32 = vunpack.c.l.bf16 %v791_v30  ;;  %v609_v33 = vunpack.c.h.bf16 %v791_v30  ;;  %v616_v34 = vunpack.c.l.bf16 %v796_v31  ;;  %v651_v41 = vpop.eup %650 }
   0x8   :  { %v84_v27 = vsel %vm50_vm0, %v625_v24, 0.0  ;;  %v93_v28 = vsel %vm50_vm0, %v632_v25, 0.0  ;;  %v96_v29 = vsel %vm50_vm0, %v633_v26, 0.0  ;;  %v617_v38 = vunpack.c.h.bf16 %v796_v31  ;;  %v601_v31 = vld [vmem:[%s1360_s3 + $0x8] sm:$0xff] }
   0x9   :  { %v57_v35 = vsel %vm50_vm0, %v608_v32, 0.0  ;;  %v60_v36 = vsel %vm50_vm0, %v609_v33, 0.0  ;;  %v69_v37 = vsel %vm50_vm0, %v616_v34, 0.0  ;;  %v100_v42 = vmul.f32 32.0, %v651_v41  ;;  %642 = vmatpush.bf16.msra.mxu2 %v601_v31  ;;  %643 = vmatpush.bf16.msra.mxu3 %v601_v31 }
   0xa   :  { %v72_v39 = vsel %vm50_vm0, %v617_v38, 0.0  ;;  %vm104_vm1 = vweird.f32 %v651_v41  ;;  %504 = vmatpush.bf16.msra.mxu0 %v601_v31  ;;  %641 = vmatpush.bf16.msra.mxu1 %v601_v31 }
   0xb   :  { %v101_v43 = vsub.f32 1.0, %v100_v42 }
   0xd   :  { %91 = vadd.xlane.f32.xlu1 %v90_v12  ;;  %79 = vadd.xlane.f32.xlu0 %v78_v13  ;;  %v102_v44 = vmul.f32 %v651_v41, %v101_v43 }
   0xe   :  { %55 = vadd.xlane.f32.xlu2 %v54_v14 }
   0xf   :  { %v103_v45 = vadd.f32 %v651_v41, %v102_v44 }
  0x11   :  { %v814_v46 = vsel %vm104_vm1, %v651_v41, %v103_v45 }
  0x15   :  { %64 = vadd.xlane.f32.xlu0 %v63_v20  ;;  %67 = vadd.xlane.f32.xlu1 %v66_v21 }
  0x16   :  { %82 = vadd.xlane.f32.xlu2 %v81_v22 }
  0x1d   :  { %85 = vadd.xlane.f32.xlu0 %v84_v27  ;;  %94 = vadd.xlane.f32.xlu1 %v93_v28 }
  0x1e   :  { %97 = vadd.xlane.f32.xlu2 %v96_v29 }
  0x25   :  { %58 = vadd.xlane.f32.xlu0 %v57_v35  ;;  %61 = vadd.xlane.f32.xlu1 %v60_v36 }
  0x26   :  { %70 = vadd.xlane.f32.xlu2 %v69_v37 }
  0x2d   :  { %73 = vadd.xlane.f32.xlu0 %v72_v39 }
  0x78   :  { %v89_v47 = vpop.xlane.xlu1 %88  ;;  %v77_v48 = vpop.xlane.xlu0 %76 }
  0x79   :  { %v118_v49 = vmul.f32 %v814_v46, %v89_v47  ;;  %v114_v50 = vmul.f32 %v814_v46, %v77_v48  ;;  %v53_v51 = vpop.xlane.xlu2 %52 }
  0x7b   :  { %v820_v52 = vsub.f32 %v628_v3, %v118_v49  ;;  %v824_v53 = vsub.f32 %v620_v4, %v114_v50  ;;  %v106_v3 = vmul.f32 %v814_v46, %v53_v51 }
  0x7d   :  { %v146_v54 = vmul.f32 %v824_v53, %v824_v53  ;;  %v150_v55 = vmul.f32 %v820_v52, %v820_v52  ;;  %v856_v0 = vsub.f32 %v604_v5, %v106_v3 }
  0x7f   :  { %v178_v56 = vsel %vm50_vm0, %v146_v54, 0.0  ;;  %v190_v57 = vsel %vm50_vm0, %v150_v55, 0.0  ;;  %v138_v27 = vmul.f32 %v856_v0, %v856_v0 }
  0x80   :  { %v92_v58 = vpop.xlane.xlu1 %91  ;;  %v80_v59 = vpop.xlane.xlu0 %79  ;;  %179 = vadd.xlane.f32.xlu1 %v178_v56  ;;  %191 = vadd.xlane.f32.xlu0 %v190_v57 }
  0x81   :  { %v119_v60 = vmul.f32 %v814_v46, %v92_v58  ;;  %v115_v61 = vmul.f32 %v814_v46, %v80_v59  ;;  %v56_v62 = vpop.xlane.xlu2 %55  ;;  %v154_v37 = vsel %vm50_vm0, %v138_v27, 0.0 }
  0x82   :  { %v107_v63 = vmul.f32 %v814_v46, %v56_v62 }
  0x83   :  { %v838_v4 = vsub.f32 %v629_v9, %v119_v60  ;;  %v842_v6 = vsub.f32 %v621_v10, %v115_v61 }
  0x84   :  { %v846_v7 = vsub.f32 %v605_v11, %v107_v63 }
  0x85   :  { %v151_v8 = vmul.f32 %v838_v4, %v838_v4  ;;  %v147_v12 = vmul.f32 %v842_v6, %v842_v6 }
  0x86   :  { %v139_v13 = vmul.f32 %v846_v7, %v846_v7 }
  0x87   :  { %v193_v1 = vsel %vm50_vm0, %v151_v8, 0.0  ;;  %v181_v9 = vsel %vm50_vm0, %v147_v12, 0.0 }
  0x88   :  { %v65_v10 = vpop.xlane.xlu0 %64  ;;  %194 = vadd.xlane.f32.xlu1 %v193_v1  ;;  %182 = vadd.xlane.f32.xlu2 %v181_v9  ;;  %v157_v11 = vsel %vm50_vm0, %v139_v13, 0.0  ;;  %v68_v14 = vpop.xlane.xlu1 %67 }
  0x89   :  { %v110_v20 = vmul.f32 %v814_v46, %v65_v10  ;;  %158 = vadd.xlane.f32.xlu0 %v157_v11  ;;  %v83_v21 = vpop.xlane.xlu2 %82  ;;  %v111_v22 = vmul.f32 %v814_v46, %v68_v14 }
  0x8a   :  { %v116_v2 = vmul.f32 %v814_v46, %v83_v21 }
  0x8b   :  { %v866_v5 = vsub.f32 %v612_v17, %v110_v20  ;;  %v876_v29 = vsub.f32 %v613_v18, %v111_v22 }
  0x8c   :  { %v872_v28 = vsub.f32 %v624_v19, %v116_v2 }
  0x8d   :  { %v142_v35 = vmul.f32 %v866_v5, %v866_v5  ;;  %v143_v42 = vmul.f32 %v876_v29, %v876_v29 }
  0x8e   :  { %v148_v36 = vmul.f32 %v872_v28, %v872_v28 }
  0x8f   :  { %v166_v17 = vsel %vm50_vm0, %v142_v35, 0.0  ;;  %v169_v49 = vsel %vm50_vm0, %v143_v42, 0.0 }
  0x90   :  { %v86_v39 = vpop.xlane.xlu0 %85  ;;  %167 = vadd.xlane.f32.xlu1 %v166_v17  ;;  %155 = vadd.xlane.f32.xlu2 %v154_v37  ;;  %v184_v19 = vsel %vm50_vm0, %v148_v36, 0.0  ;;  %v95_v40 = vpop.xlane.xlu1 %94  ;;  %v600_v36 = vld [vmem:[%s1360_s3] sm:$0xff] }
  0x91   :  { %v117_v15 = vmul.f32 %v814_v46, %v86_v39  ;;  %185 = vadd.xlane.f32.xlu0 %v184_v19  ;;  %v98_v18 = vpop.xlane.xlu2 %97  ;;  %v120_v41 = vmul.f32 %v814_v46, %v95_v40  ;;  %645 = vmatpush.bf16.msra.mxu2 %v600_v36 }
  0x92   :  { %v121_v43 = vmul.f32 %v814_v46, %v98_v18  ;;  %646 = vmatpush.bf16.msra.mxu3 %v600_v36  ;;  %505 = vmatpush.bf16.msra.mxu0 %v600_v36 }
  0x93   :  { %v892_v44 = vsub.f32 %v625_v24, %v117_v15  ;;  %v900_v47 = vsub.f32 %v632_v25, %v120_v41  ;;  %644 = vmatpush.bf16.msra.mxu1 %v600_v36 }
  0x94   :  { %v896_v45 = vsub.f32 %v633_v26, %v121_v43 }
  0x95   :  { %v149_v48 = vmul.f32 %v892_v44, %v892_v44  ;;  %v152_v55 = vmul.f32 %v900_v47, %v900_v47 }
  0x96   :  { %v153_v50 = vmul.f32 %v896_v45, %v896_v45 }
  0x97   :  { %v187_v16 = vsel %vm50_vm0, %v149_v48, 0.0  ;;  %v196_v61 = vsel %vm50_vm0, %v152_v55, 0.0 }
  0x98   :  { %188 = vadd.xlane.f32.xlu1 %v187_v16  ;;  %v59_v24 = vpop.xlane.xlu0 %58  ;;  %170 = vadd.xlane.f32.xlu2 %v169_v49  ;;  %v199_v26 = vsel %vm50_vm0, %v153_v50, 0.0  ;;  %v62_v51 = vpop.xlane.xlu1 %61 }
  0x99   :  { %v108_v23 = vmul.f32 %v814_v46, %v59_v24  ;;  %200 = vadd.xlane.f32.xlu0 %v199_v26  ;;  %v71_v25 = vpop.xlane.xlu2 %70  ;;  %v109_v54 = vmul.f32 %v814_v46, %v62_v51 }
  0x9a   :  { %v112_v56 = vmul.f32 %v814_v46, %v71_v25 }
  0x9b   :  { %v916_v57 = vsub.f32 %v608_v32, %v108_v23  ;;  %v924_v59 = vsub.f32 %v609_v33, %v109_v54 }
  0x9c   :  { %v920_v58 = vsub.f32 %v616_v34, %v112_v56 }
  0x9d   :  { %v140_v60 = vmul.f32 %v916_v57, %v916_v57  ;;  %v141_v30 = vmul.f32 %v924_v59, %v924_v59 }
  0x9e   :  { %v144_v62 = vmul.f32 %v920_v58, %v920_v58 }
  0x9f   :  { %v160_v63 = vsel %vm50_vm0, %v140_v60, 0.0  ;;  %v163_v12 = vsel %vm50_vm0, %v141_v30, 0.0 }
  0xa0   :  { %161 = vadd.xlane.f32.xlu1 %v160_v63  ;;  %v74_v32 = vpop.xlane.xlu0 %73  ;;  %197 = vadd.xlane.f32.xlu2 %v196_v61  ;;  %v172_v34 = vsel %vm50_vm0, %v144_v62, 0.0 }
  0xa1   :  { %v113_v3 = vmul.f32 %v814_v46, %v74_v32  ;;  %173 = vadd.xlane.f32.xlu0 %v172_v34 }
  0xa3   :  { %v938_v33 = vsub.f32 %v617_v38, %v113_v3 }
  0xa5   :  { %v145_v8 = vmul.f32 %v938_v33, %v938_v33 }
  0xa7   :  { %v175_v13 = vsel %vm50_vm0, %v145_v8, 0.0 }
  0xa8   :  { %176 = vadd.xlane.f32.xlu1 %v175_v13  ;;  %164 = vadd.xlane.f32.xlu2 %v163_v12 }
  0xf3   :  { %v180_v1 = vpop.xlane.xlu1 %179  ;;  %v192_v9 = vpop.xlane.xlu0 %191 }
  0xf4   :  { %v210_v10 = vmul.f32 %v180_v1, %v814_v46  ;;  %v214_v11 = vmul.f32 %v192_v9, %v814_v46 }
  0xf6   :  { %v226_v14 = vadd.f32 1e-05, %v210_v10  ;;  %v230_v20 = vadd.f32 1e-05, %v214_v11 }
  0xf8   :  { %652 = vrsqrt.f32 %v226_v14  ;;  %vm320_vm4 = vweird.f32 %v226_v14  ;;  %vm360_vm6 = vweird.f32 %v230_v20 }
  0xf9   :  { %654 = vrsqrt.f32 %v230_v20 }
  0xfb   :  { %v195_v38 = vpop.xlane.xlu1 %194  ;;  %v183_v21 = vpop.xlane.xlu2 %182 }
  0xfc   :  { %v215_v22 = vmul.f32 %v195_v38, %v814_v46  ;;  %v159_v2 = vpop.xlane.xlu0 %158  ;;  %v211_v27 = vmul.f32 %v183_v21, %v814_v46 }
  0xfd   :  { %v203_v35 = vmul.f32 %v159_v2, %v814_v46 }
  0xfe   :  { %v955_v17 = vpop.eup %652  ;;  %v957_v37 = vadd.f32 1e-05, %v215_v22  ;;  %v959_v39 = vadd.f32 1e-05, %v211_v27 }
  0xff   :  { %v961_v19 = vpop.eup %654  ;;  %v315_v40 = vmul.f32 %v955_v17, %v226_v14  ;;  %v964_v15 = vadd.f32 1e-05, %v203_v35  ;;  %vm321_vm2 = vweird.f32 %v955_v17 }
 0x100   :  { %v355_v18 = vmul.f32 %v961_v19, %v230_v20  ;;  %656 = vrsqrt.f32 %v957_v37  ;;  %vm361_vm3 = vweird.f32 %v961_v19  ;;  %vm998_vm5 = vmor %vm320_vm4, %vm321_vm2  ;;  %vm370_vm8 = vweird.f32 %v957_v37 }
 0x101   :  { %v316_v41 = vmul.f32 %v955_v17, %v315_v40  ;;  %658 = vrsqrt.f32 %v964_v15  ;;  %vm1005_vm7 = vmor %vm360_vm6, %vm361_vm3  ;;  %vm250_vm9 = vweird.f32 %v964_v15  ;;  %vm330_vm11 = vweird.f32 %v959_v39 }
 0x102   :  { %v356_v42 = vmul.f32 %v961_v19, %v355_v18  ;;  %660 = vrsqrt.f32 %v959_v39 }
 0x103   :  { %v317_v43 = vmul.f32 0.5, %v316_v41  ;;  %v168_v48 = vpop.xlane.xlu1 %167  ;;  %v156_v49 = vpop.xlane.xlu2 %155 }
 0x104   :  { %v357_v50 = vmul.f32 0.5, %v356_v42  ;;  %v206_v16 = vmul.f32 %v168_v48, %v814_v46  ;;  %v186_v24 = vpop.xlane.xlu0 %185  ;;  %v202_v26 = vmul.f32 %v156_v49, %v814_v46 }
 0x105   :  { %v318_v51 = vsub.f32 1.5, %v317_v43  ;;  %v212_v23 = vmul.f32 %v186_v24, %v814_v46  ;;  %v1034_v43 = vld [vmem:[%s1358_s1] ss:$0 sm:$0xff] }
 0x106   :  { %v975_v25 = vpop.eup %656  ;;  %v358_v54 = vsub.f32 1.5, %v357_v50  ;;  %v978_v55 = vadd.f32 1e-05, %v206_v16  ;;  %v987_v62 = vadd.f32 1e-05, %v202_v26 }
 0x107   :  { %v980_v56 = vpop.eup %658  ;;  %v365_v60 = vmul.f32 %v975_v25, %v957_v37  ;;  %v985_v61 = vadd.f32 1e-05, %v212_v23  ;;  %v319_v32 = vmul.f32 %v955_v17, %v318_v51  ;;  %vm371_vm12 = vweird.f32 %v975_v25 }
 0x108   :  { %v661_v63 = vpop.eup %660  ;;  %v359_v34 = vmul.f32 %v961_v19, %v358_v54  ;;  %v245_v3 = vmul.f32 %v980_v56, %v964_v15  ;;  %662 = vrsqrt.f32 %v978_v55  ;;  %vm251_vm14 = vweird.f32 %v980_v56  ;;  %vm1068_vm2 = vmor %vm370_vm8, %vm371_vm12 }
 0x109   :  { %v366_v30 = vmul.f32 %v975_v25, %v365_v60  ;;  %v325_v8 = vmul.f32 %v661_v63, %v959_v39  ;;  %664 = vrsqrt.f32 %v985_v61  ;;  %v323_v31 = vsel %vm998_vm5, %v955_v17, %v319_v32  ;;  %vm1090_vm5 = vmor %vm250_vm9, %vm251_vm14 }
 0x10a   :  { %v246_v13 = vmul.f32 %v980_v56, %v245_v3  ;;  %v363_v20 = vsel %vm1005_vm7, %v961_v19, %v359_v34  ;;  %666 = vrsqrt.f32 %v987_v62  ;;  %vm331_vm10 = vweird.f32 %v661_v63 }
 0x10b   :  { %v367_v9 = vmul.f32 0.5, %v366_v30  ;;  %v326_v10 = vmul.f32 %v661_v63, %v325_v8  ;;  %v189_v11 = vpop.xlane.xlu1 %188  ;;  %v171_v14 = vpop.xlane.xlu2 %170  ;;  %v402_v18 = vmul.f32 %v323_v31, %v824_v53  ;;  %v406_v41 = vmul.f32 %v363_v20, %v820_v52  ;;  %vm332_vm13 = vmor %vm330_vm11, %vm331_vm10 }
 0x10c   :  { %v201_v38 = vpop.xlane.xlu0 %200  ;;  %v247_v21 = vmul.f32 0.5, %v246_v13  ;;  %v213_v2 = vmul.f32 %v189_v11, %v814_v46  ;;  %v207_v17 = vmul.f32 %v171_v14, %v814_v46  ;;  %vm280_vm15 = vweird.f32 %v978_v55 }
 0x10d   :  { %v327_v22 = vmul.f32 0.5, %v326_v10  ;;  %v217_v27 = vmul.f32 %v201_v38, %v814_v46  ;;  %v368_v36 = vsub.f32 1.5, %v367_v9  ;;  %vm340_vm1 = vweird.f32 %v985_v61 }
 0x10e   :  { %v1019_v35 = vpop.eup %662  ;;  %v1029_v42 = vadd.f32 1e-05, %v213_v2  ;;  %v248_v49 = vsub.f32 1.5, %v247_v21  ;;  %v1048_v26 = vadd.f32 1e-05, %v207_v17  ;;  %v422_v30 = vmul.f32 %v1034_v43, %v402_v18 }
 0x10f   :  { %v328_v40 = vsub.f32 1.5, %v327_v22  ;;  %v275_v19 = vmul.f32 %v1019_v35, %v978_v55  ;;  %v1036_v48 = vpop.eup %664  ;;  %v1039_v24 = vadd.f32 1e-05, %v217_v27  ;;  %v369_v52 = vmul.f32 %v975_v25, %v368_v36 }
 0x110   :  { %v1041_v53 = vpop.eup %666  ;;  %v335_v39 = vmul.f32 %v1036_v48, %v985_v61  ;;  %668 = vrsqrt.f32 %v1029_v42  ;;  %v1073_v8 = vmul.f32 %v980_v56, %v248_v49  ;;  %vm240_vm3 = vweird.f32 %v987_v62 }
 0x111   :  { %v329_v50 = vmul.f32 %v661_v63, %v328_v40  ;;  %v276_v16 = vmul.f32 %v1019_v35, %v275_v19  ;;  %v235_v54 = vmul.f32 %v1041_v53, %v987_v62  ;;  %670 = vrsqrt.f32 %v1039_v24 }
 0x112   :  { %v336_v32 = vmul.f32 %v1036_v48, %v335_v39  ;;  %v426_v1 = vmul.f32 %v1034_v43, %v406_v41  ;;  %v373_v37 = vsel %vm1068_vm2, %v975_v25, %v369_v52  ;;  %672 = vrsqrt.f32 %v1048_v26 }
 0x113   :  { %v333_v51 = vsel %vm332_vm13, %v661_v63, %v329_v50  ;;  %v277_v23 = vmul.f32 0.5, %v276_v16  ;;  %v162_v34 = vpop.xlane.xlu1 %161  ;;  %v1062_v63 = vld [vmem:[%s1359_s2] ss:$0 sm:$0xff]  ;;  %v236_v12 = vmul.f32 %v1041_v53, %v235_v54  ;;  %v198_v13 = vpop.xlane.xlu2 %197  ;;  %vm281_vm4 = vweird.f32 %v1019_v35 }
 0x114   :  { %v403_v60 = vmul.f32 %v333_v51, %v842_v6  ;;  %v174_v3 = vpop.xlane.xlu0 %173  ;;  %v337_v10 = vmul.f32 0.5, %v336_v32  ;;  %v204_v14 = vmul.f32 %v162_v34, %v814_v46  ;;  %v216_v38 = vmul.f32 %v198_v13, %v814_v46  ;;  %vm1132_vm9 = vmor %vm280_vm15, %vm281_vm4 }
 0x115   :  { %v278_v9 = vsub.f32 1.5, %v277_v23  ;;  %v237_v11 = vmul.f32 0.5, %v236_v12  ;;  %v208_v31 = vmul.f32 %v174_v3, %v814_v46  ;;  %v442_v22 = vadd.f32 %v1062_v63, %v422_v30 }
 0x116   :  { %v338_v25 = vsub.f32 1.5, %v337_v10  ;;  %v423_v21 = vmul.f32 %v1034_v43, %v403_v60  ;;  %v407_v2 = vmul.f32 %v373_v37, %v838_v4  ;;  %v253_v27 = vsel %vm1090_vm5, %v980_v56, %v1073_v8  ;;  %v1104_v17 = vpop.eup %668 }
 0x117   :  { %v238_v36 = vsub.f32 1.5, %v237_v11  ;;  %v1102_v15 = vadd.f32 1e-05, %v204_v14  ;;  %v1107_v40 = vmul.f32 %v1019_v35, %v278_v9  ;;  %vm341_vm6 = vweird.f32 %v1036_v48  ;;  %v1113_v4 = vpop.eup %670 }
 0x118   :  { %vm241_vm7 = vweird.f32 %v1041_v53  ;;  %v1111_v19 = vadd.f32 1e-05, %v208_v31  ;;  %v345_v41 = vmul.f32 %v1104_v17, %v1029_v42  ;;  %v1119_v49 = vadd.f32 1e-05, %v216_v38  ;;  %v1121_v50 = vpop.eup %672  ;;  %vm1161_vm14 = vmor %vm340_vm1, %vm341_vm6 }
 0x119   :  { %v239_v18 = vmul.f32 %v1041_v53, %v238_v36  ;;  %674 = vrsqrt.f32 %v1102_v15  ;;  %v339_v16 = vmul.f32 %v1036_v48, %v338_v25  ;;  %vm350_vm8 = vweird.f32 %v1029_v42  ;;  %vm1150_vm12 = vmor %vm240_vm3, %vm241_vm7 }
 0x11a   :  { %v385_v52 = vmul.f32 %v1113_v4, %v1039_v24  ;;  %v443_v39 = vadd.f32 %v1062_v63, %v423_v21  ;;  %v346_v23 = vmul.f32 %v1104_v17, %v345_v41  ;;  %vm390_vm10 = vweird.f32 %v1039_v24 }
 0x11b   :  { %v285_v54 = vmul.f32 %v1121_v50, %v1048_v26  ;;  %vm290_vm11 = vweird.f32 %v1048_v26  ;;  %v427_v60 = vmul.f32 %v1034_v43, %v407_v2  ;;  %v283_v55 = vsel %vm1132_vm9, %v1019_v35, %v1107_v40  ;;  %v177_v3 = vpop.xlane.xlu1 %176  ;;  %v165_v12 = vpop.xlane.xlu2 %164 }
 0x11c   :  { %vm351_vm13 = vweird.f32 %v1104_v17  ;;  %v386_v34 = vmul.f32 %v1113_v4, %v385_v52  ;;  %676 = vrsqrt.f32 %v1111_v19  ;;  %v243_v62 = vsel %vm1150_vm12, %v1041_v53, %v239_v18 }
 0x11d   :  { %v347_v30 = vmul.f32 0.5, %v346_v23  ;;  %v286_v6 = vmul.f32 %v1121_v50, %v285_v54  ;;  %678 = vrsqrt.f32 %v1119_v49  ;;  %v343_v13 = vsel %vm1161_vm14, %v1036_v48, %v339_v16  ;;  %vm1191_vm1 = vmor %vm350_vm8, %vm351_vm13 }
 0x11e   :  { %v387_v37 = vmul.f32 0.5, %v386_v34  ;;  %v454_v61 = vpack.c.bf16 %v443_v39, %v442_v22  ;;  %v446_v9 = vadd.f32 %v1062_v63, %v426_v1  ;;  %v447_v53 = vadd.f32 %v1062_v63, %v427_v60 }
 0x11f   :  { %v1174_v10 = vpop.eup %674  ;;  %v348_v11 = vsub.f32 1.5, %v347_v30  ;;  %v287_v14 = vmul.f32 0.5, %v286_v6  ;;  %v209_v31 = vmul.f32 %v177_v3, %v814_v46  ;;  %v394_v25 = vmul.f32 %v243_v62, %v856_v0 }
 0x120   :  { %v388_v38 = vsub.f32 1.5, %v387_v37  ;;  %v255_v21 = vmul.f32 %v1174_v10, %v1102_v15  ;;  %596 = vmatmul.msk.bf16.vlgmr.msra.gmra.mxu2 %vm50_vm0, %v454_v61  ;;  %v205_v48 = vmul.f32 %v165_v12, %v814_v46  ;;  %vm291_vm15 = vweird.f32 %v1121_v50 }
 0x121   :  { %v349_v1 = vmul.f32 %v1104_v17, %v348_v11  ;;  %v288_v22 = vsub.f32 1.5, %v287_v14  ;;  %v456_v2 = vpack.c.bf16 %v447_v53, %v446_v9  ;;  %vm391_vm2 = vweird.f32 %v1113_v4  ;;  %vm292_vm3 = vmor %vm290_vm11, %vm291_vm15 }
 0x122   :  { %v1185_v36 = vpop.eup %676  ;;  %v389_v40 = vmul.f32 %v1113_v4, %v388_v38  ;;  %v256_v46 = vmul.f32 %v1174_v10, %v255_v21  ;;  %v1198_v18 = vadd.f32 1e-05, %v209_v31  ;;  %v1207_v39 = vadd.f32 1e-05, %v205_v48  ;;  %vm1230_vm4 = vmor %vm390_vm10, %vm391_vm2 }
 0x123   :  { %v679_v41 = vpop.eup %678  ;;  %v353_v16 = vsel %vm1191_vm1, %v1104_v17, %v349_v1  ;;  %v289_v52 = vmul.f32 %v1121_v50, %v288_v22  ;;  %v295_v42 = vmul.f32 %v1185_v36, %v1111_v19  ;;  %598 = vmatmul.msk.bf16.vlgmr.msra.gmra.mxu3 %vm50_vm0, %v456_v2  ;;  %v395_v51 = vmul.f32 %v253_v27, %v846_v7 }
 0x124   :  { %v398_v23 = vmul.f32 %v283_v55, %v866_v5  ;;  %v375_v17 = vmul.f32 %v679_v41, %v1119_v49  ;;  %v414_v54 = vmul.f32 %v1034_v43, %v394_v25  ;;  %v404_v60 = vmul.f32 %v343_v13, %v872_v28 }
 0x125   :  { %v405_v32 = vmul.f32 %v353_v16, %v892_v44  ;;  %v293_v20 = vsel %vm292_vm3, %v1121_v50, %v289_v52  ;;  %v296_v56 = vmul.f32 %v1185_v36, %v295_v42  ;;  %v257_v26 = vmul.f32 0.5, %v256_v46 }
 0x126   :  { %v399_v5 = vmul.f32 %v293_v20, %v876_v29  ;;  %v376_v8 = vmul.f32 %v679_v41, %v375_v17  ;;  %680 = vrsqrt.f32 %v1198_v18  ;;  %v393_v28 = vsel %vm1230_vm4, %v1113_v4, %v389_v40 }
 0x127   :  { %v297_v44 = vmul.f32 0.5, %v296_v56  ;;  %vm300_vm5 = vweird.f32 %v1111_v19  ;;  %682 = vrsqrt.f32 %v1207_v39  ;;  %vm381_vm6 = vweird.f32 %v679_v41 }
 0x128   :  { %v377_v24 = vmul.f32 0.5, %v376_v8  ;;  %v415_v27 = vmul.f32 %v1034_v43, %v395_v51  ;;  %v434_v50 = vadd.f32 %v1062_v63, %v414_v54  ;;  %v418_v55 = vmul.f32 %v1034_v43, %v398_v23 }
 0x129   :  { %v298_v29 = vsub.f32 1.5, %v297_v44  ;;  %v419_v34 = vmul.f32 %v1034_v43, %v399_v5  ;;  %v424_v3 = vmul.f32 %v1034_v43, %v404_v60  ;;  %v258_v35 = vsub.f32 1.5, %v257_v26 }
 0x12a   :  { %v378_v4 = vsub.f32 1.5, %v377_v24  ;;  %v435_v62 = vadd.f32 %v1062_v63, %v415_v27  ;;  %v425_v30 = vmul.f32 %v1034_v43, %v405_v32  ;;  %v409_v6 = vmul.f32 %v393_v28, %v896_v45 }
 0x12b   :  { %vm380_vm7 = vweird.f32 %v1119_v49  ;;  %v438_v12 = vadd.f32 %v1062_v63, %v418_v55  ;;  %v439_v13 = vadd.f32 %v1062_v63, %v419_v34  ;;  %vm301_vm8 = vweird.f32 %v1185_v36 }
 0x12c   :  { %v681_v37 = vpop.eup %680  ;;  %v379_v61 = vmul.f32 %v679_v41, %v378_v4  ;;  %v450_v9 = vpack.c.bf16 %v435_v62, %v434_v50  ;;  %v445_v11 = vadd.f32 %v1062_v63, %v425_v30  ;;  %v299_v53 = vmul.f32 %v1185_v36, %v298_v29  ;;  %vm382_vm9 = vmor %vm380_vm7, %vm381_vm6 }
 0x12d   :  { %v683_v14 = vpop.eup %682  ;;  %v305_v45 = vmul.f32 %v681_v37, %v1198_v18  ;;  %v452_v31 = vpack.c.bf16 %v439_v13, %v438_v12  ;;  %v444_v49 = vadd.f32 %v1062_v63, %v424_v3  ;;  %v259_v25 = vmul.f32 %v1174_v10, %v258_v35  ;;  %vm302_vm12 = vmor %vm300_vm5, %vm301_vm8 }
 0x12e   :  { %vm261_vm10 = vweird.f32 %v1174_v10  ;;  %v383_v38 = vsel %vm382_vm9, %v679_v41, %v379_v61  ;;  %v265_v21 = vmul.f32 %v683_v14, %v1207_v39  ;;  %592 = vmatmul.msk.bf16.vlgmr.msra.gmra.mxu0 %vm50_vm0, %v450_v9  ;;  %v429_v2 = vmul.f32 %v1034_v43, %v409_v6 }
 0x12f   :  { %v408_v48 = vmul.f32 %v383_v38, %v900_v47  ;;  %v306_v1 = vmul.f32 %v681_v37, %v305_v45  ;;  %594 = vmatmul.msk.bf16.vlgmr.msra.gmra.mxu1 %vm50_vm0, %v452_v31  ;;  %v455_v22 = vpack.c.bf16 %v445_v11, %v444_v49  ;;  %vm260_vm11 = vweird.f32 %v1102_v15 }
 0x130   :  { %v266_v0 = vmul.f32 %v683_v14, %v265_v21  ;;  %vm262_vm13 = vmor %vm260_vm11, %vm261_vm10  ;;  %v303_v40 = vsel %vm302_vm12, %v1185_v36, %v299_v53  ;;  %vm311_vm14 = vweird.f32 %v681_v37  ;;  %v449_v42 = vadd.f32 %v1062_v63, %v429_v2 }
 0x131   :  { %v307_v46 = vmul.f32 0.5, %v306_v1  ;;  %597 = vmatmul.msk.bf16.gmra.mxu2 %vm50_vm0, %v455_v22  ;;  %v428_v47 = vmul.f32 %v1034_v43, %v408_v48  ;;  %v263_v41 = vsel %vm262_vm13, %v1174_v10, %v259_v25  ;;  %v400_v19 = vmul.f32 %v303_v40, %v920_v58 }
 0x132   :  { %v267_v16 = vmul.f32 0.5, %v266_v0  ;;  %vm271_vm15 = vweird.f32 %v683_v14  ;;  %v396_v36 = vmul.f32 %v263_v41, %v916_v57  ;;  %vm310_vm1 = vweird.f32 %v1198_v18 }
 0x133   :  { %v308_v52 = vsub.f32 1.5, %v307_v46  ;;  %v448_v15 = vadd.f32 %v1062_v63, %v428_v47  ;;  %vm312_vm2 = vmor %vm310_vm1, %vm311_vm14  ;;  %vm270_vm3 = vweird.f32 %v1207_v39  ;;  %v420_v58 = vmul.f32 %v1034_v43, %v400_v19 }
 0x134   :  { %v268_v51 = vsub.f32 1.5, %v267_v16  ;;  %vm272_vm4 = vmor %vm270_vm3, %vm271_vm15  ;;  %v416_v57 = vmul.f32 %v1034_v43, %v396_v36  ;;  %vm563_vm5 = vcmask 519168  }
 0x135   :  { %v309_v23 = vmul.f32 %v681_v37, %v308_v52  ;;  %v457_v17 = vpack.c.bf16 %v449_v42, %v448_v15  ;;  %v440_v7 = vadd.f32 %v1062_v63, %v420_v58 }
 0x136   :  { %v269_v54 = vmul.f32 %v683_v14, %v268_v51  ;;  %v436_v5 = vadd.f32 %v1062_v63, %v416_v57 }
 0x137   :  { %v313_v10 = vsel %vm312_vm2, %v681_v37, %v309_v23  ;;  %599 = vmatmul.msk.bf16.gmra.mxu3 %vm50_vm0, %v457_v17 }
 0x138   :  { %v401_v60 = vmul.f32 %v313_v10, %v938_v33  ;;  %v273_v32 = vsel %vm272_vm4, %v683_v14, %v269_v54 }
 0x139   :  { %v397_v20 = vmul.f32 %v273_v32, %v924_v59 }
 0x13a   :  { %v421_v18 = vmul.f32 %v1034_v43, %v401_v60 }
 0x13b   :  { %v417_v56 = vmul.f32 %v1034_v43, %v397_v20 }
 0x13c   :  { %v441_v39 = vadd.f32 %v1062_v63, %v421_v18 }
 0x13d   :  { %v437_v26 = vadd.f32 %v1062_v63, %v417_v56 }
 0x13e   :  { %v453_v33 = vpack.c.bf16 %v441_v39, %v440_v7 }
 0x13f   :  { %v451_v8 = vpack.c.bf16 %v437_v26, %v436_v5 }
 0x140   :  { %595 = vmatmul.msk.bf16.gmra.mxu1 %vm50_vm0, %v453_v33 }
 0x141   :  { %593 = vmatmul.msk.bf16.gmra.mxu0 %vm50_vm0, %v451_v8 }
 0x1a3   :  { %v527_v59 = vpop.f32.mrf.mxu2 }
 0x1a4   :  { %v555_v28 = vpack.c.bf16 %v527_v59, %v527_v59 }
 0x1a6   :  { %572 = vst.msk [vmem:[%s1361_s4 + $0x20] sm:$0xf] %vm563_vm5, %v555_v28  ;;  %v537_v43 = vpop.f32.mrf.mxu3 }
 0x1a7   :  { %v559_v44 = vpack.c.bf16 %v537_v43, %v537_v43 }
 0x1a9   :  { %576 = vst.msk [vmem:[%s1361_s4 + $0x30] sm:$0xf] %vm563_vm5, %v559_v44 }
 0x1ab   :  { %v507_v63 = vpop.f32.mrf.mxu0  ;;  %v529_v24 = vpop.f32.mrf.mxu2 }
 0x1ac   :  { %v547_v27 = vpack.c.bf16 %v507_v63, %v507_v63  ;;  %v556_v50 = vpack.c.bf16 %v529_v24, %v529_v24  ;;  %v517_v29 = vpop.f32.mrf.mxu1 }
 0x1ad   :  { %v551_v55 = vpack.c.bf16 %v517_v29, %v517_v29 }
 0x1ae   :  { %564 = vst.msk [vmem:[%s1361_s4] sm:$0xf] %vm563_vm5, %v547_v27  ;;  %v539_v34 = vpop.f32.mrf.mxu3 }
 0x1af   :  { %573 = vst.msk [vmem:[%s1361_s4 + $0x24] sm:$0xf] %vm563_vm5, %v556_v50  ;;  %v560_v3 = vpack.c.bf16 %v539_v34, %v539_v34 }
 0x1b0   :  { %568 = vst.msk [vmem:[%s1361_s4 + $0x10] sm:$0xf] %vm563_vm5, %v551_v55 }
 0x1b1   :  { %577 = vst.msk [vmem:[%s1361_s4 + $0x34] sm:$0xf] %vm563_vm5, %v560_v3 }
 0x1b3   :  { %v509_v35 = vpop.f32.mrf.mxu0 }
 0x1b4   :  { %v548_v4 = vpack.c.bf16 %v509_v35, %v509_v35  ;;  %v532_v62 = vpop.f32.mrf.mxu2  ;;  %v519_v30 = vpop.f32.mrf.mxu1 }
 0x1b5   :  { %v557_v6 = vpack.c.bf16 %v532_v62, %v532_v62  ;;  %v552_v12 = vpack.c.bf16 %v519_v30, %v519_v30 }
 0x1b6   :  { %565 = vst.msk [vmem:[%s1361_s4 + $0x4] sm:$0xf] %vm563_vm5, %v548_v4 }
 0x1b7   :  { %574 = vst.msk [vmem:[%s1361_s4 + $0x28] sm:$0xf] %vm563_vm5, %v557_v6 }
 0x1b8   :  { %569 = vst.msk [vmem:[%s1361_s4 + $0x14] sm:$0xf] %vm563_vm5, %v552_v12 }
 0x1ba   :  { %v542_v13 = vpop.f32.mrf.mxu3 }
 0x1bb   :  { %v561_v37 = vpack.c.bf16 %v542_v13, %v542_v13 }
 0x1bc   :  { %v534_v61 = vpop.f32.mrf.mxu2 }
 0x1bd   :  { %v558_v9 = vpack.c.bf16 %v534_v61, %v534_v61  ;;  %578 = vst.msk [vmem:[%s1361_s4 + $0x38] sm:$0xf] %vm563_vm5, %v561_v37  ;;  %v522_v11 = vpop.f32.mrf.mxu1 }
 0x1be   :  { %v512_v14 = vpop.f32.mrf.mxu0  ;;  %v553_v53 = vpack.c.bf16 %v522_v11, %v522_v11 }
 0x1bf   :  { %575 = vst.msk [vmem:[%s1361_s4 + $0x2c] sm:$0xf] %vm563_vm5, %v558_v9  ;;  %v549_v45 = vpack.c.bf16 %v512_v14, %v512_v14 }
 0x1c0   :  { %570 = vst.msk [vmem:[%s1361_s4 + $0x18] sm:$0xf] %vm563_vm5, %v553_v53 }
 0x1c1   :  { %566 = vst.msk [vmem:[%s1361_s4 + $0x8] sm:$0xf] %vm563_vm5, %v549_v45 }
 0x1c2   :  { %v544_v31 = vpop.f32.mrf.mxu3 }
 0x1c3   :  { %v562_v49 = vpack.c.bf16 %v544_v31, %v544_v31 }
 0x1c5   :  { %579 = vst.msk [vmem:[%s1361_s4 + $0x3c] sm:$0xf] %vm563_vm5, %v562_v49  ;;  %v524_v25 = vpop.f32.mrf.mxu1 }
 0x1c6   :  { %v514_v38 = vpop.f32.mrf.mxu0  ;;  %v554_v21 = vpack.c.bf16 %v524_v25, %v524_v25 }
 0x1c7   :  { %v550_v48 = vpack.c.bf16 %v514_v38, %v514_v38 }
 0x1c8   :  { %571 = vst.msk [vmem:[%s1361_s4 + $0x1c] sm:$0xf] %vm563_vm5, %v554_v21 }
 0x1c9   :  { %567 = vst.msk [vmem:[%s1361_s4 + $0xc] sm:$0xf] %vm563_vm5, %v550_v48 }

// kernel: attention_forward.5
= control target key start
LH: loop header
LB: loop body
LE: loop exit
PB: predicated region body
PF: predicated region fallthrough
CT: control target
= control target key end

     0   :  { %s4820_s21 = smov 0   ;;  %s4822_s22 = smov 0   ;;  %s6608_s0 = inlined_call_operand.vmem [shape: bf16[2,256,32], index: 0, kind: input, shape index: {}]   ;;  %s6609_s1 = inlined_call_operand.vmem [shape: bf16[32,32], index: 1, kind: input, shape index: {}]   ;;  %s6610_s2 = inlined_call_operand.vmem [shape: bf16[2,2,64,16], index: 2, kind: input, shape index: {}]   ;;  %s6611_s3 = inlined_call_operand.vmem [shape: bf16[2,2,64,16], index: 3, kind: input, shape index: {}]   ;;  %s6612_s4 = inlined_call_operand.vmem [shape: bf16[32,32], index: 4, kind: input, shape index: {}]   ;;  %s6613_s5 = inlined_call_operand.vmem [shape: f32[1,32], index: 5, kind: input, shape index: {}]   ;;  %s6614_s6 = inlined_call_operand.vmem [shape: f32[2,256,32], index: 6, kind: output, shape index: {}]  }
   0x1   :  { %s4824_s23 = smov 0  }
   0x2 LB: > { %s28_s24 = sadd.s32 1, %s4777_s22  ;;  %p3921_p0 = scmp.ge.s32.totalorder %s4781_s23, 1  ;;  %s4781_s23 = sphi %s4824_s23, %s16_s23   ;;  %s4777_s22 = sphi %s4822_s22, %s6658_s22   ;;  %s4773_s21 = sphi %s4820_s21, %s6657_s21  }
   0x3   : > { %p30_p1 = scmp.ge.s32.totalorder %s28_s24, 2  ;;  %p253_p2 = scmp.lt.s32.totalorder %s4781_s23, 3 }
   0x5   : > { %s6660_s24 = smov (%p30_p1, %s28_s24), 0  ;;  %p254_p3 = pnand %p3921_p0, %p253_p2 }
   0x6   : > { %p302_p4 = scmp.lt.s32.totalorder (!%p254_p3), %s4773_s21, 1  ;;  %s4783_s13 = smov (!%p254_p3), 112  }
   0x7   : > { %257 = sbr.rel (%p254_p3) target bundleno = 1468 (0x5bc), region = 44  ;;  %s4784_s17 = smov (!%p254_p3), 16  }
   0xc   : > { %v4401_v0 = vld [vmem:[%s6609_s1 + $0x8] sm:$0xff]  ;;  %v4400_v1 = vld [vmem:[%s6609_s1] sm:$0xff]  ;;  %s6662_s21 = smov (!%p302_p4, %s4773_s21), 1  ;;  %vm460_vm0 = vcmask 261120   ;;  %vm803_vm1 = vcmask 130048   ;;  %vm630_vm2 = vcmask 257024  }
   0xd   : > { %515 = vmatpush.bf16.msra.mxu0 %v4401_v0  ;;  %4468 = vmatpush.bf16.msra.mxu3 %v4401_v0  ;;  %s4380_s29 = sshll.u32 %s6662_s21, 7  ;;  %s4381_s9 = sshll.u32 %s6662_s21, 6  ;;  %vm953_vm3 = vcmask 523264   ;;  %vm1971_vm10 = vcmask 125952  }
   0xe   : > { %s4850_s8 = scalar_lea.vmem %s6608_s0, %s4380_s29  ;;  %s4880_s12 = scalar_lea.vmem %s6610_s2, %s4381_s9 }
   0xf   : > { %v4384_v2 = vld [vmem:[%s4850_s8] sm:$0xff]  ;;  %v4393_v3 = vld [vmem:[%s4850_s8 + $0x48] sm:$0xff]  ;;  %v4394_v5 = vld [vmem:[%s4850_s8 + $0x50] sm:$0xff]  ;;  %s5050_s16 = scalar_lea.vmem %s6611_s3, %s4381_s9  ;;  %s4383_s26 = sshll.u32 %s6662_s21, 8 }
  0x10   : > { %v4385_v4 = vld [vmem:[%s4850_s8 + $0x8] sm:$0xff]  ;;  %v4386_v6 = vld [vmem:[%s4850_s8 + $0x10] sm:$0xff]  ;;  %v4395_v7 = vld [vmem:[%s4850_s8 + $0x58] sm:$0xff]  ;;  %s6379_s7 = scalar_lea.vmem %s6614_s6, %s4383_s26 }
  0x11   : > { %516 = vmatpush.bf16.msra.mxu0 %v4400_v1  ;;  %4469 = vmatpush.bf16.msra.mxu3 %v4400_v1  ;;  %v4387_v8 = vld [vmem:[%s4850_s8 + $0x18] sm:$0xff]  ;;  %v4396_v9 = vld [vmem:[%s4850_s8 + $0x60] sm:$0xff]  ;;  %v4397_v11 = vld [vmem:[%s4850_s8 + $0x68] sm:$0xff] }
  0x12   : > { %v4388_v10 = vld [vmem:[%s4850_s8 + $0x20] sm:$0xff]  ;;  %v4389_v12 = vld [vmem:[%s4850_s8 + $0x28] sm:$0xff]  ;;  %v4398_v13 = vld [vmem:[%s4850_s8 + $0x70] sm:$0xff] }
  0x13   : > { %v4421_v14 = vld [vmem:[%s4880_s12 + $0x18] sm:$0xff]  ;;  %v4420_v16 = vld [vmem:[%s4880_s12 + $0x10] sm:$0xff]  ;;  %v4419_v20 = vld [vmem:[%s4880_s12 + $0x8] sm:$0xff] }
  0x14   : > { %4002 = vmatmul.msk.bf16.vlgmr.msra.gmra.mxu0 %vm460_vm0, %v4384_v2  ;;  %4011 = vmatmul.msk.bf16.vlgmr.msra.gmra.mxu3 %vm460_vm0, %v4393_v3  ;;  %v862_v15 = vsel %vm803_vm1, %v4421_v14, 0  ;;  %v859_v17 = vsel %vm803_vm1, %v4420_v16, 0  ;;  %v4390_v18 = vld [vmem:[%s4850_s8 + $0x30] sm:$0xff]  ;;  %v4399_v19 = vld [vmem:[%s4850_s8 + $0x78] sm:$0xff]  ;;  %v856_v21 = vsel %vm803_vm1, %v4419_v20, 0  ;;  %v4418_v22 = vld [vmem:[%s4880_s12] sm:$0xff] }
  0x15   : > { %868 = vmatpush.bf16.xpose.msra.mxu1 %v862_v15  ;;  %v853_v23 = vsel %vm803_vm1, %v4418_v22, 0  ;;  %v4391_v24 = vld [vmem:[%s4850_s8 + $0x38] sm:$0xff]  ;;  %v4392_v25 = vld [vmem:[%s4850_s8 + $0x40] sm:$0xff]  ;;  %v4444_v56 = vld [vmem:[%s4880_s12 + $0x30] sm:$0xff] }
  0x16   : > { %v4445_v38 = vld [vmem:[%s4880_s12 + $0x38] sm:$0xff]  ;;  %v2232_v57 = vsel %vm803_vm1, %v4444_v56, 0  ;;  %v4443_v16 = vld [vmem:[%s4880_s12 + $0x28] sm:$0xff] }
  0x17   : > { %v2235_v39 = vsel %vm803_vm1, %v4445_v38, 0 }
  0x18   : > { %2241 = vmatpush.bf16.xpose.msrb.mxu3 %v2235_v39 }
  0x1d   : > { %869 = vmatpush.bf16.xpose.msra.mxu1 %v859_v17  ;;  %v2229_v17 = vsel %vm803_vm1, %v4443_v16, 0 }
  0x20   : > { %2242 = vmatpush.bf16.xpose.msrb.mxu3 %v2232_v57 }
  0x24   : > { %4003 = vmatmul.msk.bf16.gmra.mxu0 %vm460_vm0, %v4385_v4  ;;  %4012 = vmatmul.msk.bf16.gmra.mxu3 %vm460_vm0, %v4394_v5 }
  0x25   : > { %870 = vmatpush.bf16.xpose.msra.mxu1 %v856_v21 }
  0x28   : > { %2243 = vmatpush.bf16.xpose.msrb.mxu3 %v2229_v17 }
  0x2d   : > { %871 = vmatpush.bf16.xpose.msra.mxu1 %v853_v23 }
  0x34   : > { %4004 = vmatmul.msk.bf16.gmra.mxu0 %vm460_vm0, %v4386_v6  ;;  %4013 = vmatmul.msk.bf16.gmra.mxu3 %vm460_vm0, %v4395_v7 }
  0x44   : > { %4005 = vmatmul.msk.bf16.gmra.mxu0 %vm460_vm0, %v4387_v8  ;;  %4014 = vmatmul.msk.bf16.gmra.mxu3 %vm460_vm0, %v4396_v9 }
  0x54   : > { %4006 = vmatmul.msk.bf16.gmra.mxu0 %vm460_vm0, %v4388_v10  ;;  %4015 = vmatmul.msk.bf16.gmra.mxu3 %vm460_vm0, %v4397_v11 }
  0x64   : > { %4007 = vmatmul.msk.bf16.gmra.mxu0 %vm460_vm0, %v4389_v12  ;;  %4016 = vmatmul.msk.bf16.gmra.mxu3 %vm460_vm0, %v4398_v13 }
  0x74   : > { %4008 = vmatmul.msk.bf16.gmra.mxu0 %vm460_vm0, %v4390_v18  ;;  %4017 = vmatmul.msk.bf16.gmra.mxu3 %vm460_vm0, %v4399_v19 }
  0x84   : > { %4009 = vmatmul.msk.bf16.gmra.mxu0 %vm460_vm0, %v4391_v24 }
  0x91   : > { %v518_v26 = vpop.f32.mrf.mxu0 }
  0x92   : > { %v598_v27 = vpack.c.bf16 %v518_v26, %v518_v26 }
  0x94   : > { %631 = vst.msk [vmem:[#allocation2] sm:$0xf] %vm630_vm2, %v598_v27  ;;  %4010 = vmatmul.msk.bf16.gmra.mxu0 %vm460_vm0, %v4392_v25 }
  0x97   : > { %v563_v28 = vpop.f32.mrf.mxu3 }
  0x98   : > { %v616_v29 = vpack.c.bf16 %v563_v28, %v563_v28 }
  0x99   : > { %v520_v30 = vpop.f32.mrf.mxu0 }
  0x9a   : > { %v599_v31 = vpack.c.bf16 %v520_v30, %v520_v30  ;;  %649 = vst.msk [vmem:[#allocation2 + $0x48] sm:$0xf] %vm630_vm2, %v616_v29  ;;  %v4442_v29 = vld [vmem:[%s4880_s12 + $0x20] sm:$0xff] }
  0x9c   : > { %632 = vst.msk [vmem:[#allocation2 + $0x4] sm:$0xf] %vm630_vm2, %v599_v31 }
  0x9f   : > { %v565_v32 = vpop.f32.mrf.mxu3 }
  0xa0   : > { %v617_v33 = vpack.c.bf16 %v565_v32, %v565_v32  ;;  %v2226_v32 = vsel %vm803_vm1, %v4442_v29, 0 }
  0xa1   : > { %v523_v34 = vpop.f32.mrf.mxu0  ;;  %2244 = vmatpush.bf16.xpose.msrb.mxu3 %v2226_v32 }
  0xa2   : > { %v600_v35 = vpack.c.bf16 %v523_v34, %v523_v34  ;;  %650 = vst.msk [vmem:[#allocation2 + $0x4c] sm:$0xf] %vm630_vm2, %v617_v33 }
  0xa3   : > { %v4426_v36 = vld [vmem:[#allocation2] sm:$0xff] }
  0xa4   : > { %v4402_v37 = vld [vmem:[#allocation2] sm:$0xff]  ;;  %633 = vst.msk [vmem:[#allocation2 + $0x8] sm:$0xf] %vm630_vm2, %v600_v35  ;;  %2125 = vrot.lane.b32.xlu0 %v4426_v36, %s4783_s13 }
  0xa5   : > { %4098 = vmatmul.msk.bf16.vlgmr.msra.gmra.mxu1 %vm803_vm1, %v4402_v37 }
  0xa7   : > { %v568_v40 = vpop.f32.mrf.mxu3 }
  0xa8   : > { %v618_v41 = vpack.c.bf16 %v568_v40, %v568_v40 }
  0xa9   : > { %v525_v42 = vpop.f32.mrf.mxu0  ;;  %v4435_v43 = vld [vmem:[#allocation2 + $0x48] sm:$0xff] }
  0xaa   : > { %v601_v44 = vpack.c.bf16 %v525_v42, %v525_v42  ;;  %651 = vst.msk [vmem:[#allocation2 + $0x50] sm:$0xf] %vm630_vm2, %v618_v41 }
  0xac   : > { %634 = vst.msk [vmem:[#allocation2 + $0xc] sm:$0xf] %vm630_vm2, %v601_v44  ;;  %2143 = vrot.lane.b32.xlu0 %v4435_v43, %s4783_s13 }
  0xaf   : > { %v570_v45 = vpop.f32.mrf.mxu3 }
  0xb0   : > { %v619_v46 = vpack.c.bf16 %v570_v45, %v570_v45 }
  0xb1   : > { %v528_v47 = vpop.f32.mrf.mxu0 }
  0xb2   : > { %v602_v48 = vpack.c.bf16 %v528_v47, %v528_v47  ;;  %652 = vst.msk [vmem:[#allocation2 + $0x54] sm:$0xf] %vm630_vm2, %v619_v46 }
  0xb3   : > { %v4427_v49 = vld [vmem:[#allocation2 + $0x8] sm:$0xff] }
  0xb4   : > { %v4403_v50 = vld [vmem:[#allocation2 + $0x8] sm:$0xff]  ;;  %635 = vst.msk [vmem:[#allocation2 + $0x10] sm:$0xf] %vm630_vm2, %v602_v48  ;;  %2127 = vrot.lane.b32.xlu0 %v4427_v49, %s4783_s13 }
  0xb5   : > { %4099 = vmatmul.msk.bf16.gmra.mxu1 %vm803_vm1, %v4403_v50 }
  0xb7   : > { %v573_v51 = vpop.f32.mrf.mxu3 }
  0xb8   : > { %v620_v52 = vpack.c.bf16 %v573_v51, %v573_v51 }
  0xb9   : > { %v530_v53 = vpop.f32.mrf.mxu0  ;;  %v4436_v54 = vld [vmem:[#allocation2 + $0x50] sm:$0xff] }
  0xba   : > { %v603_v55 = vpack.c.bf16 %v530_v53, %v530_v53  ;;  %653 = vst.msk [vmem:[#allocation2 + $0x58] sm:$0xf] %vm630_vm2, %v620_v52  ;;  %2145 = vrot.lane.b32.xlu1 %v4436_v54, %s4783_s13 }
  0xbc   : > { %636 = vst.msk [vmem:[#allocation2 + $0x14] sm:$0xf] %vm630_vm2, %v603_v55 }
  0xbf   : > { %v575_v58 = vpop.f32.mrf.mxu3 }
  0xc0   : > { %v621_v59 = vpack.c.bf16 %v575_v58, %v575_v58 }
  0xc1   : > { %v533_v60 = vpop.f32.mrf.mxu0 }
  0xc2   : > { %v604_v61 = vpack.c.bf16 %v533_v60, %v533_v60  ;;  %654 = vst.msk [vmem:[#allocation2 + $0x5c] sm:$0xf] %vm630_vm2, %v621_v59 }
  0xc3   : > { %v4428_v62 = vld [vmem:[#allocation2 + $0x10] sm:$0xff] }
  0xc4   : > { %v4404_v63 = vld [vmem:[#allocation2 + $0x10] sm:$0xff]  ;;  %637 = vst.msk [vmem:[#allocation2 + $0x18] sm:$0xf] %vm630_vm2, %v604_v61  ;;  %2129 = vrot.lane.b32.xlu1 %v4428_v62, %s4783_s13 }
  0xc5   : > { %4100 = vmatmul.msk.bf16.gmra.mxu1 %vm803_vm1, %v4404_v63 }
  0xc7   : > { %v578_v0 = vpop.f32.mrf.mxu3 }
  0xc8   : > { %v622_v1 = vpack.c.bf16 %v578_v0, %v578_v0 }
  0xc9   : > { %v535_v2 = vpop.f32.mrf.mxu0  ;;  %v4437_v3 = vld [vmem:[#allocation2 + $0x58] sm:$0xff] }
  0xca   : > { %v605_v4 = vpack.c.bf16 %v535_v2, %v535_v2  ;;  %655 = vst.msk [vmem:[#allocation2 + $0x60] sm:$0xf] %vm630_vm2, %v622_v1  ;;  %2147 = vrot.lane.b32.xlu2 %v4437_v3, %s4783_s13  ;;  %v4411_v2 = vld [vmem:[#allocation2 + $0x48] sm:$0xff] }
  0xcc   : > { %638 = vst.msk [vmem:[#allocation2 + $0x1c] sm:$0xf] %vm630_vm2, %v605_v4 }
  0xcf   : > { %v580_v5 = vpop.f32.mrf.mxu3 }
  0xd0   : > { %v623_v6 = vpack.c.bf16 %v580_v5, %v580_v5 }
  0xd1   : > { %v538_v7 = vpop.f32.mrf.mxu0 }
  0xd2   : > { %v606_v8 = vpack.c.bf16 %v538_v7, %v538_v7  ;;  %656 = vst.msk [vmem:[#allocation2 + $0x64] sm:$0xf] %vm630_vm2, %v623_v6 }
  0xd3   : > { %v4429_v9 = vld [vmem:[#allocation2 + $0x18] sm:$0xff] }
  0xd4   : > { %v4405_v10 = vld [vmem:[#allocation2 + $0x18] sm:$0xff]  ;;  %639 = vst.msk [vmem:[#allocation2 + $0x20] sm:$0xf] %vm630_vm2, %v606_v8  ;;  %2131 = vrot.lane.b32.xlu1 %v4429_v9, %s4783_s13  ;;  %v4412_v9 = vld [vmem:[#allocation2 + $0x50] sm:$0xff] }
  0xd5   : > { %4101 = vmatmul.msk.bf16.gmra.mxu1 %vm803_vm1, %v4405_v10 }
  0xd7   : > { %v583_v11 = vpop.f32.mrf.mxu3 }
  0xd8   : > { %v624_v12 = vpack.c.bf16 %v583_v11, %v583_v11 }
  0xd9   : > { %v540_v13 = vpop.f32.mrf.mxu0  ;;  %v4438_v14 = vld [vmem:[#allocation2 + $0x60] sm:$0xff] }
  0xda   : > { %v607_v15 = vpack.c.bf16 %v540_v13, %v540_v13  ;;  %657 = vst.msk [vmem:[#allocation2 + $0x68] sm:$0xf] %vm630_vm2, %v624_v12  ;;  %2149 = vrot.lane.b32.xlu2 %v4438_v14, %s4783_s13 }
  0xdc   : > { %640 = vst.msk [vmem:[#allocation2 + $0x24] sm:$0xf] %vm630_vm2, %v607_v15 }
  0xdf   : > { %v585_v18 = vpop.f32.mrf.mxu3 }
  0xe0   : > { %v625_v19 = vpack.c.bf16 %v585_v18, %v585_v18  ;;  %v4413_v18 = vld [vmem:[#allocation2 + $0x58] sm:$0xff] }
  0xe1   : > { %v543_v20 = vpop.f32.mrf.mxu0 }
  0xe2   : > { %v608_v21 = vpack.c.bf16 %v543_v20, %v543_v20  ;;  %658 = vst.msk [vmem:[#allocation2 + $0x6c] sm:$0xf] %vm630_vm2, %v625_v19 }
  0xe3   : > { %v4430_v22 = vld [vmem:[#allocation2 + $0x20] sm:$0xff] }
  0xe4   : > { %v4406_v23 = vld [vmem:[#allocation2 + $0x20] sm:$0xff]  ;;  %641 = vst.msk [vmem:[#allocation2 + $0x28] sm:$0xf] %vm630_vm2, %v608_v21  ;;  %2133 = vrot.lane.b32.xlu2 %v4430_v22, %s4783_s13 }
  0xe5   : > { %4102 = vmatmul.msk.bf16.gmra.mxu1 %vm803_vm1, %v4406_v23 }
  0xe7   : > { %v588_v24 = vpop.f32.mrf.mxu3 }
  0xe8   : > { %v626_v25 = vpack.c.bf16 %v588_v24, %v588_v24 }
  0xe9   : > { %v545_v26 = vpop.f32.mrf.mxu0  ;;  %v4439_v27 = vld [vmem:[#allocation2 + $0x68] sm:$0xff] }
  0xea   : > { %v609_v28 = vpack.c.bf16 %v545_v26, %v545_v26  ;;  %659 = vst.msk [vmem:[#allocation2 + $0x70] sm:$0xf] %vm630_vm2, %v626_v25  ;;  %2151 = vrot.lane.b32.xlu1 %v4439_v27, %s4783_s13  ;;  %v4414_v25 = vld [vmem:[#allocation2 + $0x60] sm:$0xff] }
  0xec   : > { %642 = vst.msk [vmem:[#allocation2 + $0x2c] sm:$0xf] %vm630_vm2, %v609_v28 }
  0xef   : > { %v590_v30 = vpop.f32.mrf.mxu3 }
  0xf0   : > { %v627_v31 = vpack.c.bf16 %v590_v30, %v590_v30 }
  0xf1   : > { %v548_v33 = vpop.f32.mrf.mxu0 }
  0xf2   : > { %v610_v34 = vpack.c.bf16 %v548_v33, %v548_v33  ;;  %660 = vst.msk [vmem:[#allocation2 + $0x74] sm:$0xf] %vm630_vm2, %v627_v31  ;;  %v4415_v31 = vld [vmem:[#allocation2 + $0x68] sm:$0xff] }
  0xf3   : > { %v4431_v35 = vld [vmem:[#allocation2 + $0x28] sm:$0xff] }
  0xf4   : > { %v4407_v36 = vld [vmem:[#allocation2 + $0x28] sm:$0xff]  ;;  %643 = vst.msk [vmem:[#allocation2 + $0x30] sm:$0xf] %vm630_vm2, %v610_v34  ;;  %2135 = vrot.lane.b32.xlu2 %v4431_v35, %s4783_s13 }
  0xf5   : > { %4103 = vmatmul.msk.bf16.gmra.mxu1 %vm803_vm1, %v4407_v36 }
  0xf7   : > { %v593_v37 = vpop.f32.mrf.mxu3 }
  0xf8   : > { %v628_v38 = vpack.c.bf16 %v593_v37, %v593_v37 }
  0xf9   : > { %v550_v39 = vpop.f32.mrf.mxu0  ;;  %v4440_v40 = vld [vmem:[#allocation2 + $0x70] sm:$0xff] }
  0xfa   : > { %v611_v41 = vpack.c.bf16 %v550_v39, %v550_v39  ;;  %661 = vst.msk [vmem:[#allocation2 + $0x78] sm:$0xf] %vm630_vm2, %v628_v38  ;;  %v4416_v38 = vld [vmem:[#allocation2 + $0x70] sm:$0xff] }
  0xfc   : > { %644 = vst.msk [vmem:[#allocation2 + $0x34] sm:$0xf] %vm630_vm2, %v611_v41  ;;  %2153 = vrot.lane.b32.xlu2 %v4440_v40, %s4783_s13 }
  0xff   : > { %v595_v42 = vpop.f32.mrf.mxu3 }
 0x100   : > { %v629_v43 = vpack.c.bf16 %v595_v42, %v595_v42 }
 0x101   : > { %v553_v44 = vpop.f32.mrf.mxu0 }
 0x102   : > { %v612_v45 = vpack.c.bf16 %v553_v44, %v553_v44  ;;  %662 = vst.msk [vmem:[#allocation2 + $0x7c] sm:$0xf] %vm630_vm2, %v629_v43  ;;  %v4425_v43 = vld [vmem:[%s5050_s16 + $0x18] sm:$0xff] }
 0x103   : > { %v4432_v46 = vld [vmem:[#allocation2 + $0x30] sm:$0xff]  ;;  %1822 = vmatpush.bf16.msrb.mxu1 %v4425_v43  ;;  %4470 = vmatpush.bf16.msra.mxu2 %v4425_v43 }
 0x104   : > { %v4408_v47 = vld [vmem:[#allocation2 + $0x30] sm:$0xff]  ;;  %645 = vst.msk [vmem:[#allocation2 + $0x38] sm:$0xf] %vm630_vm2, %v612_v45  ;;  %2137 = vrot.lane.b32.xlu0 %v4432_v46, %s4783_s13 }
 0x105   : > { %4104 = vmatmul.msk.bf16.gmra.mxu1 %vm803_vm1, %v4408_v47  ;;  %v4424_v47 = vld [vmem:[%s5050_s16 + $0x10] sm:$0xff] }
 0x107   : > { %4471 = vmatpush.bf16.msra.mxu2 %v4424_v47  ;;  %1823 = vmatpush.bf16.msrb.mxu1 %v4424_v47 }
 0x109   : > { %v555_v48 = vpop.f32.mrf.mxu0  ;;  %v4441_v49 = vld [vmem:[#allocation2 + $0x78] sm:$0xff] }
 0x10a   : > { %v613_v50 = vpack.c.bf16 %v555_v48, %v555_v48  ;;  %v4417_v46 = vld [vmem:[#allocation2 + $0x78] sm:$0xff] }
 0x10c   : > { %646 = vst.msk [vmem:[#allocation2 + $0x3c] sm:$0xf] %vm630_vm2, %v613_v50  ;;  %2155 = vrot.lane.b32.xlu0 %v4441_v49, %s4783_s13  ;;  %v4423_v49 = vld [vmem:[%s5050_s16 + $0x8] sm:$0xff] }
 0x10d   : > { %4472 = vmatpush.bf16.msra.mxu2 %v4423_v49  ;;  %1824 = vmatpush.bf16.msrb.mxu1 %v4423_v49 }
 0x111   : > { %v558_v51 = vpop.f32.mrf.mxu0 }
 0x112   : > { %v614_v52 = vpack.c.bf16 %v558_v51, %v558_v51 }
 0x113   : > { %v4433_v53 = vld [vmem:[#allocation2 + $0x38] sm:$0xff] }
 0x114   : > { %v4409_v54 = vld [vmem:[#allocation2 + $0x38] sm:$0xff]  ;;  %647 = vst.msk [vmem:[#allocation2 + $0x40] sm:$0xf] %vm630_vm2, %v614_v52  ;;  %2139 = vrot.lane.b32.xlu1 %v4433_v53, %s4783_s13  ;;  %v4422_v53 = vld [vmem:[%s5050_s16] sm:$0xff] }
 0x115   : > { %4105 = vmatmul.msk.bf16.gmra.mxu1 %vm803_vm1, %v4409_v54  ;;  %4473 = vmatpush.bf16.msra.mxu2 %v4422_v53  ;;  %v4449_v54 = vld [vmem:[%s5050_s16 + $0x38] sm:$0xff] }
 0x116   : > { %v2126_v55 = vpop.permute.xlu0 %2125  ;;  %1825 = vmatpush.bf16.msrb.mxu1 %v4422_v53  ;;  %3195 = vmatpush.bf16.msrb.mxu0 %v4449_v54 }
 0x117   : > { %4234 = vmatmul.msk.bf16.vlgmr.msrb.gmra.mxu3 %vm803_vm1, %v2126_v55 }
 0x119   : > { %v560_v56 = vpop.f32.mrf.mxu0 }
 0x11a   : > { %v615_v57 = vpack.c.bf16 %v560_v56, %v560_v56 }
 0x11c   : > { %648 = vst.msk [vmem:[#allocation2 + $0x44] sm:$0xf] %vm630_vm2, %v615_v57 }
 0x11e   : > { %v4964_v58 = vpop.permute.xlu0 %2143 }
 0x122   : > { %v4966_v59 = vpop.f32.mrf.mxu1 }
 0x123   : > { %v4434_v60 = vld [vmem:[#allocation2 + $0x40] sm:$0xff]  ;;  %v954_v6 = vsel %vm953_vm3, %v4966_v59, -inf }
 0x124   : > { %v4410_v61 = vld [vmem:[#allocation2 + $0x40] sm:$0xff]  ;;  %2141 = vrot.lane.b32.xlu2 %v4434_v60, %s4783_s13  ;;  %v4987_v8 = vpop.permute.xlu2 %2147 }
 0x125   : > { %4106 = vmatmul.msk.bf16.gmra.mxu1 %vm803_vm1, %v4410_v61 }
 0x126   : > { %v2128_v62 = vpop.permute.xlu0 %2127 }
 0x127   : > { %4235 = vmatmul.msk.bf16.gmra.mxu3 %vm803_vm1, %v2128_v62 }
 0x12a   : > { %v4971_v63 = vpop.f32.mrf.mxu1 }
 0x12b   : > { %v957_v3 = vsel %vm953_vm3, %v4971_v63, -inf }
 0x12c   : > { %v4973_v0 = vpop.permute.xlu1 %2145 }
 0x132   : > { %v4975_v1 = vpop.f32.mrf.mxu1 }
 0x133   : > { %v960_v10 = vsel %vm953_vm3, %v4975_v1, -inf }
 0x134   : > { %v4995_v13 = vpop.permute.xlu2 %2149 }
 0x135   : > { %4107 = vmatmul.msk.bf16.gmra.mxu1 %vm803_vm1, %v4411_v2 }
 0x136   : > { %v2130_v4 = vpop.permute.xlu1 %2129  ;;  %958 = vmax.xlane.f32.xlu0 %v957_v3 }
 0x137   : > { %4236 = vmatmul.msk.bf16.gmra.mxu3 %vm803_vm1, %v2130_v4 }
 0x13a   : > { %v4981_v5 = vpop.f32.mrf.mxu1 }
 0x13b   : > { %v963_v14 = vsel %vm953_vm3, %v4981_v5, -inf }
 0x13e   : > { %955 = vmax.xlane.f32.xlu1 %v954_v6  ;;  %v2134_v20 = vpop.permute.xlu2 %2133 }
 0x142   : > { %v4985_v7 = vpop.f32.mrf.mxu1 }
 0x143   : > { %v966_v15 = vsel %vm953_vm3, %v4985_v7, -inf }
 0x145   : > { %4108 = vmatmul.msk.bf16.gmra.mxu1 %vm803_vm1, %v4412_v9 }
 0x146   : > { %v2132_v11 = vpop.permute.xlu1 %2131  ;;  %961 = vmax.xlane.f32.xlu1 %v960_v10 }
 0x147   : > { %4237 = vmatmul.msk.bf16.gmra.mxu3 %vm803_vm1, %v2132_v11 }
 0x14a   : > { %v4993_v12 = vpop.f32.mrf.mxu1 }
 0x14b   : > { %v969_v19 = vsel %vm953_vm3, %v4993_v12, -inf }
 0x14d   : > { %964 = vmax.xlane.f32.xlu2 %v963_v14 }
 0x14e   : > { %967 = vmax.xlane.f32.xlu1 %v966_v15  ;;  %v2136_v26 = vpop.permute.xlu2 %2135 }
 0x152   : > { %v5001_v16 = vpop.f32.mrf.mxu1 }
 0x153   : > { %v972_v17 = vsel %vm953_vm3, %v5001_v16, -inf }
 0x154   : > { %973 = vmax.xlane.f32.xlu0 %v972_v17 }
 0x155   : > { %4109 = vmatmul.msk.bf16.gmra.mxu1 %vm803_vm1, %v4413_v18  ;;  %970 = vmax.xlane.f32.xlu2 %v969_v19 }
 0x156   : > { %v5052_v42 = vpop.permute.xlu2 %2153 }
 0x157   : > { %4238 = vmatmul.msk.bf16.gmra.mxu3 %vm803_vm1, %v2134_v20 }
 0x15a   : > { %v5009_v21 = vpop.f32.mrf.mxu1 }
 0x15b   : > { %v975_v22 = vsel %vm953_vm3, %v5009_v21, -inf }
 0x15c   : > { %v5033_v35 = vpop.permute.xlu1 %2151 }
 0x15d   : > { %976 = vmax.xlane.f32.xlu2 %v975_v22 }
 0x162   : > { %v5013_v23 = vpop.f32.mrf.mxu1 }
 0x163   : > { %v978_v24 = vsel %vm953_vm3, %v5013_v23, -inf }
 0x164   : > { %979 = vmax.xlane.f32.xlu0 %v978_v24 }
 0x165   : > { %4110 = vmatmul.msk.bf16.gmra.mxu1 %vm803_vm1, %v4414_v25 }
 0x167   : > { %4239 = vmatmul.msk.bf16.gmra.mxu3 %vm803_vm1, %v2136_v26 }
 0x16a   : > { %v5019_v27 = vpop.f32.mrf.mxu1 }
 0x16b   : > { %v981_v28 = vsel %vm953_vm3, %v5019_v27, -inf }
 0x16c   : > { %982 = vmax.xlane.f32.xlu2 %v981_v28 }
 0x172   : > { %v5023_v29 = vpop.f32.mrf.mxu1 }
 0x173   : > { %v984_v30 = vsel %vm953_vm3, %v5023_v29, -inf }
 0x174   : > { %985 = vmax.xlane.f32.xlu0 %v984_v30 }
 0x175   : > { %4111 = vmatmul.msk.bf16.gmra.mxu1 %vm803_vm1, %v4415_v31 }
 0x176   : > { %v2138_v32 = vpop.permute.xlu0 %2137 }
 0x177   : > { %4240 = vmatmul.msk.bf16.gmra.mxu3 %vm803_vm1, %v2138_v32 }
 0x17a   : > { %v5029_v33 = vpop.f32.mrf.mxu1 }
 0x17b   : > { %v987_v34 = vsel %vm953_vm3, %v5029_v33, -inf }
 0x17c   : > { %988 = vmax.xlane.f32.xlu2 %v987_v34 }
 0x17e   : > { %v2142_v48 = vpop.permute.xlu2 %2141  ;;  %v5071_v55 = vpop.permute.xlu0 %2155 }
 0x182   : > { %v5035_v36 = vpop.f32.mrf.mxu1 }
 0x183   : > { %v990_v37 = vsel %vm953_vm3, %v5035_v36, -inf }
 0x184   : > { %991 = vmax.xlane.f32.xlu1 %v990_v37 }
 0x185   : > { %4112 = vmatmul.msk.bf16.gmra.mxu1 %vm803_vm1, %v4416_v38  ;;  %v4448_v38 = vld [vmem:[%s5050_s16 + $0x30] sm:$0xff] }
 0x186   : > { %v2140_v39 = vpop.permute.xlu1 %2139  ;;  %3196 = vmatpush.bf16.msrb.mxu0 %v4448_v38 }
 0x187   : > { %4241 = vmatmul.msk.bf16.gmra.mxu3 %vm803_vm1, %v2140_v39 }
 0x18a   : > { %v5041_v40 = vpop.f32.mrf.mxu1 }
 0x18b   : > { %v993_v41 = vsel %vm953_vm3, %v5041_v40, -inf }
 0x18c   : > { %994 = vmax.xlane.f32.xlu0 %v993_v41 }
 0x192   : > { %v5055_v44 = vpop.f32.mrf.mxu1 }
 0x193   : > { %v996_v45 = vsel %vm953_vm3, %v5055_v44, -inf }
 0x194   : > { %997 = vmax.xlane.f32.xlu2 %v996_v45 }
 0x195   : > { %4113 = vmatmul.msk.bf16.gmra.mxu1 %vm803_vm1, %v4417_v46 }
 0x197   : > { %4242 = vmatmul.msk.bf16.gmra.mxu3 %vm803_vm1, %v2142_v48 }
 0x19a   : > { %v5063_v50 = vpop.f32.mrf.mxu1  ;;  %v5065_v51 = vpop.f32.mrf.mxu3 }
 0x19b   : > { %v999_v52 = vsel %vm953_vm3, %v5063_v50, -inf  ;;  %v2326_v60 = vsel %vm953_vm3, %v5065_v51, -inf }
 0x19c   : > { %1000 = vmax.xlane.f32.xlu0 %v999_v52 }
 0x1a2   : > { %v5073_v56 = vpop.f32.mrf.mxu1  ;;  %v5075_v57 = vpop.f32.mrf.mxu3 }
 0x1a3   : > { %v1002_v61 = vsel %vm953_vm3, %v5073_v56, -inf  ;;  %v2329_v6 = vsel %vm953_vm3, %v5075_v57, -inf }
 0x1a4   : > { %2327 = vmax.xlane.f32.xlu0 %v2326_v60  ;;  %1003 = vmax.xlane.f32.xlu1 %v1002_v61 }
 0x1a7   : > { %4243 = vmatmul.msk.bf16.gmra.mxu3 %vm803_vm1, %v4964_v58 }
 0x1a9   : > { %v959_v62 = vpop.xlane.xlu0 %958 }
 0x1aa   : > { %v5083_v2 = vpop.f32.mrf.mxu1  ;;  %v1051_v3 = vsub.f32 %v4971_v63, %v959_v62  ;;  %v5086_v4 = vpop.f32.mrf.mxu3 }
 0x1ab   : > { %v1005_v45 = vsel %vm953_vm3, %v5083_v2, -inf  ;;  %v2332_v62 = vsel %vm953_vm3, %v5086_v4, -inf }
 0x1ac   : > { %2330 = vmax.xlane.f32.xlu1 %v2329_v6  ;;  %v1084_v9 = vmul.f32 1.442695, %v1051_v3 }
 0x1ae   : > { %4503 = vpow2.f32 %v1084_v9 }
 0x1b1   : > { %v956_v10 = vpop.xlane.xlu1 %955 }
 0x1b2   : > { %v5090_v11 = vpop.f32.mrf.mxu1  ;;  %v1050_v14 = vsub.f32 %v4966_v59, %v956_v10  ;;  %v5093_v15 = vpop.f32.mrf.mxu3 }
 0x1b3   : > { %v1008_v28 = vsel %vm953_vm3, %v5090_v11, -inf  ;;  %v2335_v61 = vsel %vm953_vm3, %v5093_v15, -inf }
 0x1b4   : > { %v4504_v58 = vpop.eup %4503  ;;  %v1082_v17 = vmul.f32 1.442695, %v1050_v14 }
 0x1b5   : > { %v1149_v18 = vsel %vm953_vm3, %v4504_v58, 0.0 }
 0x1b6   : > { %4505 = vpow2.f32 %v1082_v17  ;;  %1150 = vadd.xlane.f32.xlu1 %v1149_v18 }
 0x1b7   : > { %4244 = vmatmul.msk.bf16.gmra.mxu3 %vm803_vm1, %v4973_v0 }
 0x1b9   : > { %v962_v63 = vpop.xlane.xlu1 %961 }
 0x1ba   : > { %v5098_v19 = vpop.f32.mrf.mxu1  ;;  %v1052_v20 = vsub.f32 %v4975_v1, %v962_v63  ;;  %v5101_v22 = vpop.f32.mrf.mxu3 }
 0x1bb   : > { %v1011_v10 = vsel %vm953_vm3, %v5098_v19, -inf }
 0x1bc   : > { %v4506_v24 = vpop.eup %4505  ;;  %v1086_v59 = vmul.f32 1.442695, %v1052_v20 }
 0x1bd   : > { %v1722_v25 = vpack.c.bf16 %v4504_v58, %v4506_v24  ;;  %v1146_v26 = vsel %vm953_vm3, %v4506_v24, 0.0 }
 0x1be   : > { %4507 = vpow2.f32 %v1086_v59  ;;  %1147 = vadd.xlane.f32.xlu2 %v1146_v26  ;;  %1009 = vmax.xlane.f32.xlu1 %v1008_v28  ;;  %v2338_v26 = vsel %vm953_vm3, %v5101_v22, -inf }
 0x1bf   : > { %4130 = vmatmul.msk.bf16.vlgmr.msrb.gmra.mxu1 %vm953_vm3, %v1722_v25 }
 0x1c0   : > { %v965_v0 = vpop.xlane.xlu2 %964 }
 0x1c1   : > { %v1053_v30 = vsub.f32 %v4981_v5, %v965_v0  ;;  %v968_v1 = vpop.xlane.xlu1 %967 }
 0x1c2   : > { %v5108_v31 = vpop.f32.mrf.mxu1  ;;  %v1054_v32 = vsub.f32 %v4985_v7, %v968_v1  ;;  %v5111_v34 = vpop.f32.mrf.mxu3 }
 0x1c3   : > { %v1088_v37 = vmul.f32 1.442695, %v1053_v30  ;;  %v1014_v5 = vsel %vm953_vm3, %v5108_v31, -inf  ;;  %v2341_v28 = vsel %vm953_vm3, %v5111_v34, -inf }
 0x1c4   : > { %v4508_v39 = vpop.eup %4507  ;;  %v1090_v41 = vmul.f32 1.442695, %v1054_v32 }
 0x1c5   : > { %4509 = vpow2.f32 %v1088_v37  ;;  %v1152_v43 = vsel %vm953_vm3, %v4508_v39, 0.0  ;;  %v4447_v37 = vld [vmem:[%s5050_s16 + $0x28] sm:$0xff] }
 0x1c6   : > { %4511 = vpow2.f32 %v1090_v41  ;;  %1153 = vadd.xlane.f32.xlu0 %v1152_v43  ;;  %1006 = vmax.xlane.f32.xlu2 %v1005_v45 }
 0x1c7   : > { %1015 = vmax.xlane.f32.xlu1 %v1014_v5  ;;  %4245 = vmatmul.msk.bf16.gmra.mxu3 %vm803_vm1, %v4987_v8  ;;  %v974_v47 = vpop.xlane.xlu0 %973 }
 0x1c8   : > { %v971_v7 = vpop.xlane.xlu2 %970  ;;  %v1056_v60 = vsub.f32 %v5001_v16, %v974_v47  ;;  %3197 = vmatpush.bf16.msrb.mxu0 %v4447_v37  ;;  %v4446_v37 = vld [vmem:[%s5050_s16 + $0x20] sm:$0xff] }
 0x1c9   : > { %v1055_v53 = vsub.f32 %v4993_v12, %v971_v7 }
 0x1ca   : > { %v5121_v46 = vpop.f32.mrf.mxu1  ;;  %v5123_v48 = vpop.f32.mrf.mxu3  ;;  %v1094_v6 = vmul.f32 1.442695, %v1056_v60 }
 0x1cb   : > { %v4510_v49 = vpop.eup %4509  ;;  %v1092_v3 = vmul.f32 1.442695, %v1055_v53  ;;  %v1017_v41 = vsel %vm953_vm3, %v5121_v46, -inf }
 0x1cc   : > { %v4512_v52 = vpop.eup %4511  ;;  %v1723_v54 = vpack.c.bf16 %v4510_v49, %v4508_v39  ;;  %v1155_v16 = vsel %vm953_vm3, %v4510_v49, 0.0  ;;  %3198 = vmatpush.bf16.msrb.mxu0 %v4446_v37 }
 0x1cd   : > { %v1158_v8 = vsel %vm953_vm3, %v4512_v52, 0.0  ;;  %4513 = vpow2.f32 %v1092_v3 }
 0x1ce   : > { %2336 = vmax.xlane.f32.xlu0 %v2335_v61  ;;  %2333 = vmax.xlane.f32.xlu2 %v2332_v62  ;;  %4515 = vpow2.f32 %v1094_v6 }
 0x1cf   : > { %1159 = vadd.xlane.f32.xlu1 %v1158_v8  ;;  %4131 = vmatmul.msk.bf16.gmra.mxu1 %vm953_vm3, %v1723_v54 }
 0x1d0   : > { %v977_v58 = vpop.xlane.xlu2 %976 }
 0x1d1   : > { %v1057_v59 = vsub.f32 %v5009_v21, %v977_v58 }
 0x1d2   : > { %v5133_v9 = vpop.f32.mrf.mxu1  ;;  %v5135_v12 = vpop.f32.mrf.mxu3 }
 0x1d3   : > { %v1020_v14 = vsel %vm953_vm3, %v5133_v9, -inf  ;;  %v4514_v63 = vpop.eup %4513  ;;  %v1096_v30 = vmul.f32 1.442695, %v1057_v59  ;;  %v2347_v6 = vsel %vm953_vm3, %v5135_v12, -inf }
 0x1d4   : > { %v4516_v24 = vpop.eup %4515  ;;  %v1161_v39 = vsel %vm953_vm3, %v4514_v63, 0.0 }
 0x1d5   : > { %v1164_v0 = vsel %vm953_vm3, %v4516_v24, 0.0  ;;  %4517 = vpow2.f32 %v1096_v30 }
 0x1d6   : > { %1156 = vadd.xlane.f32.xlu2 %v1155_v16  ;;  %1012 = vmax.xlane.f32.xlu0 %v1011_v10 }
 0x1d7   : > { %1021 = vmax.xlane.f32.xlu1 %v1020_v14  ;;  %4246 = vmatmul.msk.bf16.gmra.mxu3 %vm803_vm1, %v4995_v13  ;;  %v980_v17 = vpop.xlane.xlu0 %979  ;;  %v1724_v13 = vpack.c.bf16 %v4514_v63, %v4512_v52  ;;  %v2344_v52 = vsel %vm953_vm3, %v5123_v48, -inf }
 0x1d8   : > { %v1058_v25 = vsub.f32 %v5013_v23, %v980_v17 }
 0x1da   : > { %v5144_v18 = vpop.f32.mrf.mxu1  ;;  %v5146_v20 = vpop.f32.mrf.mxu3  ;;  %v1098_v1 = vmul.f32 1.442695, %v1058_v25 }
 0x1db   : > { %v2350_v43 = vsel %vm953_vm3, %v5146_v20, -inf  ;;  %v4518_v5 = vpop.eup %4517  ;;  %v1023_v63 = vsel %vm953_vm3, %v5144_v18, -inf }
 0x1dc   : > { %4519 = vpow2.f32 %v1098_v1  ;;  %v1725_v53 = vpack.c.bf16 %v4518_v5, %v4516_v24 }
 0x1de   : > { %2339 = vmax.xlane.f32.xlu2 %v2338_v26  ;;  %2342 = vmax.xlane.f32.xlu0 %v2341_v28 }
 0x1df   : > { %1165 = vadd.xlane.f32.xlu1 %v1164_v0  ;;  %4132 = vmatmul.msk.bf16.gmra.mxu1 %vm953_vm3, %v1724_v13  ;;  %v983_v21 = vpop.xlane.xlu2 %982  ;;  %v1167_v13 = vsel %vm953_vm3, %v4518_v5, 0.0 }
 0x1e0   : > { %v1059_v38 = vsub.f32 %v5019_v27, %v983_v21 }
 0x1e2   : > { %v5156_v32 = vpop.f32.mrf.mxu1  ;;  %v5158_v23 = vpop.f32.mrf.mxu3  ;;  %v1100_v45 = vmul.f32 1.442695, %v1059_v38 }
 0x1e3   : > { %v4520_v27 = vpop.eup %4519  ;;  %v1026_v54 = vsel %vm953_vm3, %v5156_v32, -inf }
 0x1e4   : > { %4521 = vpow2.f32 %v1100_v45  ;;  %v1170_v49 = vsel %vm953_vm3, %v4520_v27, 0.0 }
 0x1e6   : > { %1162 = vadd.xlane.f32.xlu2 %v1161_v39  ;;  %1018 = vmax.xlane.f32.xlu0 %v1017_v41 }
 0x1e7   : > { %2351 = vmax.xlane.f32.xlu1 %v2350_v43  ;;  %4247 = vmatmul.msk.bf16.gmra.mxu3 %vm803_vm1, %v5033_v35  ;;  %v986_v35 = vpop.xlane.xlu0 %985 }
 0x1e8   : > { %v1060_v8 = vsub.f32 %v5023_v29, %v986_v35 }
 0x1ea   : > { %v5169_v7 = vpop.f32.mrf.mxu1  ;;  %v5171_v47 = vpop.f32.mrf.mxu3  ;;  %v1102_v10 = vmul.f32 1.442695, %v1060_v8 }
 0x1eb   : > { %v4522_v61 = vpop.eup %4521  ;;  %v2356_v16 = vsel %vm953_vm3, %v5171_v47, -inf }
 0x1ec   : > { %v1173_v3 = vsel %vm953_vm3, %v4522_v61, 0.0  ;;  %4523 = vpow2.f32 %v1102_v10  ;;  %v1726_v59 = vpack.c.bf16 %v4522_v61, %v4520_v27  ;;  %v2353_v27 = vsel %vm953_vm3, %v5158_v23, -inf }
 0x1ee   : > { %1171 = vadd.xlane.f32.xlu2 %v1170_v49  ;;  %2345 = vmax.xlane.f32.xlu0 %v2344_v52 }
 0x1ef   : > { %1027 = vmax.xlane.f32.xlu1 %v1026_v54  ;;  %4133 = vmatmul.msk.bf16.gmra.mxu1 %vm953_vm3, %v1725_v53  ;;  %v989_v14 = vpop.xlane.xlu2 %988 }
 0x1f0   : > { %v1061_v29 = vsub.f32 %v5029_v33, %v989_v14 }
 0x1f2   : > { %v5179_v60 = vpop.f32.mrf.mxu1  ;;  %v5181_v62 = vpop.f32.mrf.mxu3  ;;  %v1104_v25 = vmul.f32 1.442695, %v1061_v29 }
 0x1f3   : > { %v1032_v24 = vsel %vm953_vm3, %v5179_v60, -inf  ;;  %v4524_v33 = vpop.eup %4523  ;;  %v2359_v49 = vsel %vm953_vm3, %v5181_v62, -inf }
 0x1f4   : > { %4525 = vpow2.f32 %v1104_v25  ;;  %v1176_v0 = vsel %vm953_vm3, %v4524_v33, 0.0 }
 0x1f6   : > { %1174 = vadd.xlane.f32.xlu2 %v1173_v3  ;;  %2348 = vmax.xlane.f32.xlu0 %v2347_v6 }
 0x1f7   : > { %2357 = vmax.xlane.f32.xlu1 %v2356_v16  ;;  %4248 = vmatmul.msk.bf16.gmra.mxu3 %vm803_vm1, %v5052_v42  ;;  %v992_v43 = vpop.xlane.xlu1 %991 }
 0x1fa   : > { %v5191_v58 = vpop.f32.mrf.mxu1  ;;  %v5193_v17 = vpop.f32.mrf.mxu3 }
 0x1fb   : > { %v1035_v42 = vsel %vm953_vm3, %v5191_v58, -inf  ;;  %v4526_v38 = vpop.eup %4525  ;;  %v2362_v6 = vsel %vm953_vm3, %v5193_v17, -inf }
 0x1fc   : > { %v1727_v52 = vpack.c.bf16 %v4526_v38, %v4524_v33 }
 0x1fe   : > { %1024 = vmax.xlane.f32.xlu0 %v1023_v63  ;;  %1033 = vmax.xlane.f32.xlu2 %v1032_v24 }
 0x1ff   : > { %1036 = vmax.xlane.f32.xlu1 %v1035_v42  ;;  %4134 = vmatmul.msk.bf16.gmra.mxu1 %vm953_vm3, %v1726_v59  ;;  %v995_v30 = vpop.xlane.xlu0 %994 }
 0x200   : > { %v1063_v5 = vsub.f32 %v5041_v40, %v995_v30 }
 0x202   : > { %v5203_v26 = vpop.f32.mrf.mxu1  ;;  %v5205_v28 = vpop.f32.mrf.mxu3  ;;  %v1108_v40 = vmul.f32 1.442695, %v1063_v5 }
 0x203   : > { %v2365_v1 = vsel %vm953_vm3, %v5205_v28, -inf }
 0x206   : > { %1168 = vadd.xlane.f32.xlu0 %v1167_v13  ;;  %1177 = vadd.xlane.f32.xlu2 %v1176_v0  ;;  %v1179_v0 = vsel %vm953_vm3, %v4526_v38, 0.0 }
 0x207   : > { %v998_v21 = vpop.xlane.xlu2 %997  ;;  %2366 = vmax.xlane.f32.xlu1 %v2365_v1  ;;  %4249 = vmatmul.msk.bf16.gmra.mxu3 %vm803_vm1, %v5071_v55  ;;  %v1062_v55 = vsub.f32 %v5035_v36, %v992_v43  ;;  %v1029_v36 = vsel %vm953_vm3, %v5169_v7, -inf }
 0x208   : > { %v1064_v39 = vsub.f32 %v5055_v44, %v998_v21 }
 0x209   : > { %v1106_v8 = vmul.f32 1.442695, %v1062_v55 }
 0x20a   : > { %v5215_v41 = vpop.f32.mrf.mxu3  ;;  %v5217_v45 = vpop.f32.mrf.mxu1  ;;  %v1110_v53 = vmul.f32 1.442695, %v1064_v39 }
 0x20b   : > { %v1041_v44 = vsel %vm953_vm3, %v5217_v45, -inf }
 0x20c   : > { %4527 = vpow2.f32 %v1110_v53 }
 0x20e   : > { %2354 = vmax.xlane.f32.xlu0 %v2353_v27  ;;  %2360 = vmax.xlane.f32.xlu2 %v2359_v49 }
 0x20f   : > { %v1001_v54 = vpop.xlane.xlu0 %1000  ;;  %1042 = vmax.xlane.f32.xlu1 %v1041_v44  ;;  %4135 = vmatmul.msk.bf16.gmra.mxu1 %vm953_vm3, %v1727_v52 }
 0x210   : > { %v1065_v35 = vsub.f32 %v5063_v50, %v1001_v54 }
 0x212   : > { %v1112_v61 = vmul.f32 1.442695, %v1065_v35  ;;  %v5229_v3 = vpop.f32.mrf.mxu3  ;;  %v5238_v29 = vpop.eup %4527 }
 0x213   : > { %v2371_v50 = vsel %vm953_vm3, %v5229_v3, -inf  ;;  %v5251_v43 = vpop.f32.mrf.mxu1 }
 0x214   : > { %4529 = vpow2.f32 %v1112_v61  ;;  %v1044_v49 = vsel %vm953_vm3, %v5251_v43, -inf }
 0x215   : > { %4531 = vpow2.f32 %v1108_v40 }
 0x216   : > { %4533 = vpow2.f32 %v1106_v8  ;;  %1030 = vmax.xlane.f32.xlu0 %v1029_v36  ;;  %2363 = vmax.xlane.f32.xlu2 %v2362_v6 }
 0x217   : > { %v1004_v16 = vpop.xlane.xlu1 %1003  ;;  %v2328_v10 = vpop.xlane.xlu0 %2327  ;;  %2372 = vmax.xlane.f32.xlu1 %v2371_v50 }
 0x218   : > { %v1066_v14 = vsub.f32 %v5073_v56, %v1004_v16  ;;  %v2422_v42 = vsub.f32 %v5065_v51, %v2328_v10  ;;  %v1038_v56 = vsel %vm953_vm3, %v5203_v26, -inf }
 0x21a   : > { %v4530_v63 = vpop.eup %4529  ;;  %v1114_v24 = vmul.f32 1.442695, %v1066_v14  ;;  %v5241_v25 = vpop.f32.mrf.mxu3  ;;  %v2454_v1 = vmul.f32 1.442695, %v2422_v42 }
 0x21b   : > { %v4532_v59 = vpop.eup %4531  ;;  %v1729_v33 = vpack.c.bf16 %v4530_v63, %v5238_v29  ;;  %v1191_v51 = vsel %vm953_vm3, %v4530_v63, 0.0  ;;  %v5283_v10 = vpop.f32.mrf.mxu1  ;;  %v2368_v63 = vsel %vm953_vm3, %v5215_v41, -inf }
 0x21c   : > { %v4534_v13 = vpop.eup %4533  ;;  %4535 = vpow2.f32 %v1114_v24  ;;  %v1185_v35 = vsel %vm953_vm3, %v4532_v59, 0.0 }
 0x21d   : > { %4137 = vmatmul.msk.bf16.vlgmr.msra.gmra.mxu2 %vm953_vm3, %v1729_v33  ;;  %v1728_v30 = vpack.c.bf16 %v4532_v59, %v4534_v13  ;;  %4537 = vpow2.f32 %v2454_v1  ;;  %v1182_v27 = vsel %vm953_vm3, %v4534_v13, 0.0 }
 0x21e   : > { %1180 = vadd.xlane.f32.xlu0 %v1179_v0  ;;  %1039 = vmax.xlane.f32.xlu2 %v1038_v56 }
 0x21f   : > { %v2331_v21 = vpop.xlane.xlu1 %2330  ;;  %1192 = vadd.xlane.f32.xlu1 %v1191_v51  ;;  %4136 = vmatmul.msk.bf16.gmra.mxu1 %vm953_vm3, %v1728_v30 }
 0x220   : > { %v2423_v37 = vsub.f32 %v5075_v57, %v2331_v21  ;;  %v1188_v21 = vsel %vm953_vm3, %v5238_v29, 0.0 }
 0x222   : > { %v2456_v39 = vmul.f32 1.442695, %v2423_v37  ;;  %v5253_v38 = vpop.f32.mrf.mxu3  ;;  %v5255_v5 = vpop.eup %4535 }
 0x223   : > { %v1194_v57 = vsel %vm953_vm3, %v5255_v5, 0.0  ;;  %v4538_v52 = vpop.eup %4537  ;;  %v2377_v61 = vsel %vm953_vm3, %v5253_v38, -inf }
 0x224   : > { %4539 = vpow2.f32 %v2456_v39  ;;  %v2518_v40 = vsel %vm953_vm3, %v4538_v52, 0.0 }
 0x226   : > { %1183 = vadd.xlane.f32.xlu2 %v1182_v27  ;;  %1045 = vmax.xlane.f32.xlu0 %v1044_v49 }
 0x227   : > { %1195 = vadd.xlane.f32.xlu1 %v1194_v57 }
 0x229   : > { %v5264_v53 = vpop.xlane.xlu1 %1150 }
 0x22a   : > { %v5262_v55 = vpop.eup %4539  ;;  %4541 = vrcp.f32 %v5264_v53  ;;  %v5267_v54 = vpop.f32.mrf.mxu3  ;;  %v1266_v27 = vand.u32 2147483647, %v5264_v53  ;;  %vm1262_vm6 = vweird.f32 %v5264_v53 }
 0x22b   : > { %v3094_v44 = vpack.c.bf16 %v5262_v55, %v4538_v52  ;;  %v1268_v52 = vand.u32 2147483648, %v5264_v53 }
 0x22c   : > { %vm5307_vm11 = vcmp.eq.f32.partialorder %v1266_v27, 8.507059e+37 }
 0x22d   : > { %4274 = vmatmul.msk.bf16.vlgmr.msrb.gmra.mxu0 %vm953_vm3, %v3094_v44 }
 0x22e   : > { %1186 = vadd.xlane.f32.xlu2 %v1185_v35  ;;  %2519 = vadd.xlane.f32.xlu0 %v2518_v40 }
 0x22f   : > { %2378 = vmax.xlane.f32.xlu1 %v2377_v61 }
 0x230   : > { %v5275_v8 = vpop.eup %4541 }
 0x231   : > { %v1258_v36 = vmul.f32 %v5275_v8, %v5264_v53  ;;  %v1148_v6 = vpop.xlane.xlu2 %1147  ;;  %v5279_v16 = vpop.xlane.xlu1 %1009  ;;  %vm1263_vm4 = vweird.f32 %v5275_v8 }
 0x232   : > { %4543 = vrcp.f32 %v1148_v6  ;;  %v5281_v50 = vpop.f32.mrf.mxu3  ;;  %v1253_v37 = vand.u32 2147483648, %v1148_v6  ;;  %v1251_v57 = vand.u32 2147483647, %v1148_v6  ;;  %vm1247_vm7 = vweird.f32 %v1148_v6  ;;  %vm5303_vm8 = vmor %vm1262_vm6, %vm1263_vm4 }
 0x233   : > { %v1259_v14 = vsub.f32 1.0, %v1258_v36  ;;  %v1047_v36 = vsel %vm953_vm3, %v5283_v10, -inf }
 0x234   : > { %v1254_v40 = vor.u32 1.1754944e-38, %v1253_v37  ;;  %vm1252_vm12 = vcmp.eq.f32.partialorder %v1251_v57, 8.507059e+37 }
 0x235   : > { %v1260_v13 = vmul.f32 %v5275_v8, %v1259_v14 }
 0x236   : > { %2369 = vmax.xlane.f32.xlu2 %v2368_v63 }
 0x238   : > { %v4544_v24 = vpop.eup %4543 }
 0x239   : > { %v1243_v59 = vmul.f32 %v4544_v24, %v1148_v6  ;;  %v5287_v42 = vpop.xlane.xlu0 %1153  ;;  %v1007_v33 = vpop.xlane.xlu2 %1006  ;;  %vm1248_vm5 = vweird.f32 %v4544_v24 }
 0x23a   : > { %4545 = vrcp.f32 %v5287_v42  ;;  %v1067_v0 = vsub.f32 %v5083_v2, %v1007_v33  ;;  %v5292_v56 = vpop.xlane.xlu1 %1015  ;;  %v5294_v30 = vpop.f32.mrf.mxu3  ;;  %v1261_v2 = vadd.f32 %v5275_v8, %v1260_v13  ;;  %vm1249_vm9 = vmor %vm1247_vm7, %vm1248_vm5  ;;  %vm1277_vm14 = vweird.f32 %v5287_v42 }
 0x23b   : > { %v1244_v1 = vsub.f32 1.0, %v1243_v59 }
 0x23c   : > { %v1116_v51 = vmul.f32 1.442695, %v1067_v0  ;;  %v1827_v39 = vpop.f32.mrf.mxu1  ;;  %v1265_v59 = vsel %vm5303_vm8, %v5275_v8, %v1261_v2 }
 0x23d   : > { %v1245_v49 = vmul.f32 %v4544_v24, %v1244_v1 }
 0x23e   : > { %4547 = vpow2.f32 %v1116_v51  ;;  %1189 = vadd.xlane.f32.xlu2 %v1188_v21  ;;  %v1269_v51 = vor.u32 1.1754944e-38, %v1268_v52 }
 0x23f   : > { %v1246_v44 = vadd.f32 %v4544_v24, %v1245_v49 }
 0x240   : > { %v4546_v35 = vpop.eup %4545 }
 0x241   : > { %v1273_v14 = vmul.f32 %v4546_v35, %v5287_v42  ;;  %v1250_v53 = vsel %vm1249_vm9, %v4544_v24, %v1246_v44  ;;  %v2337_v6 = vpop.xlane.xlu0 %2336  ;;  %v2334_v63 = vpop.xlane.xlu2 %2333  ;;  %v1068_v24 = vsub.f32 %v5090_v11, %v5279_v16  ;;  %vm1278_vm13 = vweird.f32 %v4546_v35 }
 0x242   : > { %v1255_v33 = vsel %vm1252_vm12, %v1254_v40, %v1250_v53  ;;  %v2425_v13 = vsub.f32 %v5093_v15, %v2337_v6  ;;  %v2424_v0 = vsub.f32 %v5086_v4, %v2334_v63  ;;  %v5319_v1 = vpop.xlane.xlu1 %1159  ;;  %v5321_v21 = vpop.f32.mrf.mxu3  ;;  %v1270_v15 = vsel %vm5307_vm11, %v1269_v51, %v1265_v59  ;;  %vm5338_vm15 = vmor %vm1277_vm14, %vm1278_vm13 }
 0x243   : > { %v1274_v37 = vsub.f32 1.0, %v1273_v14  ;;  %v1907_v27 = vmul.f32 %v1827_v39, %v1255_v33  ;;  %4549 = vrcp.f32 %v5319_v1  ;;  %v1283_v11 = vand.u32 2147483648, %v5287_v42 }
 0x244   : > { %v5326_v49 = vpop.eup %4547  ;;  %v2460_v8 = vmul.f32 1.442695, %v2425_v13  ;;  %v2458_v57 = vmul.f32 1.442695, %v2424_v0  ;;  %v1829_v4 = vpop.f32.mrf.mxu1  ;;  %v1281_v40 = vand.u32 2147483647, %v5287_v42  ;;  %vm1307_vm5 = vweird.f32 %v5319_v1 }
 0x245   : > { %v1939_v2 = vpack.c.bf16 %v1907_v27, %v1907_v27  ;;  %v1908_v44 = vmul.f32 %v1829_v4, %v1270_v15  ;;  %v1730_v52 = vpack.c.bf16 %v5326_v49, %v5255_v5  ;;  %v1275_v29 = vmul.f32 %v4546_v35, %v1274_v37 }
 0x246   : > { %4551 = vpow2.f32 %v2460_v8  ;;  %1048 = vmax.xlane.f32.xlu2 %v1047_v36  ;;  %v1118_v36 = vmul.f32 1.442695, %v1068_v24  ;;  %v1284_v13 = vor.u32 1.1754944e-38, %v1283_v11  ;;  %vm1282_vm1 = vcmp.eq.f32.partialorder %v1281_v40, 8.507059e+37 }
 0x247   : > { %1972 = vst.msk [vmem:[#allocation3] sm:$0xf] %vm1971_vm10, %v1939_v2  ;;  %4553 = vpow2.f32 %v2458_v57  ;;  %v1940_v16 = vpack.c.bf16 %v1908_v44, %v1908_v44  ;;  %4138 = vmatmul.msk.bf16.gmra.mxu2 %vm953_vm3, %v1730_v52  ;;  %v1276_v39 = vadd.f32 %v4546_v35, %v1275_v29  ;;  %v1070_v40 = vsub.f32 %v5108_v31, %v5292_v56 }
 0x249   : > { %v5342_v5 = vpop.eup %4549  ;;  %1973 = vst.msk [vmem:[#allocation3 + $0x4] sm:$0xf] %vm1971_vm10, %v1940_v16  ;;  %v5345_v14 = vpop.xlane.xlu2 %1156  ;;  %v1280_v6 = vsel %vm5338_vm15, %v4546_v35, %v1276_v39  ;;  %v2374_v35 = vsel %vm953_vm3, %v5241_v25, -inf  ;;  %v2521_v16 = vsel %vm953_vm3, %v5262_v55, 0.0 }
 0x24a   : > { %v1013_v53 = vpop.xlane.xlu0 %1012  ;;  %v1303_v63 = vmul.f32 %v5342_v5, %v5319_v1  ;;  %4555 = vrcp.f32 %v5345_v14  ;;  %v5353_v59 = vpop.xlane.xlu1 %1021  ;;  %v1285_v24 = vsel %vm1282_vm1, %v1284_v13, %v1280_v6  ;;  %v1296_v55 = vand.u32 2147483647, %v5345_v14 }
 0x24b   : > { %v1069_v42 = vsub.f32 %v5098_v19, %v1013_v53  ;;  %v5355_v33 = vpop.f32.mrf.mxu3  ;;  %4557 = vpow2.f32 %v1118_v36  ;;  %vm1308_vm4 = vweird.f32 %v5342_v5  ;;  %vm1292_vm6 = vweird.f32 %v5345_v14 }
 0x24c   : > { %v4552_v0 = vpop.eup %4551  ;;  %v1832_v37 = vpop.f32.mrf.mxu1  ;;  %v1304_v8 = vsub.f32 1.0, %v1303_v63  ;;  %v1313_v63 = vand.u32 2147483648, %v5319_v1  ;;  %vm5392_vm7 = vmor %vm1307_vm5, %vm1308_vm4  ;;  %vm1297_vm9 = vcmp.eq.f32.partialorder %v1296_v55, 8.507059e+37 }
 0x24d   : > { %v1120_v51 = vmul.f32 1.442695, %v1069_v42  ;;  %v4554_v27 = vpop.eup %4553  ;;  %v1909_v57 = vmul.f32 %v1832_v37, %v1285_v24  ;;  %v2527_v15 = vsel %vm953_vm3, %v4552_v0, 0.0 }
 0x24e   : > { %v2524_v19 = vsel %vm953_vm3, %v4554_v27, 0.0  ;;  %2528 = vadd.xlane.f32.xlu0 %v2527_v15  ;;  %2375 = vmax.xlane.f32.xlu2 %v2374_v35  ;;  %v3095_v4 = vpack.c.bf16 %v4552_v0, %v4554_v27  ;;  %v1305_v39 = vmul.f32 %v5342_v5, %v1304_v8  ;;  %v1298_v0 = vand.u32 2147483648, %v5345_v14 }
 0x24f   : > { %4559 = vpow2.f32 %v1120_v51  ;;  %v1941_v2 = vpack.c.bf16 %v1909_v57, %v1909_v57  ;;  %2525 = vadd.xlane.f32.xlu1 %v2524_v19  ;;  %v2383_v27 = vsel %vm953_vm3, %v5281_v50, -inf  ;;  %v1311_v15 = vand.u32 2147483647, %v5319_v1 }
 0x250   : > { %v4556_v44 = vpop.eup %4555  ;;  %4275 = vmatmul.msk.bf16.gmra.mxu0 %vm953_vm3, %v3095_v4  ;;  %v1306_v35 = vadd.f32 %v5342_v5, %v1305_v39  ;;  %v1122_v19 = vmul.f32 1.442695, %v1070_v40  ;;  %v1299_v4 = vor.u32 1.1754944e-38, %v1298_v0 }
 0x251   : > { %v1288_v52 = vmul.f32 %v4556_v44, %v5345_v14  ;;  %1974 = vst.msk [vmem:[#allocation3 + $0x8] sm:$0xf] %vm1971_vm10, %v1941_v2  ;;  %v2340_v29 = vpop.xlane.xlu2 %2339  ;;  %v5376_v42 = vpop.eup %4557  ;;  %vm1293_vm2 = vweird.f32 %v4556_v44  ;;  %vm1312_vm11 = vcmp.eq.f32.partialorder %v1311_v15, 8.507059e+37 }
 0x252   : > { %v2343_v11 = vpop.xlane.xlu0 %2342  ;;  %v2426_v61 = vsub.f32 %v5101_v22, %v2340_v29  ;;  %v5371_v53 = vpop.xlane.xlu1 %1165  ;;  %vm1294_vm8 = vmor %vm1292_vm6, %vm1293_vm2 }
 0x253   : > { %v2427_v36 = vsub.f32 %v5111_v34, %v2343_v11  ;;  %v5373_v6 = vpop.f32.mrf.mxu3  ;;  %v1289_v13 = vsub.f32 1.0, %v1288_v52  ;;  %4561 = vrcp.f32 %v5371_v53  ;;  %v1310_v11 = vsel %vm5392_vm7, %v5342_v5, %v1306_v35 }
 0x254   : > { %v2462_v56 = vmul.f32 1.442695, %v2426_v61  ;;  %v1834_v34 = vpop.f32.mrf.mxu1  ;;  %vm1337_vm14 = vweird.f32 %v5371_v53 }
 0x255   : > { %v4560_v31 = vpop.eup %4559  ;;  %v2464_v22 = vmul.f32 1.442695, %v2427_v36  ;;  %v1290_v51 = vmul.f32 %v4556_v44, %v1289_v13  ;;  %v2386_v13 = vsel %vm953_vm3, %v5294_v30, -inf }
 0x256   : > { %v1203_v24 = vsel %vm953_vm3, %v4560_v31, 0.0  ;;  %v1731_v37 = vpack.c.bf16 %v4560_v31, %v5376_v42  ;;  %4563 = vpow2.f32 %v2462_v56  ;;  %2522 = vadd.xlane.f32.xlu2 %v2521_v16  ;;  %v1314_v16 = vor.u32 1.1754944e-38, %v1313_v63 }
 0x257   : > { %1204 = vadd.xlane.f32.xlu0 %v1203_v24  ;;  %4565 = vpow2.f32 %v2464_v22  ;;  %v1291_v8 = vadd.f32 %v4556_v44, %v1290_v51  ;;  %2384 = vmax.xlane.f32.xlu1 %v2383_v27  ;;  %v1197_v24 = vsel %vm953_vm3, %v5326_v49, 0.0 }
 0x258   : > { %4139 = vmatmul.msk.bf16.gmra.mxu2 %vm953_vm3, %v1731_v37  ;;  %v1315_v0 = vsel %vm1312_vm11, %v1314_v16, %v1310_v11 }
 0x259   : > { %v5398_v2 = vpop.eup %4561  ;;  %v1295_v52 = vsel %vm1294_vm8, %v4556_v44, %v1291_v8  ;;  %v5400_v14 = vpop.xlane.xlu2 %1162 }
 0x25a   : > { %v1019_v29 = vpop.xlane.xlu0 %1018  ;;  %v1333_v39 = vmul.f32 %v5398_v2, %v5371_v53  ;;  %v1300_v1 = vsel %vm1297_vm9, %v1299_v4, %v1295_v52  ;;  %4567 = vrcp.f32 %v5400_v14  ;;  %v5409_v61 = vpop.xlane.xlu1 %2351  ;;  %v2380_v52 = vsel %vm953_vm3, %v5267_v54, -inf }
 0x25b   : > { %v1071_v40 = vsub.f32 %v5121_v46, %v1019_v29  ;;  %v5411_v44 = vpop.f32.mrf.mxu3  ;;  %v1910_v36 = vmul.f32 %v1834_v34, %v1300_v1  ;;  %4569 = vpow2.f32 %v1122_v19  ;;  %v1072_v29 = vsub.f32 %v5133_v9, %v5353_v59 }
 0x25c   : > { %v4564_v55 = vpop.eup %4563  ;;  %v1334_v5 = vsub.f32 1.0, %v1333_v39  ;;  %v1837_v31 = vpop.f32.mrf.mxu1  ;;  %v1326_v16 = vand.u32 2147483647, %v5400_v14  ;;  %v1328_v39 = vand.u32 2147483648, %v5400_v14  ;;  %vm1338_vm13 = vweird.f32 %v5398_v2 }
 0x25d   : > { %v1124_v63 = vmul.f32 1.442695, %v1071_v40  ;;  %v4566_v56 = vpop.eup %4565  ;;  %v1942_v22 = vpack.c.bf16 %v1910_v36, %v1910_v36  ;;  %v1911_v51 = vmul.f32 %v1837_v31, %v1315_v0  ;;  %v2530_v46 = vsel %vm953_vm3, %v4564_v55, 0.0  ;;  %vm5448_vm1 = vmor %vm1337_vm14, %vm1338_vm13 }
 0x25e   : > { %1198 = vadd.xlane.f32.xlu2 %v1197_v24  ;;  %v3096_v34 = vpack.c.bf16 %v4566_v56, %v4564_v55  ;;  %v1335_v27 = vmul.f32 %v5398_v2, %v1334_v5  ;;  %v2533_v36 = vsel %vm953_vm3, %v4566_v56, 0.0  ;;  %v1343_v59 = vand.u32 2147483648, %v5371_v53 }
 0x25f   : > { %4571 = vpow2.f32 %v1124_v63  ;;  %2387 = vmax.xlane.f32.xlu0 %v2386_v13  ;;  %1975 = vst.msk [vmem:[#allocation3 + $0xc] sm:$0xf] %vm1971_vm10, %v1942_v22  ;;  %v1943_v37 = vpack.c.bf16 %v1911_v51, %v1911_v51  ;;  %2531 = vadd.xlane.f32.xlu1 %v2530_v46  ;;  %v1126_v0 = vmul.f32 1.442695, %v1072_v29  ;;  %vm1322_vm15 = vweird.f32 %v5400_v14 }
 0x260   : > { %v4568_v35 = vpop.eup %4567  ;;  %4276 = vmatmul.msk.bf16.gmra.mxu0 %vm953_vm3, %v3096_v34  ;;  %v1336_v13 = vadd.f32 %v5398_v2, %v1335_v27  ;;  %v1341_v56 = vand.u32 2147483647, %v5371_v53  ;;  %vm1327_vm4 = vcmp.eq.f32.partialorder %v1326_v16, 8.507059e+37  ;;  %v1329_v51 = vor.u32 1.1754944e-38, %v1328_v39 }
 0x261   : > { %v1318_v8 = vmul.f32 %v4568_v35, %v5400_v14  ;;  %1976 = vst.msk [vmem:[#allocation3 + $0x10] sm:$0xf] %vm1971_vm10, %v1943_v37  ;;  %v5423_v57 = vpop.xlane.xlu2 %1171  ;;  %v5425_v15 = vpop.eup %4569  ;;  %vm1323_vm12 = vweird.f32 %v4568_v35  ;;  %v1344_v29 = vor.u32 1.1754944e-38, %v1343_v59 }
 0x262   : > { %v2346_v49 = vpop.xlane.xlu0 %2345  ;;  %4573 = vrcp.f32 %v5423_v57  ;;  %v5428_v19 = vpop.xlane.xlu1 %1027  ;;  %vm1324_vm2 = vmor %vm1322_vm15, %vm1323_vm12  ;;  %v1340_v27 = vsel %vm5448_vm1, %v5398_v2, %v1336_v13  ;;  %vm1342_vm5 = vcmp.eq.f32.partialorder %v1341_v56, 8.507059e+37  ;;  %v1200_v2 = vsel %vm953_vm3, %v5376_v42, 0.0 }
 0x263   : > { %v5430_v4 = vpop.f32.mrf.mxu3  ;;  %v1319_v11 = vsub.f32 1.0, %v1318_v8  ;;  %v2428_v55 = vsub.f32 %v5123_v48, %v2346_v49  ;;  %v1345_v16 = vsel %vm1342_vm5, %v1344_v29, %v1340_v27  ;;  %v1373_v29 = vand.u32 2147483648, %v5423_v57 }
 0x264   : > { %v1839_v40 = vpop.f32.mrf.mxu1  ;;  %vm1367_vm7 = vweird.f32 %v5423_v57 }
 0x265   : > { %v4572_v1 = vpop.eup %4571  ;;  %v1320_v5 = vmul.f32 %v4568_v35, %v1319_v11  ;;  %v2466_v24 = vmul.f32 1.442695, %v2428_v55 }
 0x266   : > { %v1209_v63 = vsel %vm953_vm3, %v4572_v1, 0.0  ;;  %v1732_v9 = vpack.c.bf16 %v4572_v1, %v5425_v15  ;;  %2381 = vmax.xlane.f32.xlu2 %v2380_v52  ;;  %v2392_v1 = vsel %vm953_vm3, %v5355_v33, -inf }
 0x267   : > { %2534 = vadd.xlane.f32.xlu0 %v2533_v36  ;;  %v1321_v31 = vadd.f32 %v4568_v35, %v1320_v5  ;;  %1210 = vadd.xlane.f32.xlu1 %v1209_v63 }
 0x268   : > { %4140 = vmatmul.msk.bf16.gmra.mxu2 %vm953_vm3, %v1732_v9  ;;  %v5453_v22 = vpop.eup %4573 }
 0x269   : > { %v1363_v46 = vmul.f32 %v5453_v22, %v5423_v57  ;;  %v1325_v14 = vsel %vm1324_vm2, %v4568_v35, %v1321_v31  ;;  %v5458_v34 = vpop.xlane.xlu2 %1174  ;;  %vm1368_vm6 = vweird.f32 %v5453_v22 }
 0x26a   : > { %v2349_v37 = vpop.xlane.xlu0 %2348  ;;  %v1330_v8 = vsel %vm1327_vm4, %v1329_v51, %v1325_v14  ;;  %4575 = vrcp.f32 %v5458_v34  ;;  %v5465_v49 = vpop.xlane.xlu1 %2357  ;;  %vm1369_vm8 = vmor %vm1367_vm7, %vm1368_vm6  ;;  %vm1382_vm12 = vweird.f32 %v5458_v34 }
 0x26b   : > { %v2429_v53 = vsub.f32 %v5135_v12, %v2349_v37  ;;  %v5467_v52 = vpop.f32.mrf.mxu3  ;;  %4577 = vpow2.f32 %v1126_v0  ;;  %v1912_v11 = vmul.f32 %v1839_v40, %v1330_v8  ;;  %v1364_v36 = vsub.f32 1.0, %v1363_v46 }
 0x26c   : > { %v1842_v39 = vpop.f32.mrf.mxu1  ;;  %4579 = vpow2.f32 %v2466_v24 }
 0x26d   : > { %v2468_v35 = vmul.f32 1.442695, %v2429_v53  ;;  %v1944_v12 = vpack.c.bf16 %v1912_v11, %v1912_v11  ;;  %v1913_v13 = vmul.f32 %v1842_v39, %v1345_v16  ;;  %v1365_v59 = vmul.f32 %v5453_v22, %v1364_v36 }
 0x26e   : > { %1201 = vadd.xlane.f32.xlu2 %v1200_v2  ;;  %v1206_v53 = vsel %vm953_vm3, %v5425_v15, 0.0  ;;  %v2430_v11 = vsub.f32 %v5146_v20, %v5409_v61  ;;  %v1374_v2 = vor.u32 1.1754944e-38, %v1373_v29  ;;  %v2401_v29 = vsel %vm953_vm3, %v5430_v4, -inf }
 0x26f   : > { %4581 = vpow2.f32 %v2468_v35  ;;  %2393 = vmax.xlane.f32.xlu0 %v2392_v1  ;;  %1977 = vst.msk [vmem:[#allocation3 + $0x14] sm:$0xf] %vm1971_vm10, %v1944_v12  ;;  %v1945_v40 = vpack.c.bf16 %v1913_v13, %v1913_v13  ;;  %v1371_v35 = vand.u32 2147483647, %v5423_v57  ;;  %v1074_v12 = vsub.f32 %v5156_v32, %v5428_v19 }
 0x270   : > { %v5474_v55 = vpop.eup %4575  ;;  %v2470_v36 = vmul.f32 1.442695, %v2430_v11  ;;  %v1386_v32 = vand.u32 2147483647, %v5458_v34  ;;  %v1388_v19 = vand.u32 2147483648, %v5458_v34 }
 0x271   : > { %v4578_v5 = vpop.eup %4577  ;;  %v1378_v63 = vmul.f32 %v5474_v55, %v5458_v34  ;;  %1978 = vst.msk [vmem:[#allocation3 + $0x18] sm:$0xf] %vm1971_vm10, %v1945_v40  ;;  %v5479_v42 = vpop.xlane.xlu2 %1033  ;;  %vm1372_vm9 = vcmp.eq.f32.partialorder %v1371_v35, 8.507059e+37  ;;  %vm1383_vm11 = vweird.f32 %v5474_v55 }
 0x272   : > { %v1025_v9 = vpop.xlane.xlu0 %1024  ;;  %v5483_v31 = vpop.xlane.xlu1 %1036  ;;  %v1212_v14 = vsel %vm953_vm3, %v4578_v5, 0.0  ;;  %vm5533_vm13 = vmor %vm1382_vm12, %vm1383_vm11  ;;  %vm1387_vm14 = vcmp.eq.f32.partialorder %v1386_v32, 8.507059e+37 }
 0x273   : > { %v1073_v0 = vsub.f32 %v5144_v18, %v1025_v9  ;;  %v5485_v48 = vpop.f32.mrf.mxu3  ;;  %v5487_v56 = vpop.eup %4579  ;;  %v1379_v37 = vsub.f32 1.0, %v1378_v63  ;;  %v1366_v18 = vadd.f32 %v5453_v22, %v1365_v59 }
 0x274   : > { %v5489_v24 = vpop.f32.mrf.mxu1 }
 0x275   : > { %v4582_v51 = vpop.eup %4581  ;;  %v1128_v46 = vmul.f32 1.442695, %v1073_v0  ;;  %v1370_v15 = vsel %vm1369_vm8, %v5453_v22, %v1366_v18  ;;  %v1380_v1 = vmul.f32 %v5474_v55, %v1379_v37  ;;  %v2398_v22 = vsel %vm953_vm3, %v5411_v44, -inf }
 0x276   : > { %v2539_v27 = vsel %vm953_vm3, %v4582_v51, 0.0  ;;  %v3097_v8 = vpack.c.bf16 %v4582_v51, %v5487_v56  ;;  %1207 = vadd.xlane.f32.xlu2 %v1206_v53  ;;  %v1375_v13 = vsel %vm1372_vm9, %v1374_v2, %v1370_v15  ;;  %v2389_v51 = vsel %vm953_vm3, %v5321_v21, -inf }
 0x277   : > { %4583 = vpow2.f32 %v1128_v46  ;;  %2540 = vadd.xlane.f32.xlu1 %v2539_v27  ;;  %1213 = vadd.xlane.f32.xlu0 %v1212_v14  ;;  %v1381_v0 = vadd.f32 %v5474_v55, %v1380_v1  ;;  %v1130_v27 = vmul.f32 1.442695, %v1074_v12  ;;  %v1389_v2 = vor.u32 1.1754944e-38, %v1388_v19 }
 0x278   : > { %4277 = vmatmul.msk.bf16.gmra.mxu0 %vm953_vm3, %v3097_v8 }
 0x279   : > { %v5508_v39 = vpop.xlane.xlu2 %1177  ;;  %v1385_v34 = vsel %vm5533_vm13, %v5474_v55, %v1381_v0  ;;  %v2536_v55 = vsel %vm953_vm3, %v5487_v56, 0.0 }
 0x27a   : > { %v5506_v16 = vpop.xlane.xlu0 %1168  ;;  %v5513_v20 = vpop.xlane.xlu1 %2366  ;;  %v1403_v56 = vand.u32 2147483648, %v5508_v39  ;;  %vm1397_vm5 = vweird.f32 %v5508_v39 }
 0x27b   : > { %4585 = vrcp.f32 %v5506_v16  ;;  %v5515_v61 = vpop.f32.mrf.mxu3  ;;  %v1358_v12 = vand.u32 2147483648, %v5506_v16  ;;  %vm1352_vm2 = vweird.f32 %v5506_v16 }
 0x27c   : > { %4587 = vrcp.f32 %v5508_v39  ;;  %v1847_v40 = vpop.f32.mrf.mxu1 }
 0x27d   : > { %v4584_v57 = vpop.eup %4583  ;;  %v1915_v63 = vmul.f32 %v1847_v40, %v1375_v13  ;;  %4589 = vpow2.f32 %v2470_v36 }
 0x27e   : > { %v1215_v9 = vsel %vm953_vm3, %v4584_v57, 0.0  ;;  %v1733_v59 = vpack.c.bf16 %v4584_v57, %v4578_v5  ;;  %2390 = vmax.xlane.f32.xlu2 %v2389_v51  ;;  %v1356_v57 = vand.u32 2147483647, %v5506_v16 }
 0x27f   : > { %2399 = vmax.xlane.f32.xlu1 %v2398_v22  ;;  %1216 = vadd.xlane.f32.xlu0 %v1215_v9  ;;  %v1947_v46 = vpack.c.bf16 %v1915_v63, %v1915_v63  ;;  %v1390_v63 = vsel %vm1387_vm14, %v1389_v2, %v1385_v34 }
 0x280   : > { %4141 = vmatmul.msk.bf16.gmra.mxu2 %vm953_vm3, %v1733_v59  ;;  %vm1357_vm6 = vcmp.eq.f32.partialorder %v1356_v57, 8.507059e+37 }
 0x281   : > { %v4586_v14 = vpop.eup %4585  ;;  %1980 = vst.msk [vmem:[#allocation3 + $0x20] sm:$0xf] %vm1971_vm10, %v1947_v46  ;;  %v2361_v53 = vpop.xlane.xlu2 %2360  ;;  %v1401_v46 = vand.u32 2147483647, %v5508_v39 }
 0x282   : > { %v5537_v37 = vpop.eup %4587  ;;  %v1348_v8 = vmul.f32 %v4586_v14, %v5506_v16  ;;  %v2355_v18 = vpop.xlane.xlu0 %2354  ;;  %v2433_v22 = vsub.f32 %v5181_v62, %v2361_v53  ;;  %vm1353_vm15 = vweird.f32 %v4586_v14 }
 0x283   : > { %v1393_v11 = vmul.f32 %v5537_v37, %v5508_v39  ;;  %v2431_v35 = vsub.f32 %v5158_v23, %v2355_v18  ;;  %v5549_v15 = vpop.xlane.xlu1 %1042  ;;  %v5551_v1 = vpop.f32.mrf.mxu3  ;;  %vm1398_vm1 = vweird.f32 %v5537_v37  ;;  %vm5568_vm4 = vmor %vm1352_vm2, %vm1353_vm15  ;;  %vm1402_vm8 = vcmp.eq.f32.partialorder %v1401_v46, 8.507059e+37 }
 0x284   : > { %v1349_v36 = vsub.f32 1.0, %v1348_v8  ;;  %v1849_v23 = vpop.f32.mrf.mxu1  ;;  %v2413_v0 = vsel %vm953_vm3, %v5551_v1, -inf  ;;  %v5560_v51 = vpop.eup %4589  ;;  %v1359_v8 = vor.u32 1.1754944e-38, %v1358_v12  ;;  %v2476_v18 = vmul.f32 1.442695, %v2433_v22  ;;  %vm1399_vm7 = vmor %vm1397_vm5, %vm1398_vm1 }
 0x285   : > { %v1394_v13 = vsub.f32 1.0, %v1393_v11  ;;  %v2472_v40 = vmul.f32 1.442695, %v2431_v35  ;;  %v1916_v59 = vmul.f32 %v1849_v23, %v1390_v63  ;;  %v2542_v5 = vsel %vm953_vm3, %v5560_v51, 0.0 }
 0x286   : > { %v1350_v9 = vmul.f32 %v4586_v14, %v1349_v36  ;;  %2537 = vadd.xlane.f32.xlu2 %v2536_v55  ;;  %v1404_v36 = vor.u32 1.1754944e-38, %v1403_v56 }
 0x287   : > { %4591 = vpow2.f32 %v2472_v40  ;;  %2414 = vmax.xlane.f32.xlu1 %v2413_v0  ;;  %2402 = vmax.xlane.f32.xlu0 %v2401_v29  ;;  %v1395_v32 = vmul.f32 %v5537_v37, %v1394_v13  ;;  %v1948_v19 = vpack.c.bf16 %v1916_v59, %v1916_v59  ;;  %v1077_v0 = vsub.f32 %v5191_v58, %v5483_v31 }
 0x288   : > { %v1351_v62 = vadd.f32 %v4586_v14, %v1350_v9  ;;  %4593 = vpow2.f32 %v1130_v27  ;;  %v1076_v9 = vsub.f32 %v5179_v60, %v5479_v42 }
 0x289   : > { %v1396_v53 = vadd.f32 %v5537_v37, %v1395_v32  ;;  %1981 = vst.msk [vmem:[#allocation3 + $0x24] sm:$0xf] %vm1971_vm10, %v1948_v19  ;;  %v5575_v16 = vpop.xlane.xlu2 %2363  ;;  %4595 = vpow2.f32 %v2476_v18  ;;  %v1136_v58 = vmul.f32 1.442695, %v1077_v0 }
 0x28a   : > { %v1031_v34 = vpop.xlane.xlu0 %1030  ;;  %v1355_v29 = vsel %vm5568_vm4, %v4586_v14, %v1351_v62  ;;  %v1134_v42 = vmul.f32 1.442695, %v1076_v9 }
 0x28b   : > { %v1075_v11 = vsub.f32 %v5169_v7, %v1031_v34  ;;  %v5582_v35 = vpop.xlane.xlu1 %2372  ;;  %v5584_v2 = vpop.f32.mrf.mxu3  ;;  %v1400_v39 = vsel %vm1399_vm7, %v5537_v37, %v1396_v53  ;;  %v1360_v57 = vsel %vm1357_vm6, %v1359_v8, %v1355_v29  ;;  %v2432_v37 = vsub.f32 %v5171_v47, %v5465_v49 }
 0x28c   : > { %v1914_v12 = vmul.f32 %v5489_v24, %v1360_v57  ;;  %v1405_v40 = vsel %vm1402_vm8, %v1404_v36, %v1400_v39  ;;  %v1852_v22 = vpop.f32.mrf.mxu1  ;;  %v2416_v7 = vsel %vm953_vm3, %v5584_v2, -inf  ;;  %v2395_v24 = vsel %vm953_vm3, %v5373_v6, -inf }
 0x28d   : > { %v4592_v55 = vpop.eup %4591  ;;  %v1132_v13 = vmul.f32 1.442695, %v1075_v11  ;;  %v1917_v14 = vmul.f32 %v1852_v22, %v1405_v40  ;;  %v2474_v62 = vmul.f32 1.442695, %v2432_v37  ;;  %v2435_v8 = vsub.f32 %v5205_v28, %v5513_v20 }
 0x28e   : > { %v2545_v63 = vsel %vm953_vm3, %v4592_v55, 0.0  ;;  %v3098_v23 = vpack.c.bf16 %v4592_v55, %v5560_v51  ;;  %v1946_v27 = vpack.c.bf16 %v1914_v12, %v1914_v12  ;;  %2396 = vmax.xlane.f32.xlu2 %v2395_v24  ;;  %v5602_v47 = vpop.eup %4593  ;;  %v2434_v39 = vsub.f32 %v5193_v17, %v5575_v16 }
 0x28f   : > { %4597 = vpow2.f32 %v1132_v13  ;;  %2417 = vmax.xlane.f32.xlu1 %v2416_v7  ;;  %2546 = vadd.xlane.f32.xlu0 %v2545_v63  ;;  %v1949_v59 = vpack.c.bf16 %v1917_v14, %v1917_v14  ;;  %v4596_v56 = vpop.eup %4595  ;;  %v2480_v51 = vmul.f32 1.442695, %v2435_v8  ;;  %v2410_v12 = vsel %vm953_vm3, %v5515_v61, -inf }
 0x290   : > { %4278 = vmatmul.msk.bf16.gmra.mxu0 %vm953_vm3, %v3098_v23  ;;  %1979 = vst.msk [vmem:[#allocation3 + $0x1c] sm:$0xf] %vm1971_vm10, %v1946_v27  ;;  %v2551_v31 = vsel %vm953_vm3, %v4596_v56, 0.0  ;;  %v2404_v17 = vsel %vm953_vm3, %v5467_v52, -inf  ;;  %v2478_v16 = vmul.f32 1.442695, %v2434_v39 }
 0x291   : > { %1982 = vst.msk [vmem:[#allocation3 + $0x28] sm:$0xf] %vm1971_vm10, %v1949_v59  ;;  %v5605_v32 = vpop.xlane.xlu2 %1039 }
 0x292   : > { %v1181_v49 = vpop.xlane.xlu0 %1180 }
 0x293   : > { %4599 = vrcp.f32 %v1181_v49  ;;  %v5607_v60 = vpop.xlane.xlu1 %1192  ;;  %v1418_v57 = vand.u32 2147483648, %v1181_v49  ;;  %v1416_v40 = vand.u32 2147483647, %v1181_v49  ;;  %vm1412_vm11 = vweird.f32 %v1181_v49 }
 0x294   : > { %4601 = vrcp.f32 %v5607_v60  ;;  %v1854_v63 = vpop.f32.mrf.mxu1  ;;  %v1478_v59 = vand.u32 2147483648, %v5607_v60  ;;  %vm1472_vm15 = vweird.f32 %v5607_v60 }
 0x295   : > { %v5610_v19 = vpop.eup %4597  ;;  %4603 = vpow2.f32 %v2474_v62  ;;  %v1419_v27 = vor.u32 1.1754944e-38, %v1418_v57  ;;  %vm1417_vm14 = vcmp.eq.f32.partialorder %v1416_v40, 8.507059e+37 }
 0x296   : > { %v1734_v46 = vpack.c.bf16 %v5610_v19, %v5602_v47  ;;  %4605 = vpow2.f32 %v1134_v42  ;;  %2543 = vadd.xlane.f32.xlu2 %v2542_v5 }
 0x297   : > { %2552 = vadd.xlane.f32.xlu0 %v2551_v31  ;;  %4607 = vpow2.f32 %v1136_v58  ;;  %v1476_v58 = vand.u32 2147483647, %v5607_v60  ;;  %v1079_v31 = vsub.f32 %v5217_v45, %v5549_v15 }
 0x298   : > { %4142 = vmatmul.msk.bf16.gmra.mxu2 %vm953_vm3, %v1734_v46 }
 0x299   : > { %v4600_v18 = vpop.eup %4599  ;;  %v5622_v29 = vpop.xlane.xlu2 %1183  ;;  %vm1477_vm4 = vcmp.eq.f32.partialorder %v1476_v58, 8.507059e+37 }
 0x29a   : > { %v5620_v53 = vpop.eup %4601  ;;  %v1408_v34 = vmul.f32 %v4600_v18, %v1181_v49  ;;  %4609 = vrcp.f32 %v5622_v29  ;;  %vm1413_vm9 = vweird.f32 %v4600_v18  ;;  %v1431_v39 = vand.u32 2147483647, %v5622_v29 }
 0x29b   : > { %v1468_v11 = vmul.f32 %v5620_v53, %v5607_v60  ;;  %v4604_v20 = vpop.eup %4603  ;;  %4611 = vpow2.f32 %v2480_v51  ;;  %vm1414_vm12 = vmor %vm1412_vm11, %vm1413_vm9  ;;  %vm1473_vm13 = vweird.f32 %v5620_v53  ;;  %vm1427_vm5 = vweird.f32 %v5622_v29 }
 0x29c   : > { %v1409_v28 = vsub.f32 1.0, %v1408_v34  ;;  %v5631_v55 = vpop.eup %4605  ;;  %v3099_v22 = vpack.c.bf16 %v4596_v56, %v4604_v20  ;;  %vm5657_vm1 = vmor %vm1472_vm15, %vm1473_vm13  ;;  %v1433_v34 = vand.u32 2147483648, %v5622_v29  ;;  %v1857_v40 = vpop.f32.mrf.mxu1  ;;  %vm1432_vm7 = vcmp.eq.f32.partialorder %v1431_v39, 8.507059e+37 }
 0x29d   : > { %v1469_v36 = vsub.f32 1.0, %v1468_v11  ;;  %v5633_v14 = vpop.eup %4607  ;;  %v1479_v11 = vor.u32 1.1754944e-38, %v1478_v59 }
 0x29e   : > { %v1410_v13 = vmul.f32 %v4600_v18, %v1409_v28  ;;  %2405 = vmax.xlane.f32.xlu2 %v2404_v17  ;;  %v1735_v62 = vpack.c.bf16 %v5633_v14, %v5631_v55  ;;  %v2548_v28 = vsel %vm953_vm3, %v4604_v20, 0.0 }
 0x29f   : > { %v1470_v7 = vmul.f32 %v5620_v53, %v1469_v36  ;;  %2411 = vmax.xlane.f32.xlu0 %v2410_v12  ;;  %v1140_v36 = vmul.f32 1.442695, %v1079_v31 }
 0x2a0   : > { %v1411_v23 = vadd.f32 %v4600_v18, %v1410_v13  ;;  %v5638_v37 = vpop.f32.mrf.mxu2  ;;  %4279 = vmatmul.msk.bf16.gmra.mxu0 %vm953_vm3, %v3099_v22  ;;  %v4610_v24 = vpop.eup %4609  ;;  %v1434_v13 = vor.u32 1.1754944e-38, %v1433_v34 }
 0x2a1   : > { %v1471_v9 = vadd.f32 %v5620_v53, %v1470_v7  ;;  %v1423_v56 = vmul.f32 %v4610_v24, %v5622_v29  ;;  %v5646_v49 = vpop.xlane.xlu2 %1186  ;;  %v5667_v45 = vpop.eup %4611  ;;  %vm1428_vm2 = vweird.f32 %v4610_v24 }
 0x2a2   : > { %v1415_v0 = vsel %vm1414_vm12, %v4600_v18, %v1411_v23  ;;  %4613 = vrcp.f32 %v5646_v49  ;;  %v1078_v18 = vsub.f32 %v5203_v26, %v5605_v32  ;;  %vm1429_vm6 = vmor %vm1427_vm5, %vm1428_vm2  ;;  %v5675_v29 = vpop.xlane.xlu1 %1195  ;;  %vm1442_vm9 = vweird.f32 %v5646_v49 }
 0x2a3   : > { %v1420_v42 = vsel %vm1417_vm14, %v1419_v27, %v1415_v0  ;;  %4615 = vpow2.f32 %v2478_v16  ;;  %v1424_v5 = vsub.f32 1.0, %v1423_v56  ;;  %v1475_v60 = vsel %vm5657_vm1, %v5620_v53, %v1471_v9 }
 0x2a4   : > { %v1918_v46 = vmul.f32 %v1854_v63, %v1420_v42  ;;  %v1480_v32 = vsel %vm1477_vm4, %v1479_v11, %v1475_v60  ;;  %v1138_v12 = vmul.f32 1.442695, %v1078_v18  ;;  %4617 = vpow2.f32 %v1140_v36 }
 0x2a5   : > { %v1425_v51 = vmul.f32 %v4610_v24, %v1424_v5  ;;  %v1446_v0 = vand.u32 2147483647, %v5646_v49  ;;  %v1448_v56 = vand.u32 2147483648, %v5646_v49  ;;  %vm1487_vm4 = vweird.f32 %v5675_v29 }
 0x2a6   : > { %v1950_v15 = vpack.c.bf16 %v1918_v46, %v1918_v46  ;;  %2549 = vadd.xlane.f32.xlu2 %v2548_v28  ;;  %4619 = vpow2.f32 %v1138_v12  ;;  %v2407_v46 = vsel %vm953_vm3, %v5485_v48, -inf }
 0x2a7   : > { %v1426_v26 = vadd.f32 %v4610_v24, %v1425_v51  ;;  %4621 = vrcp.f32 %v5675_v29  ;;  %v1449_v8 = vor.u32 1.1754944e-38, %v1448_v56  ;;  %vm1447_vm12 = vcmp.eq.f32.partialorder %v1446_v0, 8.507059e+37 }
 0x2a8   : > { %1983 = vst.msk [vmem:[#allocation3 + $0x2c] sm:$0xf] %vm1971_vm10, %v1950_v15  ;;  %v1864_v53 = vpop.f32.mrf.mxu2  ;;  %4143 = vmatmul.msk.bf16.gmra.mxu2 %vm953_vm3, %v1735_v62  ;;  %v4614_v57 = vpop.eup %4613 }
 0x2a9   : > { %v1922_v22 = vmul.f32 %v1864_v53, %v1480_v32  ;;  %v4616_v7 = vpop.eup %4615  ;;  %v1430_v20 = vsel %vm1429_vm6, %v4610_v24, %v1426_v26  ;;  %v1438_v63 = vmul.f32 %v4614_v57, %v5646_v49  ;;  %v2370_v17 = vpop.xlane.xlu2 %2369  ;;  %vm1443_vm8 = vweird.f32 %v4614_v57 }
 0x2aa   : > { %v1435_v16 = vsel %vm1432_vm7, %v1434_v13, %v1430_v20  ;;  %v2436_v59 = vsub.f32 %v5215_v41, %v2370_v17  ;;  %v3100_v24 = vpack.c.bf16 %v5667_v45, %v4616_v7  ;;  %v1046_v62 = vpop.xlane.xlu0 %1045  ;;  %v2437_v41 = vsub.f32 %v5229_v3, %v5582_v35  ;;  %vm1444_vm11 = vmor %vm1442_vm9, %vm1443_vm8  ;;  %v5690_v18 = vpop.eup %4617 }
 0x2ab   : > { %v1954_v23 = vpack.c.bf16 %v1922_v22, %v1922_v22  ;;  %v1919_v27 = vmul.f32 %v1857_v40, %v1435_v16  ;;  %v1439_v9 = vsub.f32 1.0, %v1438_v63  ;;  %v1859_v35 = vpop.f32.mrf.mxu1  ;;  %v1080_v28 = vsub.f32 %v5251_v43, %v1046_v62  ;;  %v2379_v26 = vpop.xlane.xlu1 %2378 }
 0x2ac   : > { %v2482_v31 = vmul.f32 1.442695, %v2436_v59  ;;  %v5694_v11 = vpop.eup %4619  ;;  %v2484_v15 = vmul.f32 1.442695, %v2437_v41  ;;  %v2554_v53 = vsel %vm953_vm3, %v4616_v7, 0.0  ;;  %v2439_v22 = vsub.f32 %v5253_v38, %v2379_v26  ;;  %v5714_v17 = vpop.f32.mrf.mxu3 }
 0x2ad   : > { %1987 = vst.msk [vmem:[#allocation3 + $0x3c] sm:$0xf] %vm1971_vm10, %v1954_v23  ;;  %v1951_v42 = vpack.c.bf16 %v1919_v27, %v1919_v27  ;;  %v1440_v58 = vmul.f32 %v4614_v57, %v1439_v9  ;;  %v5697_v51 = vpop.eup %4621  ;;  %v1142_v40 = vmul.f32 1.442695, %v1080_v28  ;;  %v5716_v23 = vpop.f32.mrf.mxu0  ;;  %v2557_v59 = vsel %vm953_vm3, %v5667_v45, 0.0 }
 0x2ae   : > { %4623 = vpow2.f32 %v2482_v31  ;;  %2408 = vmax.xlane.f32.xlu2 %v2407_v46  ;;  %v1483_v12 = vmul.f32 %v5697_v51, %v5675_v29  ;;  %v2488_v38 = vmul.f32 1.442695, %v2439_v22  ;;  %vm1488_vm1 = vweird.f32 %v5697_v51 }
 0x2af   : > { %1984 = vst.msk [vmem:[#allocation3 + $0x30] sm:$0xf] %vm1971_vm10, %v1951_v42  ;;  %v1441_v5 = vadd.f32 %v4614_v57, %v1440_v58  ;;  %vm5760_vm5 = vmor %vm1487_vm4, %vm1488_vm1 }
 0x2b0   : > { %4280 = vmatmul.msk.bf16.gmra.mxu0 %vm953_vm3, %v3100_v24  ;;  %v1484_v16 = vsub.f32 1.0, %v1483_v12 }
 0x2b1   : > { %v1445_v34 = vsel %vm1444_vm11, %v4614_v57, %v1441_v5  ;;  %v5692_v60 = vpop.xlane.xlu2 %1189  ;;  %v1736_v57 = vpack.c.bf16 %v5690_v18, %v5694_v11 }
 0x2b2   : > { %v1450_v3 = vsel %vm1447_vm12, %v1449_v8, %v1445_v34  ;;  %4625 = vrcp.f32 %v5692_v60  ;;  %v5706_v13 = vpop.xlane.xlu0 %2519  ;;  %v1463_v24 = vand.u32 2147483648, %v5692_v60  ;;  %vm1457_vm14 = vweird.f32 %v5692_v60 }
 0x2b3   : > { %v1920_v49 = vmul.f32 %v1859_v35, %v1450_v3  ;;  %4627 = vpow2.f32 %v2484_v15  ;;  %v1461_v58 = vand.u32 2147483647, %v5692_v60  ;;  %v1485_v45 = vmul.f32 %v5697_v51, %v1484_v16 }
 0x2b4   : > { %v4624_v39 = vpop.eup %4623  ;;  %4629 = vrcp.f32 %v5706_v13  ;;  %v1464_v34 = vor.u32 1.1754944e-38, %v1463_v24  ;;  %vm2619_vm9 = vweird.f32 %v5706_v13 }
 0x2b5   : > { %v1952_v36 = vpack.c.bf16 %v1920_v49, %v1920_v49  ;;  %v2560_v32 = vsel %vm953_vm3, %v4624_v39, 0.0  ;;  %4631 = vpow2.f32 %v1142_v40  ;;  %vm1462_vm2 = vcmp.eq.f32.partialorder %v1461_v58, 8.507059e+37 }
 0x2b6   : > { %2561 = vadd.xlane.f32.xlu0 %v2560_v32  ;;  %2555 = vadd.xlane.f32.xlu2 %v2554_v53  ;;  %v1486_v49 = vadd.f32 %v5697_v51, %v1485_v45  ;;  %v5751_v32 = vpop.f32.mrf.mxu0  ;;  %v1491_v53 = vand.u32 2147483647, %v5675_v29 }
 0x2b7   : > { %1985 = vst.msk [vmem:[#allocation3 + $0x34] sm:$0xf] %vm1971_vm10, %v1952_v36  ;;  %v1493_v36 = vand.u32 2147483648, %v5675_v29 }
 0x2b8   : > { %v4626_v43 = vpop.eup %4625  ;;  %4144 = vmatmul.msk.bf16.gmra.mxu2 %vm953_vm3, %v1736_v57  ;;  %vm1492_vm6 = vcmp.eq.f32.partialorder %v1491_v53, 8.507059e+37 }
 0x2b9   : > { %v1453_v7 = vmul.f32 %v4626_v43, %v5692_v60  ;;  %v1049_v20 = vpop.xlane.xlu2 %1048  ;;  %v4628_v0 = vpop.eup %4627  ;;  %vm1458_vm13 = vweird.f32 %v4626_v43  ;;  %v1494_v29 = vor.u32 1.1754944e-38, %v1493_v36 }
 0x2ba   : > { %v1081_v63 = vsub.f32 %v5283_v10, %v1049_v20  ;;  %v2419_v10 = vsel %vm953_vm3, %v5714_v17, -inf  ;;  %v3101_v62 = vpack.c.bf16 %v4628_v0, %v4624_v39  ;;  %v5726_v31 = vpop.eup %4629  ;;  %vm5728_vm15 = vmor %vm1457_vm14, %vm1458_vm13  ;;  %v2563_v57 = vsel %vm953_vm3, %v4628_v0, 0.0 }
 0x2bb   : > { %v1454_v27 = vsub.f32 1.0, %v1453_v7  ;;  %v5742_v35 = vpop.eup %4631  ;;  %v2615_v15 = vmul.f32 %v5726_v31, %v5706_v13  ;;  %v1490_v7 = vsel %vm5760_vm5, %v5697_v51, %v1486_v49  ;;  %vm2620_vm8 = vweird.f32 %v5726_v31 }
 0x2bc   : > { %v1144_v9 = vmul.f32 1.442695, %v1081_v63  ;;  %v1495_v51 = vsel %vm1492_vm6, %v1494_v29, %v1490_v7 }
 0x2bd   : > { %v1455_v56 = vmul.f32 %v4626_v43, %v1454_v27  ;;  %v2616_v22 = vsub.f32 1.0, %v2615_v15 }
 0x2be   : > { %4633 = vpow2.f32 %v1144_v9  ;;  %2420 = vmax.xlane.f32.xlu0 %v2419_v10  ;;  %2558 = vadd.xlane.f32.xlu2 %v2557_v59 }
 0x2bf   : > { %v1456_v42 = vadd.f32 %v4626_v43, %v1455_v56  ;;  %4635 = vpow2.f32 %v2488_v38  ;;  %v2617_v56 = vmul.f32 %v5726_v31, %v2616_v22 }
 0x2c0   : > { %4281 = vmatmul.msk.bf16.gmra.mxu0 %vm953_vm3, %v3101_v62 }
 0x2c1   : > { %v5733_v41 = vpop.xlane.xlu0 %2528  ;;  %v2376_v5 = vpop.xlane.xlu2 %2375  ;;  %v1460_v8 = vsel %vm5728_vm15, %v4626_v43, %v1456_v42  ;;  %v2625_v42 = vand.u32 2147483648, %v5706_v13  ;;  %v2618_v36 = vadd.f32 %v5726_v31, %v2617_v56  ;;  %vm5805_vm15 = vmor %vm2619_vm9, %vm2620_vm8 }
 0x2c2   : > { %v5737_v60 = vpop.xlane.xlu1 %2525  ;;  %4637 = vrcp.f32 %v5733_v41  ;;  %v2438_v3 = vsub.f32 %v5241_v25, %v2376_v5  ;;  %v1465_v26 = vsel %vm1462_vm2, %v1464_v34, %v1460_v8  ;;  %vm2664_vm1 = vweird.f32 %v5733_v41 }
 0x2c3   : > { %4639 = vrcp.f32 %v5737_v60  ;;  %v1921_v43 = vmul.f32 %v5638_v37, %v1465_v26  ;;  %v2653_v5 = vand.u32 2147483647, %v5737_v60  ;;  %v2655_v8 = vand.u32 2147483648, %v5737_v60 }
 0x2c4   : > { %v5748_v39 = vpop.eup %4633  ;;  %v2486_v28 = vmul.f32 1.442695, %v2438_v3  ;;  %vm2649_vm11 = vweird.f32 %v5737_v60 }
 0x2c5   : > { %v1737_v25 = vpack.c.bf16 %v5748_v39, %v5742_v35  ;;  %v4636_v40 = vpop.eup %4635  ;;  %v1953_v63 = vpack.c.bf16 %v1921_v43, %v1921_v43  ;;  %vm2654_vm13 = vcmp.eq.f32.partialorder %v2653_v5, 8.507059e+37  ;;  %v2656_v12 = vor.u32 1.1754944e-38, %v2655_v8 }
 0x2c6   : > { %4641 = vpow2.f32 %v2486_v28  ;;  %2564 = vadd.xlane.f32.xlu0 %v2563_v57  ;;  %v2569_v45 = vsel %vm953_vm3, %v4636_v40, 0.0  ;;  %v2626_v57 = vor.u32 1.1754944e-38, %v2625_v42 }
 0x2c7   : > { %1986 = vst.msk [vmem:[#allocation3 + $0x38] sm:$0xf] %vm1971_vm10, %v1953_v63 }
 0x2c8   : > { %v5768_v20 = vpop.eup %4637  ;;  %4145 = vmatmul.msk.bf16.gmra.mxu2 %vm953_vm3, %v1737_v25  ;;  %v2623_v25 = vand.u32 2147483647, %v5706_v13 }
 0x2c9   : > { %v4640_v16 = vpop.eup %4639  ;;  %v2660_v27 = vmul.f32 %v5768_v20, %v5733_v41  ;;  %v5775_v37 = vpop.xlane.xlu2 %2522  ;;  %vm2665_vm14 = vweird.f32 %v5768_v20 }
 0x2ca   : > { %v5773_v9 = vpop.xlane.xlu0 %1204  ;;  %v2645_v59 = vmul.f32 %v4640_v16, %v5737_v60  ;;  %v5778_v0 = vpop.xlane.xlu1 %2384  ;;  %vm2650_vm7 = vweird.f32 %v4640_v16  ;;  %vm2624_vm2 = vcmp.eq.f32.partialorder %v2623_v25, 8.507059e+37  ;;  %vm2666_vm4 = vmor %vm2664_vm1, %vm2665_vm14 }
 0x2cb   : > { %4643 = vrcp.f32 %v5773_v9  ;;  %v1867_v38 = vpop.f32.mrf.mxu2  ;;  %v2661_v24 = vsub.f32 1.0, %v2660_v27  ;;  %vm2651_vm12 = vmor %vm2649_vm11, %vm2650_vm7  ;;  %v2622_v27 = vsel %vm5805_vm15, %v5726_v31, %v2618_v36  ;;  %vm1532_vm6 = vweird.f32 %v5773_v9 }
 0x2cc   : > { %v1923_v10 = vmul.f32 %v1867_v38, %v1495_v51  ;;  %v4642_v62 = vpop.eup %4641  ;;  %v2646_v58 = vsub.f32 1.0, %v2645_v59  ;;  %4645 = vrcp.f32 %v5775_v37  ;;  %v2670_v51 = vand.u32 2147483648, %v5733_v41 }
 0x2cd   : > { %v3205_v34 = vpop.f32.mrf.mxu0  ;;  %v2566_v3 = vsel %vm953_vm3, %v4642_v62, 0.0  ;;  %v2662_v15 = vmul.f32 %v5768_v20, %v2661_v24  ;;  %v3102_v28 = vpack.c.bf16 %v4636_v40, %v4642_v62  ;;  %v2627_v56 = vsel %vm2624_vm2, %v2626_v57, %v2622_v27 }
 0x2ce   : > { %v1955_v46 = vpack.c.bf16 %v1923_v10, %v1923_v10  ;;  %v2647_v49 = vmul.f32 %v4640_v16, %v2646_v58  ;;  %2567 = vadd.xlane.f32.xlu1 %v2566_v3  ;;  %2570 = vadd.xlane.f32.xlu0 %v2569_v45  ;;  %v2441_v62 = vsub.f32 %v5281_v50, %v5778_v0  ;;  %v2671_v42 = vor.u32 1.1754944e-38, %v2670_v51 }
 0x2cf   : > { %v2663_v63 = vadd.f32 %v5768_v20, %v2662_v15  ;;  %v1536_v57 = vand.u32 2147483647, %v5773_v9 }
 0x2d0   : > { %1988 = vst.msk [vmem:[#allocation3 + $0x40] sm:$0xf] %vm1971_vm10, %v1955_v46  ;;  %v2648_v53 = vadd.f32 %v4640_v16, %v2647_v49  ;;  %4282 = vmatmul.msk.bf16.gmra.mxu0 %vm953_vm3, %v3102_v28  ;;  %v5836_v46 = vmul.f32 %v5716_v23, %v2627_v56  ;;  %v2492_v36 = vmul.f32 1.442695, %v2441_v62 }
 0x2d1   : > { %v5792_v26 = vpop.eup %4643  ;;  %v5800_v40 = vpop.xlane.xlu2 %1198  ;;  %v2667_v31 = vsel %vm2666_vm4, %v5768_v20, %v2663_v63  ;;  %vm5885_vm15 = vcmp.eq.f32.partialorder %v1536_v57, 8.507059e+37 }
 0x2d2   : > { %v5798_v43 = vpop.xlane.xlu0 %2387  ;;  %v1528_v13 = vmul.f32 %v5792_v26, %v5773_v9  ;;  %v2652_v60 = vsel %vm2651_vm12, %v4640_v16, %v2648_v53  ;;  %v5812_v7 = vpop.xlane.xlu1 %2531  ;;  %v2668_v16 = vand.u32 2147483647, %v5733_v41  ;;  %vm1533_vm7 = vweird.f32 %v5792_v26 }
 0x2d3   : > { %v5814_v29 = vpop.f32.mrf.mxu2  ;;  %v2657_v59 = vsel %vm2654_vm13, %v2656_v12, %v2652_v60  ;;  %4647 = vrcp.f32 %v5812_v7  ;;  %v5830_v45 = vpop.eup %4645  ;;  %v1538_v12 = vand.u32 2147483648, %v5773_v9  ;;  %v1506_v51 = vand.u32 2147483647, %v5800_v40  ;;  %vm5867_vm12 = vmor %vm1532_vm6, %vm1533_vm7 }
 0x2d4   : > { %v3282_v38 = vmul.f32 %v3205_v34, %v2657_v59  ;;  %4649 = vrcp.f32 %v5800_v40  ;;  %v1529_v24 = vsub.f32 1.0, %v1528_v13  ;;  %vm2669_vm5 = vcmp.eq.f32.partialorder %v2668_v16, 8.507059e+37 }
 0x2d5   : > { %v3207_v58 = vpop.f32.mrf.mxu0  ;;  %v2672_v5 = vsel %vm2669_vm5, %v2671_v42, %v2667_v31  ;;  %v2630_v22 = vmul.f32 %v5830_v45, %v5775_v37  ;;  %vm2679_vm11 = vweird.f32 %v5812_v7  ;;  %v2685_v16 = vand.u32 2147483648, %v5812_v7 }
 0x2d6   : > { %v3314_v10 = vpack.c.bf16 %v3282_v38, %v3282_v38  ;;  %v1530_v50 = vmul.f32 %v5792_v26, %v1529_v24  ;;  %v3283_v3 = vmul.f32 %v3207_v58, %v2672_v5  ;;  %vm1502_vm13 = vweird.f32 %v5800_v40 }
 0x2d7   : > { %v2683_v62 = vand.u32 2147483647, %v5812_v7  ;;  %vm1507_vm2 = vcmp.eq.f32.partialorder %v1506_v51, 8.507059e+37  ;;  %v3312_v57 = vpack.c.bf16 %v5836_v46, %v5836_v46  ;;  %vm2634_vm5 = vweird.f32 %v5775_v37 }
 0x2d8   : > { %3380 = vrot.lane.b32.xlu2 %v3314_v10, %s4784_s17  ;;  %v3315_v60 = vpack.c.bf16 %v3283_v3, %v3283_v3  ;;  %v1531_v27 = vadd.f32 %v5792_v26, %v1530_v50  ;;  %v1539_v50 = vor.u32 1.1754944e-38, %v1538_v12  ;;  %vm2635_vm6 = vweird.f32 %v5830_v45 }
 0x2d9   : > { %v5833_v41 = vpop.eup %4647  ;;  %v2382_v20 = vpop.xlane.xlu2 %2381  ;;  %vm2684_vm4 = vcmp.eq.f32.partialorder %v2683_v62, 8.507059e+37  ;;  %v2442_v58 = vsub.f32 %v5294_v30, %v5798_v43 }
 0x2da   : > { %v5838_v8 = vpop.xlane.xlu0 %2534  ;;  %v4650_v34 = vpop.eup %4649  ;;  %v2675_v0 = vmul.f32 %v5833_v41, %v5812_v7  ;;  %v2440_v49 = vsub.f32 %v5267_v54, %v2382_v20  ;;  %v1508_v54 = vand.u32 2147483648, %v5800_v40  ;;  %vm2680_vm8 = vweird.f32 %v5833_v41 }
 0x2db   : > { %v5843_v15 = vpop.xlane.xlu1 %1210  ;;  %v5846_v28 = vpop.f32.mrf.mxu2  ;;  %v1498_v23 = vmul.f32 %v4650_v34, %v5800_v40  ;;  %vm1503_vm9 = vweird.f32 %v4650_v34  ;;  %vm5876_vm14 = vmor %vm2679_vm11, %vm2680_vm8  ;;  %v1535_v20 = vsel %vm5867_vm12, %v5792_v26, %v1531_v27 }
 0x2dc   : > { %4651 = vrcp.f32 %v5843_v15  ;;  %v2676_v25 = vsub.f32 1.0, %v2675_v0  ;;  %v2490_v53 = vmul.f32 1.442695, %v2440_v49  ;;  %vm1504_vm1 = vmor %vm1502_vm13, %vm1503_vm9  ;;  %v1509_v5 = vor.u32 1.1754944e-38, %v1508_v54 }
 0x2dd   : > { %v1499_v13 = vsub.f32 1.0, %v1498_v23  ;;  %v2631_v0 = vsub.f32 1.0, %v2630_v22  ;;  %vm5935_vm8 = vmor %vm2634_vm5, %vm2635_vm6  ;;  %vm1562_vm9 = vweird.f32 %v5843_v15 }
 0x2de   : > { %v2677_v63 = vmul.f32 %v5833_v41, %v2676_v25  ;;  %4653 = vpow2.f32 %v2490_v53  ;;  %v2686_v25 = vor.u32 1.1754944e-38, %v2685_v16 }
 0x2df   : > { %v1500_v59 = vmul.f32 %v4650_v34, %v1499_v13  ;;  %4655 = vpow2.f32 %v2492_v36 }
 0x2e0   : > { %v2678_v38 = vadd.f32 %v5833_v41, %v2677_v63  ;;  %3382 = vrot.lane.b32.xlu2 %v3315_v60, %s4784_s17  ;;  %v3210_v60 = vpop.f32.mrf.mxu0 }
 0x2e1   : > { %v1501_v10 = vadd.f32 %v4650_v34, %v1500_v59  ;;  %v5883_v9 = vpop.xlane.xlu2 %1201 }
 0x2e2   : > { %v5871_v24 = vpop.eup %4651  ;;  %v5881_v42 = vpop.xlane.xlu0 %2393  ;;  %v2682_v49 = vsel %vm5876_vm14, %v5833_v41, %v2678_v38  ;;  %4657 = vrcp.f32 %v5883_v9  ;;  %v2632_v41 = vmul.f32 %v5830_v45, %v2631_v0  ;;  %v2638_v0 = vand.u32 2147483647, %v5775_v37 }
 0x2e3   : > { %v1558_v40 = vmul.f32 %v5871_v24, %v5843_v15  ;;  %v1874_v7 = vpop.f32.mrf.mxu2  ;;  %v1505_v3 = vsel %vm1504_vm1, %v4650_v34, %v1501_v10  ;;  %v1540_v34 = vsel %vm5885_vm15, %v1539_v50, %v1535_v20  ;;  %v2687_v22 = vsel %vm2684_vm4, %v2686_v25, %v2682_v49 }
 0x2e4   : > { %v1510_v36 = vsel %vm1507_vm2, %v1509_v5, %v1505_v3  ;;  %v4654_v53 = vpop.eup %4653  ;;  %v1926_v13 = vmul.f32 %v1874_v7, %v1540_v34  ;;  %v3284_v59 = vmul.f32 %v3210_v60, %v2687_v22  ;;  %v2640_v10 = vand.u32 2147483648, %v5775_v37 }
 0x2e5   : > { %v1559_v23 = vsub.f32 1.0, %v1558_v40  ;;  %v1924_v26 = vmul.f32 %v5814_v29, %v1510_v36  ;;  %v5904_v12 = vpop.eup %4655  ;;  %v2572_v46 = vsel %vm953_vm3, %v4654_v53, 0.0  ;;  %vm1563_vm7 = vweird.f32 %v5871_v24 }
 0x2e6   : > { %v1958_v27 = vpack.c.bf16 %v1926_v13, %v1926_v13  ;;  %v3103_v29 = vpack.c.bf16 %v5904_v12, %v4654_v53  ;;  %2573 = vadd.xlane.f32.xlu0 %v2572_v46  ;;  %v2633_v62 = vadd.f32 %v5830_v45, %v2632_v41  ;;  %v3316_v5 = vpack.c.bf16 %v3284_v59, %v3284_v59  ;;  %vm5943_vm11 = vmor %vm1562_vm9, %vm1563_vm7 }
 0x2e7   : > { %v1956_v54 = vpack.c.bf16 %v1924_v26, %v1924_v26  ;;  %3376 = vrot.lane.b32.xlu1 %v3312_v57, %s4784_s17  ;;  %v1560_v63 = vmul.f32 %v5871_v24, %v1559_v23  ;;  %v1568_v20 = vand.u32 2147483648, %v5843_v15  ;;  %v1566_v7 = vand.u32 2147483647, %v5843_v15 }
 0x2e8   : > { %v5914_v38 = vpop.eup %4657  ;;  %1991 = vst.msk [vmem:[#allocation3 + $0x4c] sm:$0xf] %vm1971_vm10, %v1958_v27  ;;  %4283 = vmatmul.msk.bf16.gmra.mxu0 %vm953_vm3, %v3103_v29  ;;  %v2637_v3 = vsel %vm5935_vm8, %v5830_v45, %v2633_v62  ;;  %v2641_v36 = vor.u32 1.1754944e-38, %v2640_v10  ;;  %v2494_v15 = vmul.f32 1.442695, %v2442_v58  ;;  %v5955_v37 = vpop.f32.mrf.mxu0  ;;  %vm2639_vm13 = vcmp.eq.f32.partialorder %v2638_v0, 8.507059e+37 }
 0x2e9   : > { %1989 = vst.msk [vmem:[#allocation3 + $0x44] sm:$0xf] %vm1971_vm10, %v1956_v54  ;;  %v5918_v16 = vpop.xlane.xlu2 %1207  ;;  %v1561_v31 = vadd.f32 %v5871_v24, %v1560_v63  ;;  %v1513_v40 = vmul.f32 %v5914_v38, %v5883_v9  ;;  %v1569_v53 = vor.u32 1.1754944e-38, %v1568_v20  ;;  %vm1567_vm12 = vcmp.eq.f32.partialorder %v1566_v7, 8.507059e+37 }
 0x2ea   : > { %v5912_v51 = vpop.xlane.xlu0 %1213  ;;  %v2642_v41 = vsel %vm2639_vm13, %v2641_v36, %v2637_v3  ;;  %v1551_v29 = vand.u32 2147483647, %v5918_v16  ;;  %v1553_v59 = vand.u32 2147483648, %v5918_v16  ;;  %vm1517_vm15 = vweird.f32 %v5883_v9 }
 0x2eb   : > { %v5920_v56 = vpop.f32.mrf.mxu2  ;;  %4659 = vrcp.f32 %v5912_v51  ;;  %v1565_v43 = vsel %vm5943_vm11, %v5871_v24, %v1561_v31  ;;  %v1514_v23 = vsub.f32 1.0, %v1513_v40  ;;  %v3281_v31 = vmul.f32 %v5751_v32, %v2642_v41 }
 0x2ec   : > { %4661 = vrcp.f32 %v5918_v16  ;;  %v1570_v13 = vsel %vm1567_vm12, %v1569_v53, %v1565_v43  ;;  %vm1518_vm1 = vweird.f32 %v5914_v38  ;;  %vm1547_vm2 = vweird.f32 %v5918_v16 }
 0x2ed   : > { %v1515_v63 = vmul.f32 %v5914_v38, %v1514_v23  ;;  %v1523_v7 = vand.u32 2147483648, %v5883_v9  ;;  %vm1552_vm5 = vcmp.eq.f32.partialorder %v1551_v29, 8.507059e+37  ;;  %v1554_v0 = vor.u32 1.1754944e-38, %v1553_v59  ;;  %vm5994_vm7 = vmor %vm1517_vm15, %vm1518_vm1 }
 0x2ee   : > { %v3313_v3 = vpack.c.bf16 %v3281_v31, %v3281_v31  ;;  %vm1577_vm8 = vweird.f32 %v5912_v51 }
 0x2ef   : > { %3384 = vrot.lane.b32.xlu1 %v3316_v5, %s4784_s17  ;;  %v1521_v5 = vand.u32 2147483647, %v5883_v9  ;;  %v1516_v40 = vadd.f32 %v5914_v38, %v1515_v63 }
 0x2f1   : > { %v5953_v49 = vpop.eup %4659  ;;  %v2391_v24 = vpop.xlane.xlu2 %2390  ;;  %v1520_v9 = vsel %vm5994_vm7, %v5914_v38, %v1516_v40  ;;  %vm1522_vm11 = vcmp.eq.f32.partialorder %v1521_v5, 8.507059e+37 }
 0x2f2   : > { %v5957_v25 = vpop.xlane.xlu0 %1216  ;;  %v4662_v57 = vpop.eup %4661  ;;  %v1573_v26 = vmul.f32 %v5953_v49, %v5912_v51  ;;  %v2443_v22 = vsub.f32 %v5321_v21, %v2391_v24  ;;  %vm1578_vm6 = vweird.f32 %v5953_v49  ;;  %v1583_v24 = vand.u32 2147483648, %v5912_v51 }
 0x2f3   : > { %4663 = vrcp.f32 %v5957_v25  ;;  %v1879_v34 = vpop.f32.mrf.mxu2  ;;  %v1543_v45 = vmul.f32 %v4662_v57, %v5918_v16  ;;  %vm1548_vm14 = vweird.f32 %v4662_v57  ;;  %vm6010_vm9 = vmor %vm1577_vm8, %vm1578_vm6  ;;  %v1598_v40 = vand.u32 2147483648, %v5957_v25 }
 0x2f4   : > { %v1574_v54 = vsub.f32 1.0, %v1573_v26  ;;  %v1928_v60 = vmul.f32 %v1879_v34, %v1570_v13  ;;  %4665 = vpow2.f32 %v2494_v15  ;;  %v2496_v46 = vmul.f32 1.442695, %v2443_v22  ;;  %vm1549_vm4 = vmor %vm1547_vm2, %vm1548_vm14 }
 0x2f5   : > { %v1544_v27 = vsub.f32 1.0, %v1543_v45  ;;  %v5982_v30 = vpop.f32.mrf.mxu0  ;;  %v1581_v45 = vand.u32 2147483647, %v5912_v51  ;;  %v2444_v22 = vsub.f32 %v5355_v33, %v5881_v42  ;;  %v1524_v13 = vor.u32 1.1754944e-38, %v1523_v7  ;;  %v6019_v33 = vpop.xlane.xlu1 %2540 }
 0x2f6   : > { %v1960_v10 = vpack.c.bf16 %v1928_v60, %v1928_v60  ;;  %4667 = vpow2.f32 %v2496_v46  ;;  %v1575_v21 = vmul.f32 %v5953_v49, %v1574_v54  ;;  %v1584_v38 = vor.u32 1.1754944e-38, %v1583_v24 }
 0x2f7   : > { %v1545_v62 = vmul.f32 %v4662_v57, %v1544_v27  ;;  %v1525_v63 = vsel %vm1522_vm11, %v1524_v13, %v1520_v9  ;;  %vm1582_vm12 = vcmp.eq.f32.partialorder %v1581_v45, 8.507059e+37  ;;  %v2498_v46 = vmul.f32 1.442695, %v2444_v22 }
 0x2f8   : > { %1993 = vst.msk [vmem:[#allocation3 + $0x54] sm:$0xf] %vm1971_vm10, %v1960_v10  ;;  %v1576_v16 = vadd.f32 %v5953_v49, %v1575_v21  ;;  %v1925_v21 = vmul.f32 %v5846_v28, %v1525_v63  ;;  %vm1592_vm14 = vweird.f32 %v5957_v25 }
 0x2f9   : > { %v5969_v58 = vpop.eup %4663  ;;  %v1546_v20 = vadd.f32 %v4662_v57, %v1545_v62  ;;  %v5984_v43 = vpop.xlane.xlu2 %2537 }
 0x2fa   : > { %v1588_v32 = vmul.f32 %v5969_v58, %v5957_v25  ;;  %v5979_v50 = vpop.xlane.xlu0 %2402  ;;  %v5986_v36 = vpop.eup %4665  ;;  %4669 = vrcp.f32 %v5984_v43  ;;  %3378 = vrot.lane.b32.xlu0 %v3313_v3, %s4784_s17  ;;  %v1580_v51 = vsel %vm6010_vm9, %v5953_v49, %v1576_v16  ;;  %vm1593_vm13 = vweird.f32 %v5969_v58 }
 0x2fb   : > { %v1550_v15 = vsel %vm1549_vm4, %v4662_v57, %v1546_v20  ;;  %v1585_v59 = vsel %vm1582_vm12, %v1584_v38, %v1580_v51  ;;  %4671 = vpow2.f32 %v2498_v46  ;;  %vm1594_vm15 = vmor %vm1592_vm14, %vm1593_vm13  ;;  %v1957_v28 = vpack.c.bf16 %v1925_v21, %v1925_v21 }
 0x2fc   : > { %v1589_v23 = vsub.f32 1.0, %v1588_v32  ;;  %v1555_v26 = vsel %vm1552_vm5, %v1554_v0, %v1550_v15  ;;  %v4668_v34 = vpop.eup %4667  ;;  %v1596_v0 = vand.u32 2147483647, %v5957_v25  ;;  %v1599_v15 = vor.u32 1.1754944e-38, %v1598_v40 }
 0x2fd   : > { %v1927_v57 = vmul.f32 %v5920_v56, %v1555_v26  ;;  %v3104_v41 = vpack.c.bf16 %v4668_v34, %v5986_v36  ;;  %v6030_v5 = vpop.f32.mrf.mxu0  ;;  %v2581_v3 = vsel %vm953_vm3, %v4668_v34, 0.0  ;;  %1990 = vst.msk [vmem:[#allocation3 + $0x48] sm:$0xf] %vm1971_vm10, %v1957_v28  ;;  %v2447_v9 = vsub.f32 %v5430_v4, %v5979_v50 }
 0x2fe   : > { %v1590_v60 = vmul.f32 %v5969_v58, %v1589_v23  ;;  %vm1597_vm1 = vcmp.eq.f32.partialorder %v1596_v0, 8.507059e+37  ;;  %v2715_v38 = vand.u32 2147483648, %v5984_v43  ;;  %vm2709_vm4 = vweird.f32 %v5984_v43 }
 0x2ff   : > { %v1959_v56 = vpack.c.bf16 %v1927_v57, %v1927_v57  ;;  %4284 = vmatmul.msk.bf16.gmra.mxu0 %vm953_vm3, %v3104_v41  ;;  %v2504_v51 = vmul.f32 1.442695, %v2447_v9 }
 0x300   : > { %v6024_v27 = vpop.eup %4669  ;;  %v1591_v62 = vadd.f32 %v5969_v58, %v1590_v60 }
 0x301   : > { %1992 = vst.msk [vmem:[#allocation3 + $0x50] sm:$0xf] %vm1971_vm10, %v1959_v56  ;;  %v2397_v29 = vpop.xlane.xlu2 %2396  ;;  %v2705_v20 = vmul.f32 %v6024_v27, %v5984_v43  ;;  %v6044_v57 = vpop.eup %4671  ;;  %vm2710_vm2 = vweird.f32 %v6024_v27 }
 0x302   : > { %v6022_v42 = vpop.xlane.xlu0 %2546  ;;  %v2445_v49 = vsub.f32 %v5373_v6, %v2397_v29  ;;  %v1595_v6 = vsel %vm1594_vm15, %v5969_v58, %v1591_v62  ;;  %v2400_v58 = vpop.xlane.xlu1 %2399  ;;  %v2713_v29 = vand.u32 2147483647, %v5984_v43  ;;  %vm6065_vm5 = vmor %vm2709_vm4, %vm2710_vm2  ;;  %vm2724_vm2 = vweird.f32 %v6019_v33 }
 0x303   : > { %v1882_v10 = vpop.f32.mrf.mxu2  ;;  %v2706_v23 = vsub.f32 1.0, %v2705_v20  ;;  %v1600_v53 = vsel %vm1597_vm1, %v1599_v15, %v1595_v6  ;;  %v2446_v54 = vsub.f32 %v5411_v44, %v2400_v58  ;;  %v2716_v20 = vor.u32 1.1754944e-38, %v2715_v38 }
 0x304   : > { %v1929_v31 = vmul.f32 %v1882_v10, %v1585_v59  ;;  %v2500_v32 = vmul.f32 1.442695, %v2445_v49  ;;  %vm2714_vm7 = vcmp.eq.f32.partialorder %v2713_v29, 8.507059e+37  ;;  %v2730_v29 = vand.u32 2147483648, %v6019_v33 }
 0x305   : > { %v2707_v22 = vmul.f32 %v6024_v27, %v2706_v23  ;;  %v2502_v44 = vmul.f32 1.442695, %v2446_v54 }
 0x306   : > { %v1961_v7 = vpack.c.bf16 %v1929_v31, %v1929_v31  ;;  %4673 = vpow2.f32 %v2500_v32 }
 0x307   : > { %v2708_v50 = vadd.f32 %v6024_v27, %v2707_v22 }
 0x308   : > { %1994 = vst.msk [vmem:[#allocation3 + $0x58] sm:$0xf] %vm1971_vm10, %v1961_v7 }
 0x309   : > { %2582 = vadd.xlane.f32.xlu2 %v2581_v3  ;;  %v2544_v25 = vpop.xlane.xlu2 %2543  ;;  %v2712_v40 = vsel %vm6065_vm5, %v6024_v27, %v2708_v50 }
 0x30a   : > { %v6040_v16 = vpop.xlane.xlu0 %2552  ;;  %v2745_v21 = vand.u32 2147483648, %v2544_v25  ;;  %v2743_v43 = vand.u32 2147483647, %v2544_v25  ;;  %vm2739_vm8 = vweird.f32 %v2544_v25  ;;  %v2717_v28 = vsel %vm2714_vm7, %v2716_v20, %v2712_v40 }
 0x30b   : > { %4675 = vrcp.f32 %v6040_v16  ;;  %v1884_v26 = vpop.f32.mrf.mxu2  ;;  %v2790_v54 = vand.u32 2147483648, %v6040_v16  ;;  %vm2784_vm13 = vweird.f32 %v6040_v16 }
 0x30c   : > { %4677 = vrcp.f32 %v2544_v25  ;;  %v1930_v24 = vmul.f32 %v1884_v26, %v1600_v53  ;;  %v4674_v34 = vpop.eup %4673  ;;  %v2746_v3 = vor.u32 1.1754944e-38, %v2745_v21  ;;  %vm2744_vm11 = vcmp.eq.f32.partialorder %v2743_v43, 8.507059e+37  ;;  %v2415_v43 = vpop.xlane.xlu1 %2414 }
 0x30d   : > { %v3220_v45 = vpop.f32.mrf.mxu0  ;;  %4679 = vrcp.f32 %v6019_v33  ;;  %v3105_v41 = vpack.c.bf16 %v4674_v34, %v6044_v57  ;;  %v2587_v6 = vsel %vm953_vm3, %v4674_v34, 0.0  ;;  %v2791_v38 = vor.u32 1.1754944e-38, %v2790_v54 }
 0x30e   : > { %v1962_v13 = vpack.c.bf16 %v1930_v24, %v1930_v24  ;;  %4681 = vpow2.f32 %v2504_v51  ;;  %v3286_v24 = vmul.f32 %v5982_v30, %v2717_v28  ;;  %v2788_v30 = vand.u32 2147483647, %v6040_v16 }
 0x30f   : > { %4285 = vmatmul.msk.bf16.gmra.mxu0 %vm953_vm3, %v3105_v41  ;;  %4683 = vpow2.f32 %v2502_v44  ;;  %v2731_v21 = vor.u32 1.1754944e-38, %v2730_v29 }
 0x310   : > { %1995 = vst.msk [vmem:[#allocation3 + $0x5c] sm:$0xf] %vm1971_vm10, %v1962_v13  ;;  %vm2789_vm15 = vcmp.eq.f32.partialorder %v2788_v30, 8.507059e+37  ;;  %4685 = vrcp.f32 %v5838_v8 }
 0x311   : > { %v6053_v56 = vpop.eup %4675  ;;  %v2406_v46 = vpop.xlane.xlu2 %2405 }
 0x312   : > { %v4678_v60 = vpop.eup %4677  ;;  %v2780_v4 = vmul.f32 %v6053_v56, %v6040_v16  ;;  %vm2785_vm12 = vweird.f32 %v6053_v56  ;;  %v2448_v13 = vsub.f32 %v5467_v52, %v2406_v46  ;;  %v2412_v52 = vpop.xlane.xlu0 %2411 }
 0x313   : > { %v2735_v63 = vmul.f32 %v4678_v60, %v2544_v25  ;;  %v6063_v59 = vpop.eup %4679  ;;  %vm2740_vm6 = vweird.f32 %v4678_v60  ;;  %vm2786_vm14 = vmor %vm2784_vm13, %vm2785_vm12 }
 0x314   : > { %v2781_v62 = vsub.f32 1.0, %v2780_v4  ;;  %v2720_v7 = vmul.f32 %v6063_v59, %v6019_v33  ;;  %vm2741_vm9 = vmor %vm2739_vm8, %vm2740_vm6  ;;  %v6080_v53 = vpop.eup %4681  ;;  %v2506_v4 = vmul.f32 1.442695, %v2448_v13  ;;  %vm2725_vm1 = vweird.f32 %v6063_v59 }
 0x315   : > { %v2736_v49 = vsub.f32 1.0, %v2735_v63  ;;  %v6069_v31 = vpop.f32.mrf.mxu0  ;;  %v6087_v34 = vpop.eup %4683  ;;  %vm2726_vm4 = vmor %vm2724_vm2, %vm2725_vm1  ;;  %vm2694_vm6 = vweird.f32 %v5838_v8 }
 0x316   : > { %v2782_v15 = vmul.f32 %v6053_v56, %v2781_v62  ;;  %v2721_v58 = vsub.f32 1.0, %v2720_v7  ;;  %v3106_v41 = vpack.c.bf16 %v6080_v53, %v6087_v34  ;;  %4687 = vpow2.f32 %v2506_v4  ;;  %v6113_v40 = vpop.eup %4685 }
 0x317   : > { %v2737_v32 = vmul.f32 %v4678_v60, %v2736_v49  ;;  %v2690_v28 = vmul.f32 %v6113_v40, %v5838_v8  ;;  %vm2695_vm12 = vweird.f32 %v6113_v40 }
 0x318   : > { %v2783_v22 = vadd.f32 %v6053_v56, %v2782_v15  ;;  %v2578_v15 = vsel %vm953_vm3, %v5986_v36, 0.0 }
 0x319   : > { %v2738_v0 = vadd.f32 %v4678_v60, %v2737_v32  ;;  %2588 = vadd.xlane.f32.xlu1 %v2587_v6  ;;  %v6078_v23 = vpop.xlane.xlu2 %2549 }
 0x31a   : > { %v2787_v51 = vsel %vm2786_vm14, %v6053_v56, %v2783_v22  ;;  %v2728_v56 = vand.u32 2147483647, %v6019_v33 }
 0x31b   : > { %v2742_v27 = vsel %vm2741_vm9, %v4678_v60, %v2738_v0  ;;  %v3318_v60 = vpack.c.bf16 %v3286_v24, %v3286_v24  ;;  %v2792_v46 = vsel %vm2789_vm15, %v2791_v38, %v2787_v51  ;;  %v2450_v0 = vsub.f32 %v5515_v61, %v2412_v52 }
 0x31c   : > { %v2747_v26 = vsel %vm2744_vm11, %v2746_v3, %v2742_v27  ;;  %vm2729_vm5 = vcmp.eq.f32.partialorder %v2728_v56, 8.507059e+37  ;;  %v6120_v33 = vpop.eup %4687  ;;  %v2451_v3 = vsub.f32 %v5551_v1, %v2415_v43  ;;  %v2691_v24 = vsub.f32 1.0, %v2690_v28 }
 0x31d   : > { %v6083_v9 = vmul.f32 %v3220_v45, %v2747_v26  ;;  %v6085_v25 = vpop.f32.mrf.mxu0  ;;  %v2722_v45 = vmul.f32 %v6063_v59, %v2721_v58  ;;  %v2510_v61 = vmul.f32 1.442695, %v2450_v0  ;;  %v2584_v52 = vsel %vm953_vm3, %v6044_v57, 0.0 }
 0x31e   : > { %v2512_v22 = vmul.f32 1.442695, %v2451_v3  ;;  %v2692_v30 = vmul.f32 %v6113_v40, %v2691_v24  ;;  %vm3472_vm9 = vcmask 257152   ;;  %v2700_v57 = vand.u32 2147483648, %v5838_v8 }
 0x31f   : > { %4286 = vmatmul.msk.bf16.gmra.mxu0 %vm953_vm3, %v3106_v41  ;;  %v2723_v16 = vadd.f32 %v6063_v59, %v2722_v45  ;;  %v2698_v45 = vand.u32 2147483647, %v5838_v8 }
 0x321   : > { %3388 = vrot.lane.b32.xlu2 %v3318_v60, %s4784_s17  ;;  %v2409_v50 = vpop.xlane.xlu2 %2408  ;;  %v2727_v62 = vsel %vm2726_vm4, %v6063_v59, %v2723_v16  ;;  %vm6190_vm4 = vmor %vm2694_vm6, %vm2695_vm12 }
 0x322   : > { %v2449_v63 = vsub.f32 %v5485_v48, %v2409_v50  ;;  %v2575_v48 = vsel %vm953_vm3, %v5904_v12, 0.0  ;;  %v2732_v7 = vsel %vm2729_vm5, %v2731_v21, %v2727_v62  ;;  %v2693_v21 = vadd.f32 %v6113_v40, %v2692_v30 }
 0x323   : > { %v3287_v12 = vmul.f32 %v6030_v5, %v2732_v7  ;;  %v2701_v30 = vor.u32 1.1754944e-38, %v2700_v57 }
 0x324   : > { %v2508_v10 = vmul.f32 1.442695, %v2449_v63  ;;  %2576 = vadd.xlane.f32.xlu0 %v2575_v48 }
 0x325   : > { %v3227_v44 = vpop.f32.mrf.mxu0  ;;  %v3319_v5 = vpack.c.bf16 %v3287_v12, %v3287_v12 }
 0x326   : > { %v6106_v49 = vmul.f32 %v3227_v44, %v2792_v46  ;;  %4689 = vpow2.f32 %v2508_v10  ;;  %v2418_v10 = vpop.xlane.xlu1 %2417 }
 0x329   : > { %v6115_v20 = vpop.xlane.xlu0 %2561  ;;  %v6117_v32 = vpop.xlane.xlu2 %2555 }
 0x32a   : > { %4691 = vrcp.f32 %v6115_v20  ;;  %v2805_v4 = vand.u32 2147483648, %v6117_v32  ;;  %v2803_v63 = vand.u32 2147483647, %v6117_v32  ;;  %v2835_v16 = vand.u32 2147483648, %v6115_v20 }
 0x32b   : > { %4693 = vrcp.f32 %v6117_v32  ;;  %vm2829_vm11 = vweird.f32 %v6115_v20  ;;  %v2833_v44 = vand.u32 2147483647, %v6115_v20  ;;  %vm2799_vm13 = vweird.f32 %v6117_v32 }
 0x32c   : > { %v6127_v6 = vpop.eup %4689  ;;  %2579 = vadd.xlane.f32.xlu0 %v2578_v15  ;;  %vm2804_vm1 = vcmp.eq.f32.partialorder %v2803_v63, 8.507059e+37  ;;  %v2836_v28 = vor.u32 1.1754944e-38, %v2835_v16 }
 0x32d   : > { %v6125_v59 = vpop.f32.mrf.mxu0  ;;  %v3107_v27 = vpack.c.bf16 %v6127_v6, %v6120_v33  ;;  %vm2834_vm2 = vcmp.eq.f32.partialorder %v2833_v44, 8.507059e+37 }
 0x32f   : > { %4287 = vmatmul.msk.bf16.gmra.mxu0 %vm953_vm3, %v3107_v27 }
 0x330   : > { %v4692_v26 = vpop.eup %4691 }
 0x331   : > { %v4694_v58 = vpop.eup %4693  ;;  %v2825_v13 = vmul.f32 %v4692_v26, %v6115_v20  ;;  %v6138_v41 = vpop.xlane.xlu0 %2420  ;;  %vm2830_vm7 = vweird.f32 %v4692_v26  ;;  %v2806_v20 = vor.u32 1.1754944e-38, %v2805_v4 }
 0x332   : > { %v6140_v1 = vpop.xlane.xlu2 %2558  ;;  %3390 = vrot.lane.b32.xlu1 %v3319_v5, %s4784_s17  ;;  %v2795_v36 = vmul.f32 %v4694_v58, %v6117_v32  ;;  %vm2800_vm8 = vweird.f32 %v4694_v58  ;;  %vm6161_vm14 = vmor %vm2829_vm11, %vm2830_vm7  ;;  %v2453_v27 = vsub.f32 %v5714_v17, %v6138_v41  ;;  %vm2699_vm7 = vcmp.eq.f32.partialorder %v2698_v45, 8.507059e+37 }
 0x333   : > { %4695 = vrcp.f32 %v6140_v1  ;;  %v2826_v54 = vsub.f32 1.0, %v2825_v13  ;;  %vm2801_vm15 = vmor %vm2799_vm13, %vm2800_vm8  ;;  %vm2814_vm6 = vweird.f32 %v6140_v1 }
 0x334   : > { %4697 = vpow2.f32 %v2510_v61  ;;  %v2796_v51 = vsub.f32 1.0, %v2795_v36  ;;  %2585 = vadd.xlane.f32.xlu0 %v2584_v52  ;;  %v2697_v36 = vsel %vm6190_vm4, %v6113_v40, %v2693_v21 }
 0x335   : > { %v6145_v60 = vpop.f32.mrf.mxu0  ;;  %4699 = vpow2.f32 %v2512_v22  ;;  %v2827_v50 = vmul.f32 %v4692_v26, %v2826_v54  ;;  %v2452_v54 = vsub.f32 %v5584_v2, %v2418_v10 }
 0x336   : > { %v2797_v38 = vmul.f32 %v4694_v58, %v2796_v51  ;;  %4701 = vrcp.f32 %v6078_v23  ;;  %v2516_v51 = vmul.f32 1.442695, %v2453_v27 }
 0x337   : > { %v2828_v46 = vadd.f32 %v4692_v26, %v2827_v50  ;;  %v2514_v40 = vmul.f32 1.442695, %v2452_v54  ;;  %v4467_v54 = vld [vmem:[%s6612_s4 + $0x8] sm:$0xff] }
 0x338   : > { %v2798_v56 = vadd.f32 %v4694_v58, %v2797_v38  ;;  %v2702_v38 = vsel %vm2699_vm7, %v2701_v30, %v2697_v36  ;;  %3691 = vmatpush.bf16.msrb.mxu2 %v4467_v54  ;;  %4474 = vmatpush.bf16.msra.mxu3 %v4467_v54 }
 0x339   : > { %v4696_v29 = vpop.eup %4695  ;;  %v6170_v7 = vpop.xlane.xlu0 %2564  ;;  %v2832_v32 = vsel %vm6161_vm14, %v4692_v26, %v2828_v46  ;;  %v2820_v26 = vand.u32 2147483648, %v6140_v1  ;;  %v3285_v45 = vmul.f32 %v5955_v37, %v2702_v38  ;;  %v2775_v38 = vand.u32 2147483648, %v6078_v23 }
 0x33a   : > { %v6165_v62 = vpop.eup %4697  ;;  %v2810_v43 = vmul.f32 %v4696_v29, %v6140_v1  ;;  %v3381_v12 = vpop.permute.xlu2 %3380  ;;  %v2802_v0 = vsel %vm2801_vm15, %v4694_v58, %v2798_v56  ;;  %v2837_v24 = vsel %vm2834_vm2, %v2836_v28, %v2832_v32  ;;  %vm2815_vm5 = vweird.f32 %v4696_v29 }
 0x33b   : > { %3475 = vst.msk [vmem:[#allocation3 + $0x8] sm:$0xf] %vm3472_vm9, %v3381_v12  ;;  %v6176_v3 = vpop.eup %4699  ;;  %v2807_v15 = vsel %vm2804_vm1, %v2806_v20, %v2802_v0  ;;  %vm2816_vm8 = vmor %vm2814_vm6, %vm2815_vm5  ;;  %v2821_v4 = vor.u32 1.1754944e-38, %v2820_v26  ;;  %v3317_v56 = vpack.c.bf16 %v3285_v45, %v3285_v45  ;;  %v2596_v20 = vsel %vm953_vm3, %v6120_v33, 0.0  ;;  %v4466_v45 = vld [vmem:[%s6612_s4] sm:$0xff] }
 0x33c   : > { %v2811_v5 = vsub.f32 1.0, %v2810_v43  ;;  %v6181_v61 = vmul.f32 %v6125_v59, %v2807_v15  ;;  %v3108_v58 = vpack.c.bf16 %v6176_v3, %v6165_v62  ;;  %v2818_v59 = vand.u32 2147483647, %v6140_v1  ;;  %v6203_v8 = vpop.eup %4701  ;;  %3692 = vmatpush.bf16.msrb.mxu2 %v4466_v45  ;;  %4475 = vmatpush.bf16.msra.mxu3 %v4466_v45 }
 0x33d   : > { %v3235_v22 = vpop.f32.mrf.mxu0  ;;  %v2765_v44 = vmul.f32 %v6203_v8, %v6078_v23  ;;  %vm2770_vm2 = vweird.f32 %v6203_v8  ;;  %vm2769_vm6 = vweird.f32 %v6078_v23 }
 0x33e   : > { %v2812_v17 = vmul.f32 %v4696_v29, %v2811_v5  ;;  %v6195_v41 = vmul.f32 %v3235_v22, %v2837_v24  ;;  %vm2819_vm11 = vcmp.eq.f32.partialorder %v2818_v59, 8.507059e+37 }
 0x33f   : > { %4288 = vmatmul.msk.bf16.gmra.mxu0 %vm953_vm3, %v3108_v58  ;;  %v2766_v48 = vsub.f32 1.0, %v2765_v44 }
 0x340   : > { %v2813_v52 = vadd.f32 %v4696_v29, %v2812_v17 }
 0x341   : > { %v2568_v50 = vpop.xlane.xlu1 %2567  ;;  %v6205_v16 = vpop.xlane.xlu0 %2570  ;;  %v2767_v15 = vmul.f32 %v6203_v8, %v2766_v48  ;;  %v2776_v48 = vor.u32 1.1754944e-38, %v2775_v38 }
 0x342   : > { %v2817_v63 = vsel %vm2816_vm8, %v4696_v29, %v2813_v52  ;;  %4703 = vrcp.f32 %v2568_v50  ;;  %v3383_v2 = vpop.permute.xlu2 %3382  ;;  %v2865_v0 = vand.u32 2147483648, %v2568_v50  ;;  %v2863_v5 = vand.u32 2147483647, %v2568_v50  ;;  %vm2771_vm8 = vmor %vm2769_vm6, %vm2770_vm2 }
 0x343   : > { %v2822_v46 = vsel %vm2819_vm11, %v2821_v4, %v2817_v63  ;;  %4705 = vrcp.f32 %v6205_v16  ;;  %3476 = vst.msk [vmem:[#allocation3 + $0xc] sm:$0xf] %vm3472_vm9, %v3383_v2  ;;  %vm2859_vm14 = vweird.f32 %v2568_v50  ;;  %v2880_v13 = vand.u32 2147483648, %v6205_v16 }
 0x344   : > { %4707 = vpow2.f32 %v2516_v51  ;;  %v6210_v1 = vmul.f32 %v6145_v60, %v2822_v46  ;;  %v2866_v17 = vor.u32 1.1754944e-38, %v2865_v0  ;;  %vm2874_vm1 = vweird.f32 %v6205_v16 }
 0x345   : > { %4709 = vrcp.f32 %v6170_v7  ;;  %v6216_v29 = vpop.f32.mrf.mxu0  ;;  %v2878_v36 = vand.u32 2147483647, %v6205_v16  ;;  %vm2864_vm4 = vcmp.eq.f32.partialorder %v2863_v5, 8.507059e+37  ;;  %v2768_v51 = vadd.f32 %v6203_v8, %v2767_v15 }
 0x346   : > { %4711 = vpow2.f32 %v2514_v40  ;;  %v2773_v2 = vand.u32 2147483647, %v6078_v23  ;;  %v2848_v0 = vand.u32 2147483647, %v6170_v7  ;;  %vm2754_vm2 = vweird.f32 %v6022_v42 }
 0x347   : > { %4713 = vrcp.f32 %v6022_v42  ;;  %vm2879_vm7 = vcmp.eq.f32.partialorder %v2878_v36, 8.507059e+37  ;;  %v2772_v44 = vsel %vm2771_vm8, %v6203_v8, %v2768_v51  ;;  %v2850_v8 = vand.u32 2147483648, %v6170_v7 }
 0x348   : > { %v4704_v57 = vpop.eup %4703  ;;  %3386 = vrot.lane.b32.xlu0 %v3317_v56, %s4784_s17  ;;  %vm2774_vm11 = vcmp.eq.f32.partialorder %v2773_v2, 8.507059e+37  ;;  %v2590_v51 = vsel %vm953_vm3, %v6087_v34, 0.0 }
 0x349   : > { %v4706_v10 = vpop.eup %4705  ;;  %v2855_v21 = vmul.f32 %v4704_v57, %v2568_v50  ;;  %vm2860_vm12 = vweird.f32 %v4704_v57  ;;  %v2777_v23 = vsel %vm2774_vm11, %v2776_v48, %v2772_v44  ;;  %v2851_v5 = vor.u32 1.1754944e-38, %v2850_v8 }
 0x34a   : > { %v6220_v60 = vpop.eup %4707  ;;  %v2870_v37 = vmul.f32 %v4706_v10, %v6205_v16  ;;  %2597 = vadd.xlane.f32.xlu2 %v2596_v20  ;;  %vm2875_vm13 = vweird.f32 %v4706_v10  ;;  %vm2861_vm15 = vmor %vm2859_vm14, %vm2860_vm12  ;;  %v2881_v16 = vor.u32 1.1754944e-38, %v2880_v13  ;;  %v4451_v38 = vld [vmem:[#allocation3 + $0x8] sm:$0xff]  ;;  %v2599_v8 = vsel %vm953_vm3, %v6127_v6, 0.0 }
 0x34b   : > { %v6223_v43 = vpop.eup %4709  ;;  %v2856_v12 = vsub.f32 1.0, %v2855_v21  ;;  %vm2876_vm5 = vmor %vm2874_vm1, %vm2875_vm13  ;;  %vm2844_vm13 = vweird.f32 %v6170_v7 }
 0x34c   : > { %v2871_v32 = vsub.f32 1.0, %v2870_v37  ;;  %v6226_v28 = vpop.eup %4711  ;;  %v2840_v26 = vmul.f32 %v6223_v43, %v6170_v7  ;;  %vm2845_vm12 = vweird.f32 %v6223_v43 }
 0x34d   : > { %v2857_v27 = vmul.f32 %v4704_v57, %v2856_v12  ;;  %v3240_v33 = vpop.f32.mrf.mxu0  ;;  %v3109_v24 = vpack.c.bf16 %v6220_v60, %v6226_v28  ;;  %v4714_v56 = vpop.eup %4713  ;;  %v2593_v12 = vsel %vm953_vm3, %v6080_v53, 0.0  ;;  %vm2846_vm14 = vmor %vm2844_vm13, %vm2845_vm12 }
 0x34e   : > { %v2872_v22 = vmul.f32 %v4706_v10, %v2871_v32  ;;  %v2841_v52 = vsub.f32 1.0, %v2840_v26  ;;  %v2750_v37 = vmul.f32 %v4714_v56, %v6022_v42  ;;  %v3290_v32 = vmul.f32 %v6085_v25, %v2777_v23 }
 0x34f   : > { %v2858_v58 = vadd.f32 %v4704_v57, %v2857_v27  ;;  %4289 = vmatmul.msk.bf16.gmra.mxu0 %vm953_vm3, %v3109_v24  ;;  %vm2755_vm1 = vweird.f32 %v4714_v56 }
 0x350   : > { %v2873_v59 = vadd.f32 %v4706_v10, %v2872_v22  ;;  %v2751_v27 = vsub.f32 1.0, %v2750_v37 }
 0x351   : > { %v2862_v30 = vsel %vm2861_vm15, %v4704_v57, %v2858_v58  ;;  %v2842_v57 = vmul.f32 %v6223_v43, %v2841_v52  ;;  %vm2849_vm15 = vcmp.eq.f32.partialorder %v2848_v0, 8.507059e+37  ;;  %v2760_v58 = vand.u32 2147483648, %v6022_v42 }
 0x352   : > { %v2867_v4 = vsel %vm2864_vm4, %v2866_v17, %v2862_v30  ;;  %v2877_v50 = vsel %vm2876_vm5, %v4706_v10, %v2873_v59  ;;  %v2752_v53 = vmul.f32 %v4714_v56, %v2751_v27  ;;  %vm2756_vm4 = vmor %vm2754_vm2, %vm2755_vm1 }
 0x353   : > { %v6245_v63 = vmul.f32 %v3240_v33, %v2867_v4  ;;  %v2882_v40 = vsel %vm2879_vm7, %v2881_v16, %v2877_v50  ;;  %v2843_v20 = vadd.f32 %v6223_v43, %v2842_v57  ;;  %v3322_v33 = vpack.c.bf16 %v3290_v32, %v3290_v32 }
 0x354   : > { %v2753_v22 = vadd.f32 %v4714_v56, %v2752_v53  ;;  %v2761_v59 = vor.u32 1.1754944e-38, %v2760_v58 }
 0x355   : > { %v3242_v46 = vpop.f32.mrf.mxu0  ;;  %v2847_v15 = vsel %vm2846_vm14, %v6223_v43, %v2843_v20  ;;  %v2758_v43 = vand.u32 2147483647, %v6022_v42 }
 0x356   : > { %v6256_v10 = vmul.f32 %v3242_v46, %v2882_v40  ;;  %v2852_v26 = vsel %vm2849_vm15, %v2851_v5, %v2847_v15  ;;  %v2757_v17 = vsel %vm2756_vm4, %v4714_v56, %v2753_v22  ;;  %v1218_v40 = vsel %vm953_vm3, %v5602_v47, 0.0 }
 0x357   : > { %v3295_v25 = vmul.f32 %v6216_v29, %v2852_v26  ;;  %vm2759_vm5 = vcmp.eq.f32.partialorder %v2758_v43, 8.507059e+37 }
 0x358   : > { %v2762_v36 = vsel %vm2759_vm5, %v2761_v59, %v2757_v17 }
 0x359   : > { %v3377_v21 = vpop.permute.xlu1 %3376  ;;  %v2574_v7 = vpop.xlane.xlu0 %2573  ;;  %v3327_v13 = vpack.c.bf16 %v3295_v25, %v3295_v25  ;;  %v3289_v54 = vmul.f32 %v6069_v31, %v2762_v36  ;;  %v3320_v31 = vpack.c.bf16 %v6083_v9, %v6083_v9 }
 0x35a   : > { %3473 = vst.msk [vmem:[#allocation3] sm:$0xf] %vm3472_vm9, %v3377_v21  ;;  %4715 = vrcp.f32 %v2574_v7  ;;  %v2895_v21 = vand.u32 2147483648, %v2574_v7  ;;  %vm2889_vm7 = vweird.f32 %v2574_v7  ;;  %v2893_v37 = vand.u32 2147483647, %v2574_v7 }
 0x35b   : > { %v3321_v30 = vpack.c.bf16 %v3289_v54, %v3289_v54 }
 0x35c   : > { %2594 = vadd.xlane.f32.xlu1 %v2593_v12  ;;  %v2896_v0 = vor.u32 1.1754944e-38, %v2895_v21  ;;  %vm2894_vm11 = vcmp.eq.f32.partialorder %v2893_v37, 8.507059e+37  ;;  %v2602_v37 = vsel %vm953_vm3, %v6165_v62, 0.0 }
 0x360   : > { %v4716_v34 = vpop.eup %4715 }
 0x361   : > { %v3385_v24 = vpop.permute.xlu1 %3384  ;;  %v2885_v2 = vmul.f32 %v4716_v34, %v2574_v7  ;;  %vm2890_vm6 = vweird.f32 %v4716_v34 }
 0x362   : > { %3477 = vst.msk [vmem:[#allocation3 + $0x10] sm:$0xf] %vm3472_vm9, %v3385_v24  ;;  %3396 = vrot.lane.b32.xlu2 %v3322_v33, %s4784_s17  ;;  %vm2891_vm8 = vmor %vm2889_vm7, %vm2890_vm6 }
 0x363   : > { %v2886_v46 = vsub.f32 1.0, %v2885_v2 }
 0x365   : > { %v3245_v4 = vpop.f32.mrf.mxu0  ;;  %v2887_v9 = vmul.f32 %v4716_v34, %v2886_v46 }
 0x367   : > { %v2888_v48 = vadd.f32 %v4716_v34, %v2887_v9 }
 0x369   : > { %v2892_v12 = vsel %vm2891_vm8, %v4716_v34, %v2888_v48 }
 0x36a   : > { %3406 = vrot.lane.b32.xlu2 %v3327_v13, %s4784_s17  ;;  %v2897_v27 = vsel %vm2894_vm11, %v2896_v0, %v2892_v12  ;;  %v3323_v0 = vpack.c.bf16 %v6106_v49, %v6106_v49 }
 0x36b   : > { %v3298_v22 = vmul.f32 %v3245_v4, %v2897_v27 }
 0x36c   : > { %v3379_v29 = vpop.permute.xlu0 %3378 }
 0x36d   : > { %3474 = vst.msk [vmem:[#allocation3 + $0x4] sm:$0xf] %vm3472_vm9, %v3379_v29  ;;  %v6289_v16 = vpop.f32.mrf.mxu0  ;;  %v3330_v29 = vpack.c.bf16 %v3298_v22, %v3298_v22 }
 0x372   : > { %2591 = vadd.xlane.f32.xlu0 %v2590_v51 }
 0x374   : > { %v4450_v42 = vld [vmem:[#allocation3] sm:$0xff] }
 0x375   : > { %3394 = vrot.lane.b32.xlu1 %v3321_v30, %s4784_s17  ;;  %4362 = vmatmul.msk.bf16.vlgmr.msrb.gmra.mxu2 %vm460_vm0, %v4450_v42 }
 0x37c   : > { %v6282_v52 = vpop.xlane.xlu2 %2582  ;;  %v6294_v44 = vpop.f32.mrf.mxu0 }
 0x37d   : > { %4717 = vrcp.f32 %v6282_v52  ;;  %v2940_v24 = vand.u32 2147483648, %v6282_v52  ;;  %vm2934_vm13 = vweird.f32 %v6282_v52  ;;  %v2938_v6 = vand.u32 2147483647, %v6282_v52 }
 0x37f   : > { %v2941_v17 = vor.u32 1.1754944e-38, %v2940_v24  ;;  %vm2939_vm2 = vcmp.eq.f32.partialorder %v2938_v6, 8.507059e+37 }
 0x383   : > { %v4718_v45 = vpop.eup %4717 }
 0x384   : > { %v3389_v50 = vpop.permute.xlu2 %3388  ;;  %v2930_v57 = vmul.f32 %v4718_v45, %v6282_v52  ;;  %v3252_v47 = vpop.f32.mrf.mxu0  ;;  %vm2935_vm12 = vweird.f32 %v4718_v45 }
 0x385   : > { %3479 = vst.msk [vmem:[#allocation3 + $0x18] sm:$0xf] %vm3472_vm9, %v3389_v50  ;;  %4363 = vmatmul.msk.bf16.gmra.mxu2 %vm460_vm0, %v4451_v38  ;;  %vm2936_vm14 = vmor %vm2934_vm13, %vm2935_vm12 }
 0x386   : > { %3392 = vrot.lane.b32.xlu0 %v3320_v31, %s4784_s17  ;;  %v2931_v23 = vsub.f32 1.0, %v2930_v57 }
 0x388   : > { %v2932_v32 = vmul.f32 %v4718_v45, %v2931_v23 }
 0x38a   : > { %v2933_v26 = vadd.f32 %v4718_v45, %v2932_v32 }
 0x38c   : > { %v6297_v20 = vpop.xlane.xlu1 %2588  ;;  %v2937_v13 = vsel %vm2936_vm14, %v4718_v45, %v2933_v26  ;;  %v3255_v59 = vpop.f32.mrf.mxu0 }
 0x38d   : > { %v2942_v30 = vsel %vm2939_vm2, %v2941_v17, %v2937_v13 }
 0x38e   : > { %v3301_v38 = vmul.f32 %v3252_v47, %v2942_v30 }
 0x393   : > { %1219 = vadd.xlane.f32.xlu2 %v1218_v40  ;;  %v6309_v40 = vpop.f32.mrf.mxu2 }
 0x394   : > { %v6311_v23 = vpop.f32.mrf.mxu0 }
 0x397   : > { %v2577_v56 = vpop.xlane.xlu0 %2576 }
 0x398   : > { %4719 = vrcp.f32 %v2577_v56  ;;  %v2910_v58 = vand.u32 2147483648, %v2577_v56  ;;  %v2908_v43 = vand.u32 2147483647, %v2577_v56  ;;  %vm2904_vm1 = vweird.f32 %v2577_v56 }
 0x39a   : > { %v2911_v51 = vor.u32 1.1754944e-38, %v2910_v58  ;;  %vm2909_vm5 = vcmp.eq.f32.partialorder %v2908_v43, 8.507059e+37 }
 0x39e   : > { %v4720_v15 = vpop.eup %4719 }
 0x39f   : > { %2600 = vadd.xlane.f32.xlu1 %v2599_v8  ;;  %v2900_v5 = vmul.f32 %v4720_v15, %v2577_v56  ;;  %v2580_v33 = vpop.xlane.xlu0 %2579  ;;  %vm2905_vm15 = vweird.f32 %v4720_v15  ;;  %v3333_v56 = vpack.c.bf16 %v3301_v38, %v3301_v38 }
 0x3a0   : > { %4721 = vrcp.f32 %v2580_v33  ;;  %vm2906_vm4 = vmor %vm2904_vm1, %vm2905_vm15  ;;  %v2925_v34 = vand.u32 2147483648, %v2580_v33  ;;  %v2923_v45 = vand.u32 2147483647, %v2580_v33  ;;  %vm2919_vm7 = vweird.f32 %v2580_v33 }
 0x3a1   : > { %v2901_v53 = vsub.f32 1.0, %v2900_v5  ;;  %v6321_v5 = vpop.f32.mrf.mxu2 }
 0x3a2   : > { %v2926_v48 = vor.u32 1.1754944e-38, %v2925_v34  ;;  %vm2924_vm11 = vcmp.eq.f32.partialorder %v2923_v45, 8.507059e+37  ;;  %v3328_v34 = vpack.c.bf16 %v6245_v63, %v6245_v63 }
 0x3a3   : > { %v2902_v7 = vmul.f32 %v4720_v15, %v2901_v53 }
 0x3a4   : > { %v3391_v25 = vpop.permute.xlu1 %3390 }
 0x3a5   : > { %3480 = vst.msk [vmem:[#allocation3 + $0x1c] sm:$0xf] %vm3472_vm9, %v3391_v25  ;;  %v2903_v36 = vadd.f32 %v4720_v15, %v2902_v7  ;;  %v3324_v7 = vpack.c.bf16 %v6181_v61, %v6181_v61  ;;  %v3325_v61 = vpack.c.bf16 %v6210_v1, %v6210_v1  ;;  %v3329_v1 = vpack.c.bf16 %v6256_v10, %v6256_v10 }
 0x3a6   : > { %v4722_v54 = vpop.eup %4721 }
 0x3a7   : > { %v2915_v42 = vmul.f32 %v4722_v54, %v2580_v33  ;;  %v2586_v52 = vpop.xlane.xlu0 %2585  ;;  %v2907_v4 = vsel %vm2906_vm4, %v4720_v15, %v2903_v36  ;;  %vm2920_vm6 = vweird.f32 %v4722_v54 }
 0x3a8   : > { %4723 = vrcp.f32 %v2586_v52  ;;  %v2912_v31 = vsel %vm2909_vm5, %v2911_v51, %v2907_v4  ;;  %vm2921_vm8 = vmor %vm2919_vm7, %vm2920_vm6  ;;  %v2955_v32 = vand.u32 2147483648, %v2586_v52  ;;  %v2953_v27 = vand.u32 2147483647, %v2586_v52 }
 0x3a9   : > { %v2916_v50 = vsub.f32 1.0, %v2915_v42  ;;  %v6307_v2 = vmul.f32 %v6289_v16, %v2912_v31  ;;  %vm2949_vm13 = vweird.f32 %v2586_v52  ;;  %v6329_v22 = vpop.f32.mrf.mxu2 }
 0x3aa   : > { %v2956_v62 = vor.u32 1.1754944e-38, %v2955_v32  ;;  %vm2954_vm15 = vcmp.eq.f32.partialorder %v2953_v27, 8.507059e+37 }
 0x3ab   : > { %3412 = vrot.lane.b32.xlu2 %v3330_v29, %s4784_s17  ;;  %v2917_v46 = vmul.f32 %v4722_v54, %v2916_v50 }
 0x3ad   : > { %v2918_v9 = vadd.f32 %v4722_v54, %v2917_v46  ;;  %v4453_v46 = vld [vmem:[#allocation3 + $0x18] sm:$0xff] }
 0x3ae   : > { %v4724_v57 = vpop.eup %4723 }
 0x3af   : > { %v2945_v21 = vmul.f32 %v4724_v57, %v2586_v52  ;;  %v2922_v16 = vsel %vm2921_vm8, %v4722_v54, %v2918_v9  ;;  %vm2950_vm12 = vweird.f32 %v4724_v57 }
 0x3b0   : > { %2603 = vadd.xlane.f32.xlu0 %v2602_v37  ;;  %v2927_v47 = vsel %vm2924_vm11, %v2926_v48, %v2922_v16  ;;  %vm2951_vm14 = vmor %vm2949_vm13, %vm2950_vm12  ;;  %v2608_v37 = vsel %vm953_vm3, %v6226_v28, 0.0 }
 0x3b1   : > { %v2946_v8 = vsub.f32 1.0, %v2945_v21  ;;  %v6317_v12 = vmul.f32 %v6294_v44, %v2927_v47  ;;  %v6324_v44 = vpop.f32.mrf.mxu0  ;;  %v6338_v30 = vpop.f32.mrf.mxu2 }
 0x3b3   : > { %3418 = vrot.lane.b32.xlu2 %v3333_v56, %s4784_s17  ;;  %v2947_v15 = vmul.f32 %v4724_v57, %v2946_v8  ;;  %v2605_v56 = vsel %vm953_vm3, %v6176_v3, 0.0  ;;  %v2611_v3 = vsel %vm953_vm3, %v6220_v60, 0.0 }
 0x3b5   : > { %v2948_v33 = vadd.f32 %v4724_v57, %v2947_v15 }
 0x3b7   : > { %v2952_v26 = vsel %vm2951_vm14, %v4724_v57, %v2948_v33 }
 0x3b8   : > { %3398 = vrot.lane.b32.xlu1 %v3323_v0, %s4784_s17  ;;  %v2957_v24 = vsel %vm2954_vm15, %v2956_v62, %v2952_v26 }
 0x3b9   : > { %v6326_v53 = vmul.f32 %v3255_v59, %v2957_v24  ;;  %v6333_v13 = vpop.f32.mrf.mxu0  ;;  %v6348_v45 = vpop.f32.mrf.mxu2 }
 0x3ba   : > { %v3387_v25 = vpop.permute.xlu0 %3386 }
 0x3bb   : > { %3478 = vst.msk [vmem:[#allocation3 + $0x14] sm:$0xf] %vm3472_vm9, %v3387_v25 }
 0x3bd   : > { %v2598_v49 = vpop.xlane.xlu2 %2597 }
 0x3be   : > { %4725 = vrcp.f32 %v2598_v49  ;;  %v3015_v36 = vand.u32 2147483648, %v2598_v49  ;;  %v3013_v29 = vand.u32 2147483647, %v2598_v49  ;;  %vm3009_vm2 = vweird.f32 %v2598_v49 }
 0x3c0   : > { %v3016_v42 = vor.u32 1.1754944e-38, %v3015_v36  ;;  %vm3014_vm5 = vcmp.eq.f32.partialorder %v3013_v29, 8.507059e+37 }
 0x3c1   : > { %v3265_v31 = vpop.f32.mrf.mxu0  ;;  %v6355_v57 = vpop.f32.mrf.mxu2 }
 0x3c2   : > { %v4452_v58 = vld [vmem:[#allocation3 + $0x10] sm:$0xff] }
 0x3c3   : > { %4364 = vmatmul.msk.bf16.gmra.mxu2 %vm460_vm0, %v4452_v58 }
 0x3c4   : > { %v4726_v6 = vpop.eup %4725  ;;  %3400 = vrot.lane.b32.xlu0 %v3324_v7, %s4784_s17  ;;  %v6372_v7 = vld [vmem:[%s6613_s5] ss:$0 sm:$0xff] }
 0x3c5   : > { %v3005_v43 = vmul.f32 %v4726_v6, %v2598_v49  ;;  %v3397_v17 = vpop.permute.xlu2 %3396  ;;  %vm3010_vm1 = vweird.f32 %v4726_v6 }
 0x3c6   : > { %3483 = vst.msk [vmem:[#allocation3 + $0x28] sm:$0xf] %vm3472_vm9, %v3397_v17  ;;  %vm3011_vm4 = vmor %vm3009_vm2, %vm3010_vm1 }
 0x3c7   : > { %v3006_v59 = vsub.f32 1.0, %v3005_v43 }
 0x3c9   : > { %v3007_v54 = vmul.f32 %v4726_v6, %v3006_v59  ;;  %v6362_v10 = vpop.f32.mrf.mxu2 }
 0x3cb   : > { %v3008_v51 = vadd.f32 %v4726_v6, %v3007_v54 }
 0x3cc   : > { %3402 = vrot.lane.b32.xlu0 %v3325_v61, %s4784_s17 }
 0x3cd   : > { %v3407_v52 = vpop.permute.xlu2 %3406  ;;  %v3012_v4 = vsel %vm3011_vm4, %v4726_v6, %v3008_v51 }
 0x3ce   : > { %3488 = vst.msk [vmem:[#allocation3 + $0x3c] sm:$0xf] %vm3472_vm9, %v3407_v52  ;;  %v3017_v50 = vsel %vm3014_vm5, %v3016_v42, %v3012_v4 }
 0x3cf   : > { %v6344_v38 = vmul.f32 %v3265_v31, %v3017_v50  ;;  %v2595_v9 = vpop.xlane.xlu1 %2594 }
 0x3d0   : > { %4727 = vrcp.f32 %v2595_v9  ;;  %v3000_v25 = vand.u32 2147483648, %v2595_v9  ;;  %vm2994_vm12 = vweird.f32 %v2595_v9  ;;  %v2998_v6 = vand.u32 2147483647, %v2595_v9 }
 0x3d1   : > { %v6366_v33 = vpop.f32.mrf.mxu2 }
 0x3d2   : > { %v3001_v59 = vor.u32 1.1754944e-38, %v3000_v25  ;;  %vm2999_vm15 = vcmp.eq.f32.partialorder %v2998_v6, 8.507059e+37 }
 0x3d3   : > { %4365 = vmatmul.msk.bf16.gmra.mxu2 %vm460_vm0, %v4453_v46  ;;  %v1224_v46 = vsel %vm953_vm3, %v5631_v55, 0.0 }
 0x3d4   : > { %3408 = vrot.lane.b32.xlu0 %v3328_v34, %s4784_s17 }
 0x3d6   : > { %v4728_v63 = vpop.eup %4727 }
 0x3d7   : > { %v2990_v16 = vmul.f32 %v4728_v63, %v2595_v9  ;;  %vm2995_vm7 = vweird.f32 %v4728_v63 }
 0x3d8   : > { %vm2996_vm14 = vmor %vm2994_vm12, %vm2995_vm7  ;;  %vm2964_vm7 = vweird.f32 %v6297_v20 }
 0x3d9   : > { %v2991_v47 = vsub.f32 1.0, %v2990_v16 }
 0x3db   : > { %v2992_v0 = vmul.f32 %v4728_v63, %v2991_v47 }
 0x3dc   : > { %3410 = vrot.lane.b32.xlu0 %v3329_v1, %s4784_s17 }
 0x3dd   : > { %v2993_v26 = vadd.f32 %v4728_v63, %v2992_v0 }
 0x3df   : > { %v2997_v17 = vsel %vm2996_vm14, %v4728_v63, %v2993_v26 }
 0x3e0   : > { %v3002_v61 = vsel %vm2999_vm15, %v3001_v59, %v2997_v17 }
 0x3e2   : > { %2606 = vadd.xlane.f32.xlu1 %v2605_v56 }
 0x3e5   : > { %v2592_v21 = vpop.xlane.xlu0 %2591 }
 0x3e6   : > { %4729 = vrcp.f32 %v2592_v21  ;;  %v2985_v27 = vand.u32 2147483648, %v2592_v21  ;;  %v2983_v28 = vand.u32 2147483647, %v2592_v21  ;;  %vm2979_vm8 = vweird.f32 %v2592_v21 }
 0x3e7   : > { %v3395_v48 = vpop.permute.xlu1 %3394  ;;  %4731 = vrcp.f32 %v6297_v20 }
 0x3e8   : > { %3482 = vst.msk [vmem:[#allocation3 + $0x24] sm:$0xf] %vm3472_vm9, %v3395_v48  ;;  %v2986_v49 = vor.u32 1.1754944e-38, %v2985_v27  ;;  %vm2984_vm13 = vcmp.eq.f32.partialorder %v2983_v28, 8.507059e+37 }
 0x3ea   : > { %2609 = vadd.xlane.f32.xlu1 %v2608_v37 }
 0x3ec   : > { %v4730_v8 = vpop.eup %4729 }
 0x3ed   : > { %v2975_v32 = vmul.f32 %v4730_v8, %v2592_v21  ;;  %vm2980_vm6 = vweird.f32 %v4730_v8  ;;  %v4732_v31 = vpop.eup %4731 }
 0x3ee   : > { %vm2981_vm11 = vmor %vm2979_vm8, %vm2980_vm6  ;;  %v2960_v1 = vmul.f32 %v4732_v31, %v6297_v20  ;;  %vm2965_vm4 = vweird.f32 %v4732_v31 }
 0x3ef   : > { %v2976_v15 = vsub.f32 1.0, %v2975_v32  ;;  %vm2966_vm8 = vmor %vm2964_vm7, %vm2965_vm4 }
 0x3f0   : > { %v2961_v63 = vsub.f32 1.0, %v2960_v1 }
 0x3f1   : > { %v2977_v62 = vmul.f32 %v4730_v8, %v2976_v15 }
 0x3f2   : > { %2612 = vadd.xlane.f32.xlu1 %v2611_v3  ;;  %v2962_v55 = vmul.f32 %v4732_v31, %v2961_v63 }
 0x3f3   : > { %v2978_v24 = vadd.f32 %v4730_v8, %v2977_v62  ;;  %v2970_v62 = vand.u32 2147483648, %v6297_v20 }
 0x3f4   : > { %v2963_v0 = vadd.f32 %v4732_v31, %v2962_v55  ;;  %v3331_v55 = vpack.c.bf16 %v6307_v2, %v6307_v2  ;;  %v3334_v2 = vpack.c.bf16 %v6326_v53, %v6326_v53 }
 0x3f5   : > { %v2982_v60 = vsel %vm2981_vm11, %v4730_v8, %v2978_v24  ;;  %v2968_v24 = vand.u32 2147483647, %v6297_v20 }
 0x3f6   : > { %v2987_v58 = vsel %vm2984_vm13, %v2986_v49, %v2982_v60  ;;  %v2967_v6 = vsel %vm2966_vm8, %v4732_v31, %v2963_v0  ;;  %v2971_v60 = vor.u32 1.1754944e-38, %v2970_v62 }
 0x3f7   : > { %v3304_v43 = vmul.f32 %v6324_v44, %v2987_v58  ;;  %v3305_v44 = vmul.f32 %v6333_v13, %v3002_v61  ;;  %v3326_v13 = vpack.c.bf16 %v6195_v41, %v6195_v41  ;;  %vm2969_vm11 = vcmp.eq.f32.partialorder %v2968_v24, 8.507059e+37 }
 0x3f8   : > { %v3393_v36 = vpop.permute.xlu0 %3392  ;;  %v3694_v54 = vpop.f32.mrf.mxu2  ;;  %v2972_v17 = vsel %vm2969_vm11, %v2971_v60, %v2967_v6 }
 0x3f9   : > { %3481 = vst.msk [vmem:[#allocation3 + $0x20] sm:$0xf] %vm3472_vm9, %v3393_v36  ;;  %v3336_v29 = vpack.c.bf16 %v3304_v43, %v3304_v43  ;;  %v3695_v51 = vadd.f32 %v6372_v7, %v3694_v54  ;;  %v3337_v4 = vpack.c.bf16 %v3305_v44, %v3305_v44  ;;  %v3332_v43 = vpack.c.bf16 %v6317_v12, %v6317_v12 }
 0x3fa   : > { %v3303_v20 = vmul.f32 %v6311_v23, %v2972_v17  ;;  %v1230_v12 = vsel %vm953_vm3, %v5694_v11, 0.0  ;;  %v1221_v23 = vsel %vm953_vm3, %v5610_v19, 0.0 }
 0x3fb   : > { %3424 = vrot.lane.b32.xlu2 %v3336_v29, %s4784_s17  ;;  %3774 = vst.msk [vmem:[%s6379_s7] sm:$0xff] %vm460_vm0, %v3695_v51 }
 0x3fc   : > { %v3335_v36 = vpack.c.bf16 %v3303_v20, %v3303_v20 }
 0x400   : > { %v4454_v42 = vld [vmem:[#allocation3 + $0x20] sm:$0xff]  ;;  %v3696_v52 = vpop.f32.mrf.mxu2 }
 0x401   : > { %v3697_v50 = vadd.f32 %v6372_v7, %v3696_v52  ;;  %4366 = vmatmul.msk.bf16.gmra.mxu2 %vm460_vm0, %v4454_v42  ;;  %v6424_v52 = vpop.f32.mrf.mxu0 }
 0x403   : > { %3426 = vrot.lane.b32.xlu2 %v3337_v4, %s4784_s17  ;;  %3775 = vst.msk [vmem:[%s6379_s7 + $0x8] sm:$0xff] %vm460_vm0, %v3697_v50 }
 0x406   : > { %v1220_v34 = vpop.xlane.xlu2 %1219  ;;  %1225 = vadd.xlane.f32.xlu0 %v1224_v46 }
 0x407   : > { %4733 = vrcp.f32 %v1220_v34  ;;  %v1613_v47 = vand.u32 2147483648, %v1220_v34  ;;  %v1611_v8 = vand.u32 2147483647, %v1220_v34  ;;  %vm1607_vm2 = vweird.f32 %v1220_v34 }
 0x408   : > { %v3699_v9 = vpop.f32.mrf.mxu2 }
 0x409   : > { %v3700_v48 = vadd.f32 %v6372_v7, %v3699_v9  ;;  %v1614_v15 = vor.u32 1.1754944e-38, %v1613_v47  ;;  %vm1612_vm6 = vcmp.eq.f32.partialorder %v1611_v8, 8.507059e+37  ;;  %v3270_v19 = vpop.f32.mrf.mxu0  ;;  %v1233_v47 = vsel %vm953_vm3, %v5690_v18, 0.0 }
 0x40a   : > { %v1239_v18 = vsel %vm953_vm3, %v5748_v39, 0.0 }
 0x40b   : > { %3404 = vrot.lane.b32.xlu1 %v3326_v13, %s4784_s17  ;;  %3776 = vst.msk [vmem:[%s6379_s7 + $0x10] sm:$0xff] %vm460_vm0, %v3700_v48 }
 0x40d   : > { %v4734_v56 = vpop.eup %4733 }
 0x40e   : > { %v1603_v21 = vmul.f32 %v4734_v56, %v1220_v34  ;;  %v3413_v37 = vpop.permute.xlu2 %3412  ;;  %vm1608_vm1 = vweird.f32 %v4734_v56 }
 0x40f   : > { %3491 = vst.msk [vmem:[#allocation3 + $0x48] sm:$0xf] %vm3472_vm9, %v3413_v37  ;;  %vm1609_vm5 = vmor %vm1607_vm2, %vm1608_vm1 }
 0x410   : > { %v1604_v16 = vsub.f32 1.0, %v1603_v21  ;;  %v3701_v3 = vpop.f32.mrf.mxu2 }
 0x411   : > { %v3702_v27 = vadd.f32 %v6372_v7, %v3701_v3  ;;  %v6460_v20 = vpop.f32.mrf.mxu0 }
 0x412   : > { %v1605_v41 = vmul.f32 %v4734_v56, %v1604_v16  ;;  %v6415_v59 = vpop.xlane.xlu1 %2600 }
 0x413   : > { %3777 = vst.msk [vmem:[%s6379_s7 + $0x18] sm:$0xff] %vm460_vm0, %v3702_v27  ;;  %v3030_v24 = vand.u32 2147483648, %v6415_v59  ;;  %vm3024_vm2 = vweird.f32 %v6415_v59 }
 0x414   : > { %v1606_v32 = vadd.f32 %v4734_v56, %v1605_v41 }
 0x415   : > { %v3031_v6 = vor.u32 1.1754944e-38, %v3030_v24 }
 0x416   : > { %v3419_v28 = vpop.permute.xlu2 %3418  ;;  %v1610_v26 = vsel %vm1609_vm5, %v4734_v56, %v1606_v32 }
 0x417   : > { %v1615_v25 = vsel %vm1612_vm6, %v1614_v15, %v1610_v26  ;;  %3494 = vst.msk [vmem:[#allocation3 + $0x54] sm:$0xf] %vm3472_vm9, %v3419_v28 }
 0x418   : > { %v1931_v49 = vmul.f32 %v6309_v40, %v1615_v25  ;;  %v3028_v25 = vand.u32 2147483647, %v6415_v59 }
 0x41a   : > { %v1963_v58 = vpack.c.bf16 %v1931_v49, %v1931_v49  ;;  %3416 = vrot.lane.b32.xlu0 %v3332_v43, %s4784_s17  ;;  %vm3029_vm5 = vcmp.eq.f32.partialorder %v3028_v25, 8.507059e+37 }
 0x41c   : > { %1996 = vst.msk [vmem:[#allocation3 + $0x60] sm:$0xf] %vm1971_vm10, %v1963_v58 }
 0x422   : > { %3422 = vrot.lane.b32.xlu0 %v3335_v36, %s4784_s17 }
 0x423   : > { %v2604_v40 = vpop.xlane.xlu0 %2603 }
 0x424   : > { %4735 = vrcp.f32 %v2604_v40  ;;  %v3045_v50 = vand.u32 2147483648, %v2604_v40  ;;  %vm3039_vm13 = vweird.f32 %v2604_v40  ;;  %v3043_v31 = vand.u32 2147483647, %v2604_v40 }
 0x425   : > { %4737 = vrcp.f32 %v6415_v59 }
 0x426   : > { %v3046_v46 = vor.u32 1.1754944e-38, %v3045_v50  ;;  %vm3044_vm15 = vcmp.eq.f32.partialorder %v3043_v31, 8.507059e+37 }
 0x42a   : > { %v3399_v54 = vpop.permute.xlu1 %3398  ;;  %v4736_v29 = vpop.eup %4735 }
 0x42b   : > { %3484 = vst.msk [vmem:[#allocation3 + $0x2c] sm:$0xf] %vm3472_vm9, %v3399_v54  ;;  %v3035_v51 = vmul.f32 %v4736_v29, %v2604_v40  ;;  %vm3040_vm12 = vweird.f32 %v4736_v29  ;;  %v4738_v16 = vpop.eup %4737 }
 0x42c   : > { %1231 = vadd.xlane.f32.xlu2 %v1230_v12  ;;  %vm3041_vm14 = vmor %vm3039_vm13, %vm3040_vm12  ;;  %v3020_v41 = vmul.f32 %v4738_v16, %v6415_v59  ;;  %vm3025_vm1 = vweird.f32 %v4738_v16 }
 0x42d   : > { %v3036_v61 = vsub.f32 1.0, %v3035_v51  ;;  %vm3026_vm4 = vmor %vm3024_vm2, %vm3025_vm1 }
 0x42e   : > { %v3021_v3 = vsub.f32 1.0, %v3020_v41 }
 0x42f   : > { %v3037_v42 = vmul.f32 %v4736_v29, %v3036_v61 }
 0x430   : > { %v3022_v27 = vmul.f32 %v4738_v16, %v3021_v3 }
 0x431   : > { %v3038_v4 = vadd.f32 %v4736_v29, %v3037_v42 }
 0x432   : > { %v4455_v44 = vld [vmem:[#allocation3 + $0x28] sm:$0xff]  ;;  %v3023_v26 = vadd.f32 %v4738_v16, %v3022_v27 }
 0x433   : > { %4367 = vmatmul.msk.bf16.gmra.mxu2 %vm460_vm0, %v4455_v44  ;;  %v3042_v11 = vsel %vm3041_vm14, %v4736_v29, %v3038_v4 }
 0x434   : > { %v3047_v13 = vsel %vm3044_vm15, %v3046_v46, %v3042_v11  ;;  %v3027_v49 = vsel %vm3026_vm4, %v4738_v16, %v3023_v26  ;;  %v1227_v46 = vsel %vm953_vm3, %v5633_v14, 0.0 }
 0x435   : > { %1222 = vadd.xlane.f32.xlu1 %v1221_v23  ;;  %v3308_v9 = vmul.f32 %v3270_v19, %v3047_v13  ;;  %v3032_v58 = vsel %vm3029_vm5, %v3031_v6, %v3027_v49  ;;  %v3275_v23 = vpop.f32.mrf.mxu0 }
 0x436   : > { %v3401_v34 = vpop.permute.xlu0 %3400  ;;  %v3307_v59 = vmul.f32 %v6424_v52, %v3032_v58 }
 0x437   : > { %3485 = vst.msk [vmem:[#allocation3 + $0x30] sm:$0xf] %vm3472_vm9, %v3401_v34  ;;  %v3340_v56 = vpack.c.bf16 %v3308_v9, %v3308_v9 }
 0x438   : > { %v3339_v12 = vpack.c.bf16 %v3307_v59, %v3307_v59 }
 0x43e   : > { %v3403_v1 = vpop.permute.xlu0 %3402 }
 0x43f   : > { %3486 = vst.msk [vmem:[#allocation3 + $0x34] sm:$0xf] %vm3472_vm9, %v3403_v1 }
 0x444   : > { %3432 = vrot.lane.b32.xlu2 %v3340_v56, %s4784_s17 }
 0x446   : > { %v3409_v63 = vpop.permute.xlu0 %3408  ;;  %v4456_v48 = vld [vmem:[#allocation3 + $0x30] sm:$0xff]  ;;  %v3704_v21 = vpop.f32.mrf.mxu2 }
 0x447   : > { %3489 = vst.msk [vmem:[#allocation3 + $0x40] sm:$0xf] %vm3472_vm9, %v3409_v63  ;;  %v3705_v37 = vadd.f32 %v6372_v7, %v3704_v21  ;;  %4368 = vmatmul.msk.bf16.gmra.mxu2 %vm460_vm0, %v4456_v48  ;;  %v1236_v63 = vsel %vm953_vm3, %v5742_v35, 0.0 }
 0x449   : > { %3778 = vst.msk [vmem:[%s6379_s7 + $0x20] sm:$0xff] %vm460_vm0, %v3705_v37 }
 0x44c   : > { %1234 = vadd.xlane.f32.xlu0 %v1233_v47 }
 0x44e   : > { %3414 = vrot.lane.b32.xlu1 %v3331_v55, %s4784_s17  ;;  %v3411_v8 = vpop.permute.xlu0 %3410  ;;  %v3706_v32 = vpop.f32.mrf.mxu2 }
 0x44f   : > { %3490 = vst.msk [vmem:[#allocation3 + $0x44] sm:$0xf] %vm3472_vm9, %v3411_v8  ;;  %v3707_v0 = vadd.f32 %v6372_v7, %v3706_v32 }
 0x451   : > { %3779 = vst.msk [vmem:[%s6379_s7 + $0x28] sm:$0xff] %vm460_vm0, %v3707_v0 }
 0x454   : > { %1240 = vadd.xlane.f32.xlu0 %v1239_v18 }
 0x455   : > { %v6447_v15 = vpop.xlane.xlu1 %2606  ;;  %v3425_v62 = vpop.permute.xlu2 %3424 }
 0x456   : > { %3420 = vrot.lane.b32.xlu1 %v3334_v2, %s4784_s17  ;;  %3497 = vst.msk [vmem:[#allocation3 + $0x60] sm:$0xf] %vm3472_vm9, %v3425_v62  ;;  %v3709_v28 = vpop.f32.mrf.mxu2  ;;  %vm3054_vm1 = vweird.f32 %v6447_v15  ;;  %v3058_v6 = vand.u32 2147483647, %v6447_v15 }
 0x457   : > { %v3710_v53 = vadd.f32 %v6372_v7, %v3709_v28 }
 0x458   : > { %vm3059_vm4 = vcmp.eq.f32.partialorder %v3058_v6, 8.507059e+37 }
 0x459   : > { %3780 = vst.msk [vmem:[%s6379_s7 + $0x30] sm:$0xff] %vm460_vm0, %v3710_v53  ;;  %v4458_v53 = vld [vmem:[#allocation3 + $0x40] sm:$0xff] }
 0x45d   : > { %v2610_v39 = vpop.xlane.xlu1 %2609  ;;  %v6491_v49 = vpop.permute.xlu2 %3426 }
 0x45e   : > { %4739 = vrcp.f32 %v2610_v39  ;;  %v3711_v60 = vpop.f32.mrf.mxu2  ;;  %v3075_v54 = vand.u32 2147483648, %v2610_v39  ;;  %v3073_v51 = vand.u32 2147483647, %v2610_v39  ;;  %vm3069_vm7 = vweird.f32 %v2610_v39 }
 0x45f   : > { %v3712_v43 = vadd.f32 %v6372_v7, %v3711_v60 }
 0x460   : > { %v3076_v44 = vor.u32 1.1754944e-38, %v3075_v54  ;;  %vm3074_vm11 = vcmp.eq.f32.partialorder %v3073_v51, 8.507059e+37 }
 0x461   : > { %3781 = vst.msk [vmem:[%s6379_s7 + $0x38] sm:$0xff] %vm460_vm0, %v3712_v43 }
 0x464   : > { %v4740_v17 = vpop.eup %4739 }
 0x465   : > { %v3065_v36 = vmul.f32 %v4740_v17, %v2610_v39  ;;  %vm3070_vm6 = vweird.f32 %v4740_v17  ;;  %v6467_v52 = vpop.xlane.xlu1 %2612  ;;  %v3060_v39 = vand.u32 2147483648, %v6447_v15 }
 0x466   : > { %vm3071_vm8 = vmor %vm3069_vm7, %vm3070_vm6  ;;  %vm3084_vm6 = vweird.f32 %v6467_v52 }
 0x467   : > { %v3066_v40 = vsub.f32 1.0, %v3065_v36  ;;  %v3061_v43 = vor.u32 1.1754944e-38, %v3060_v39 }
 0x468   : > { %3430 = vrot.lane.b32.xlu0 %v3339_v12, %s4784_s17 }
 0x469   : > { %v3067_v29 = vmul.f32 %v4740_v17, %v3066_v40  ;;  %v3090_v40 = vand.u32 2147483648, %v6467_v52 }
 0x46b   : > { %v3068_v61 = vadd.f32 %v4740_v17, %v3067_v29  ;;  %v3091_v12 = vor.u32 1.1754944e-38, %v3090_v40 }
 0x46d   : > { %v3072_v42 = vsel %vm3071_vm8, %v4740_v17, %v3068_v61  ;;  %v3338_v17 = vpack.c.bf16 %v6344_v38, %v6344_v38 }
 0x46e   : > { %v3077_v4 = vsel %vm3074_vm11, %v3076_v44, %v3072_v42 }
 0x46f   : > { %v3310_v50 = vmul.f32 %v3275_v23, %v3077_v4  ;;  %v3277_v23 = vpop.f32.mrf.mxu0 }
 0x471   : > { %v3342_v31 = vpack.c.bf16 %v3310_v50, %v3310_v50 }
 0x473   : > { %3436 = vrot.lane.b32.xlu0 %v3342_v31, %s4784_s17 }
 0x479   : > { %v1226_v34 = vpop.xlane.xlu0 %1225 }
 0x47a   : > { %4741 = vrcp.f32 %v1226_v34  ;;  %v1643_v56 = vand.u32 2147483648, %v1226_v34  ;;  %v1641_v21 = vand.u32 2147483647, %v1226_v34  ;;  %vm1637_vm13 = vweird.f32 %v1226_v34 }
 0x47b   : > { %4743 = vrcp.f32 %v6447_v15 }
 0x47c   : > { %v1644_v47 = vor.u32 1.1754944e-38, %v1643_v56  ;;  %4745 = vrcp.f32 %v6467_v52  ;;  %vm1642_vm3 = vcmp.eq.f32.partialorder %v1641_v21, 8.507059e+37 }
 0x47d   : > { %v3405_v11 = vpop.permute.xlu1 %3404 }
 0x47e   : > { %3487 = vst.msk [vmem:[#allocation3 + $0x38] sm:$0xf] %vm3472_vm9, %v3405_v11 }
 0x480   : > { %1228 = vadd.xlane.f32.xlu1 %v1227_v46  ;;  %v4742_v13 = vpop.eup %4741 }
 0x481   : > { %v1633_v19 = vmul.f32 %v4742_v13, %v1226_v34  ;;  %vm1638_vm12 = vweird.f32 %v4742_v13  ;;  %v4744_v16 = vpop.eup %4743 }
 0x482   : > { %vm1639_vm14 = vmor %vm1637_vm13, %vm1638_vm12  ;;  %v3050_v41 = vmul.f32 %v4744_v16, %v6447_v15  ;;  %v4746_v62 = vpop.eup %4745  ;;  %vm3055_vm15 = vweird.f32 %v4744_v16  ;;  %v3088_v15 = vand.u32 2147483647, %v6467_v52 }
 0x483   : > { %v1634_v9 = vsub.f32 1.0, %v1633_v19  ;;  %v3080_v26 = vmul.f32 %v4746_v62, %v6467_v52  ;;  %vm3056_vm2 = vmor %vm3054_vm1, %vm3055_vm15  ;;  %vm3085_vm5 = vweird.f32 %v4746_v62 }
 0x484   : > { %v3714_v37 = vpop.f32.mrf.mxu2  ;;  %v3051_v18 = vsub.f32 1.0, %v3050_v41  ;;  %vm3086_vm7 = vmor %vm3084_vm6, %vm3085_vm5  ;;  %vm3089_vm8 = vcmp.eq.f32.partialorder %v3088_v15, 8.507059e+37 }
 0x485   : > { %v4457_v1 = vld [vmem:[#allocation3 + $0x38] sm:$0xff]  ;;  %v1635_v48 = vmul.f32 %v4742_v13, %v1634_v9  ;;  %v3715_v14 = vadd.f32 %v6372_v7, %v3714_v37  ;;  %v3081_v25 = vsub.f32 1.0, %v3080_v26 }
 0x486   : > { %4369 = vmatmul.msk.bf16.gmra.mxu2 %vm460_vm0, %v4457_v1  ;;  %v3052_v28 = vmul.f32 %v4744_v16, %v3051_v18 }
 0x487   : > { %v1636_v55 = vadd.f32 %v4742_v13, %v1635_v48  ;;  %3782 = vst.msk [vmem:[%s6379_s7 + $0x40] sm:$0xff] %vm460_vm0, %v3715_v14  ;;  %v3082_v60 = vmul.f32 %v4746_v62, %v3081_v25 }
 0x488   : > { %1237 = vadd.xlane.f32.xlu1 %v1236_v63 }
 0x489   : > { %v1640_v35 = vsel %vm1639_vm14, %v4742_v13, %v1636_v55  ;;  %v3083_v59 = vadd.f32 %v4746_v62, %v3082_v60 }
 0x48a   : > { %v1645_v8 = vsel %vm1642_vm3, %v1644_v47, %v1640_v35 }
 0x48b   : > { %v1933_v32 = vmul.f32 %v6329_v22, %v1645_v8  ;;  %v3053_v22 = vadd.f32 %v4744_v16, %v3052_v28  ;;  %v3087_v51 = vsel %vm3086_vm7, %v4746_v62, %v3083_v59 }
 0x48c   : > { %v3417_v3 = vpop.permute.xlu0 %3416  ;;  %v3716_v0 = vpop.f32.mrf.mxu2  ;;  %v3092_v44 = vsel %vm3089_vm8, %v3091_v12, %v3087_v51 }
 0x48d   : > { %3493 = vst.msk [vmem:[#allocation3 + $0x50] sm:$0xf] %vm3472_vm9, %v3417_v3  ;;  %v1965_v2 = vpack.c.bf16 %v1933_v32, %v1933_v32  ;;  %v3717_v27 = vadd.f32 %v6372_v7, %v3716_v0  ;;  %v3057_v58 = vsel %vm3056_vm2, %v4744_v16, %v3053_v22  ;;  %v3311_v50 = vmul.f32 %v3277_v23, %v3092_v44 }
 0x48e   : > { %v3062_v36 = vsel %vm3059_vm4, %v3061_v43, %v3057_v58 }
 0x48f   : > { %1998 = vst.msk [vmem:[#allocation3 + $0x68] sm:$0xf] %vm1971_vm10, %v1965_v2  ;;  %v3309_v29 = vmul.f32 %v6460_v20, %v3062_v36  ;;  %v3343_v46 = vpack.c.bf16 %v3311_v50, %v3311_v50 }
 0x490   : > { %3783 = vst.msk [vmem:[%s6379_s7 + $0x48] sm:$0xff] %vm460_vm0, %v3717_v27 }
 0x491   : > { %v3341_v38 = vpack.c.bf16 %v3309_v29, %v3309_v29 }
 0x494   : > { %v3423_v24 = vpop.permute.xlu0 %3422  ;;  %v4460_v23 = vld [vmem:[#allocation3 + $0x50] sm:$0xff] }
 0x495   : > { %3496 = vst.msk [vmem:[#allocation3 + $0x5c] sm:$0xf] %vm3472_vm9, %v3423_v24 }
 0x496   : > { %4370 = vmatmul.msk.bf16.gmra.mxu2 %vm460_vm0, %v4458_v53 }
 0x49f   : > { %v1232_v54 = vpop.xlane.xlu2 %1231 }
 0x4a0   : > { %4747 = vrcp.f32 %v1232_v54  ;;  %v1673_v34 = vand.u32 2147483648, %v1232_v54  ;;  %v1671_v11 = vand.u32 2147483647, %v1232_v54  ;;  %vm1667_vm12 = vweird.f32 %v1232_v54 }
 0x4a1   : > { %3428 = vrot.lane.b32.xlu1 %v3338_v17, %s4784_s17 }
 0x4a2   : > { %v1674_v1 = vor.u32 1.1754944e-38, %v1673_v34  ;;  %vm1672_vm14 = vcmp.eq.f32.partialorder %v1671_v11, 8.507059e+37 }
 0x4a6   : > { %v4748_v42 = vpop.eup %4747 }
 0x4a7   : > { %v1663_v4 = vmul.f32 %v4748_v42, %v1232_v54  ;;  %vm1668_vm11 = vweird.f32 %v4748_v42  ;;  %v3433_v41 = vpop.permute.xlu2 %3432 }
 0x4a8   : > { %v1223_v61 = vpop.xlane.xlu1 %1222  ;;  %vm1669_vm13 = vmor %vm1667_vm12, %vm1668_vm11 }
 0x4a9   : > { %4749 = vrcp.f32 %v1223_v61  ;;  %3434 = vrot.lane.b32.xlu1 %v3341_v38, %s4784_s17  ;;  %v1664_v31 = vsub.f32 1.0, %v1663_v4  ;;  %v1628_v48 = vand.u32 2147483648, %v1223_v61  ;;  %v1626_v14 = vand.u32 2147483647, %v1223_v61 }
 0x4aa   : > { %vm1622_vm15 = vweird.f32 %v1223_v61 }
 0x4ab   : > { %v1665_v52 = vmul.f32 %v4748_v42, %v1664_v31  ;;  %v1629_v47 = vor.u32 1.1754944e-38, %v1628_v48  ;;  %vm1627_vm2 = vcmp.eq.f32.partialorder %v1626_v14, 8.507059e+37 }
 0x4ad   : > { %v1666_v13 = vadd.f32 %v4748_v42, %v1665_v52 }
 0x4af   : > { %v4750_v20 = vpop.eup %4749  ;;  %v1670_v9 = vsel %vm1669_vm13, %v4748_v42, %v1666_v13 }
 0x4b0   : > { %v1618_v19 = vmul.f32 %v4750_v20, %v1223_v61  ;;  %v1675_v63 = vsel %vm1672_vm14, %v1674_v1, %v1670_v9  ;;  %vm1623_vm3 = vweird.f32 %v4750_v20 }
 0x4b1   : > { %3438 = vrot.lane.b32.xlu1 %v3343_v46, %s4784_s17  ;;  %v1935_v21 = vmul.f32 %v6348_v45, %v1675_v63  ;;  %vm1624_vm1 = vmor %vm1622_vm15, %vm1623_vm3 }
 0x4b2   : > { %v1619_v56 = vsub.f32 1.0, %v1618_v19 }
 0x4b3   : > { %v1967_v16 = vpack.c.bf16 %v1935_v21, %v1935_v21 }
 0x4b4   : > { %v1620_v37 = vmul.f32 %v4750_v20, %v1619_v56 }
 0x4b5   : > { %2000 = vst.msk [vmem:[#allocation3 + $0x70] sm:$0xf] %vm1971_vm10, %v1967_v16 }
 0x4b6   : > { %v1621_v55 = vadd.f32 %v4750_v20, %v1620_v37  ;;  %v3719_v35 = vpop.f32.mrf.mxu2  ;;  %3501 = vst.msk [vmem:[#allocation3 + $0x70] sm:$0xf] %vm3472_vm9, %v3433_v41 }
 0x4b7   : > { %v3720_v32 = vadd.f32 %v6372_v7, %v3719_v35 }
 0x4b8   : > { %v1625_v8 = vsel %vm1624_vm1, %v4750_v20, %v1621_v55 }
 0x4b9   : > { %v1630_v45 = vsel %vm1627_vm2, %v1629_v47, %v1625_v8  ;;  %3784 = vst.msk [vmem:[%s6379_s7 + $0x50] sm:$0xff] %vm460_vm0, %v3720_v32 }
 0x4ba   : > { %v1932_v3 = vmul.f32 %v6321_v5, %v1630_v45 }
 0x4bc   : > { %v1964_v0 = vpack.c.bf16 %v1932_v3, %v1932_v3 }
 0x4be   : > { %1997 = vst.msk [vmem:[#allocation3 + $0x64] sm:$0xf] %vm1971_vm10, %v1964_v0  ;;  %v3721_v2 = vpop.f32.mrf.mxu2 }
 0x4bf   : > { %3498 = vst.msk [vmem:[#allocation3 + $0x64] sm:$0xf] %vm3472_vm9, %v6491_v49  ;;  %v3722_v27 = vadd.f32 %v6372_v7, %v3721_v2  ;;  %v1235_v62 = vpop.xlane.xlu0 %1234 }
 0x4c0   : > { %v3415_v18 = vpop.permute.xlu1 %3414  ;;  %4751 = vrcp.f32 %v1235_v62  ;;  %v1688_v25 = vand.u32 2147483648, %v1235_v62  ;;  %v1686_v49 = vand.u32 2147483647, %v1235_v62  ;;  %vm1682_vm5 = vweird.f32 %v1235_v62 }
 0x4c1   : > { %3492 = vst.msk [vmem:[#allocation3 + $0x4c] sm:$0xf] %vm3472_vm9, %v3415_v18 }
 0x4c2   : > { %3785 = vst.msk [vmem:[%s6379_s7 + $0x58] sm:$0xff] %vm460_vm0, %v3722_v27  ;;  %v1689_v17 = vor.u32 1.1754944e-38, %v1688_v25  ;;  %vm1687_vm7 = vcmp.eq.f32.partialorder %v1686_v49, 8.507059e+37 }
 0x4c6   : > { %v4752_v26 = vpop.eup %4751  ;;  %v4462_v20 = vld [vmem:[#allocation3 + $0x60] sm:$0xff] }
 0x4c7   : > { %v1678_v53 = vmul.f32 %v4752_v26, %v1235_v62  ;;  %v1241_v24 = vpop.xlane.xlu0 %1240  ;;  %vm1683_vm4 = vweird.f32 %v4752_v26 }
 0x4c8   : > { %v3421_v28 = vpop.permute.xlu1 %3420  ;;  %v4459_v5 = vld [vmem:[#allocation3 + $0x48] sm:$0xff]  ;;  %4753 = vrcp.f32 %v1241_v24  ;;  %vm1684_vm6 = vmor %vm1682_vm5, %vm1683_vm4  ;;  %v1718_v29 = vand.u32 2147483648, %v1241_v24  ;;  %v1716_v12 = vand.u32 2147483647, %v1241_v24  ;;  %vm1712_vm11 = vweird.f32 %v1241_v24 }
 0x4c9   : > { %3495 = vst.msk [vmem:[#allocation3 + $0x58] sm:$0xf] %vm3472_vm9, %v3421_v28  ;;  %4371 = vmatmul.msk.bf16.gmra.mxu2 %vm460_vm0, %v4459_v5  ;;  %v1679_v22 = vsub.f32 1.0, %v1678_v53 }
 0x4ca   : > { %v3724_v6 = vpop.f32.mrf.mxu2  ;;  %v1719_v4 = vor.u32 1.1754944e-38, %v1718_v29  ;;  %vm1717_vm13 = vcmp.eq.f32.partialorder %v1716_v12, 8.507059e+37 }
 0x4cb   : > { %v1680_v39 = vmul.f32 %v4752_v26, %v1679_v22  ;;  %v3725_v60 = vadd.f32 %v6372_v7, %v3724_v6 }
 0x4cd   : > { %v1681_v58 = vadd.f32 %v4752_v26, %v1680_v39  ;;  %3786 = vst.msk [vmem:[%s6379_s7 + $0x60] sm:$0xff] %vm460_vm0, %v3725_v60 }
 0x4ce   : > { %v4754_v43 = vpop.eup %4753 }
 0x4cf   : > { %v1708_v36 = vmul.f32 %v4754_v43, %v1241_v24  ;;  %v1685_v59 = vsel %vm1684_vm6, %v4752_v26, %v1681_v58  ;;  %vm1713_vm8 = vweird.f32 %v4754_v43 }
 0x4d0   : > { %v1690_v40 = vsel %vm1687_vm7, %v1689_v17, %v1685_v59  ;;  %vm1714_vm12 = vmor %vm1712_vm11, %vm1713_vm8  ;;  %v4461_v52 = vld [vmem:[#allocation3 + $0x58] sm:$0xff] }
 0x4d1   : > { %v1709_v54 = vsub.f32 1.0, %v1708_v36  ;;  %v1936_v15 = vmul.f32 %v6355_v57, %v1690_v40 }
 0x4d2   : > { %v3726_v38 = vpop.f32.mrf.mxu2 }
 0x4d3   : > { %v1710_v51 = vmul.f32 %v4754_v43, %v1709_v54  ;;  %v1968_v61 = vpack.c.bf16 %v1936_v15, %v1936_v15  ;;  %v3727_v44 = vadd.f32 %v6372_v7, %v3726_v38 }
 0x4d5   : > { %v1711_v42 = vadd.f32 %v4754_v43, %v1710_v51  ;;  %2001 = vst.msk [vmem:[#allocation3 + $0x74] sm:$0xf] %vm1971_vm10, %v1968_v61 }
 0x4d6   : > { %3787 = vst.msk [vmem:[%s6379_s7 + $0x68] sm:$0xff] %vm460_vm0, %v3727_v44 }
 0x4d7   : > { %v1715_v57 = vsel %vm1714_vm12, %v4754_v43, %v1711_v42 }
 0x4d8   : > { %v1720_v50 = vsel %vm1717_vm13, %v1719_v4, %v1715_v57 }
 0x4d9   : > { %4372 = vmatmul.msk.bf16.gmra.mxu2 %vm460_vm0, %v4460_v23  ;;  %v1938_v31 = vmul.f32 %v6366_v33, %v1720_v50 }
 0x4da   : > { %v3431_v45 = vpop.permute.xlu0 %3430 }
 0x4db   : > { %v1970_v34 = vpack.c.bf16 %v1938_v31, %v1938_v31 }
 0x4dd   : > { %2003 = vst.msk [vmem:[#allocation3 + $0x7c] sm:$0xf] %vm1971_vm10, %v1970_v34 }
 0x4e5   : > { %v3437_v5 = vpop.permute.xlu0 %3436 }
 0x4e9   : > { %4373 = vmatmul.msk.bf16.gmra.mxu2 %vm460_vm0, %v4461_v52 }
 0x4f3   : > { %v1229_v11 = vpop.xlane.xlu1 %1228 }
 0x4f4   : > { %4755 = vrcp.f32 %v1229_v11  ;;  %v1658_v9 = vand.u32 2147483648, %v1229_v11  ;;  %v1656_v33 = vand.u32 2147483647, %v1229_v11  ;;  %vm1652_vm3 = vweird.f32 %v1229_v11 }
 0x4f6   : > { %v1659_v21 = vor.u32 1.1754944e-38, %v1658_v9  ;;  %vm1657_vm1 = vcmp.eq.f32.partialorder %v1656_v33, 8.507059e+37 }
 0x4f9   : > { %4374 = vmatmul.msk.bf16.gmra.mxu2 %vm460_vm0, %v4462_v20 }
 0x4fa   : > { %v4756_v46 = vpop.eup %4755 }
 0x4fb   : > { %v1648_v13 = vmul.f32 %v4756_v46, %v1229_v11  ;;  %v1238_v19 = vpop.xlane.xlu1 %1237  ;;  %vm1653_vm14 = vweird.f32 %v4756_v46 }
 0x4fc   : > { %4757 = vrcp.f32 %v1238_v19  ;;  %vm1654_vm15 = vmor %vm1652_vm3, %vm1653_vm14  ;;  %v1703_v35 = vand.u32 2147483648, %v1238_v19  ;;  %v1701_v32 = vand.u32 2147483647, %v1238_v19  ;;  %vm1697_vm4 = vweird.f32 %v1238_v19 }
 0x4fd   : > { %v1649_v1 = vsub.f32 1.0, %v1648_v13 }
 0x4fe   : > { %v1704_v0 = vor.u32 1.1754944e-38, %v1703_v35  ;;  %vm1702_vm6 = vcmp.eq.f32.partialorder %v1701_v32, 8.507059e+37 }
 0x4ff   : > { %v1650_v56 = vmul.f32 %v4756_v46, %v1649_v1 }
 0x501   : > { %v1651_v63 = vadd.f32 %v4756_v46, %v1650_v56 }
 0x502   : > { %v4758_v48 = vpop.eup %4757 }
 0x503   : > { %v1655_v37 = vsel %vm1654_vm15, %v4756_v46, %v1651_v63  ;;  %v1693_v14 = vmul.f32 %v4758_v48, %v1238_v19  ;;  %vm1698_vm2 = vweird.f32 %v4758_v48 }
 0x504   : > { %v1660_v16 = vsel %vm1657_vm1, %v1659_v21, %v1655_v37  ;;  %vm1699_vm5 = vmor %vm1697_vm4, %vm1698_vm2 }
 0x505   : > { %v1934_v55 = vmul.f32 %v6338_v30, %v1660_v16  ;;  %v1694_v47 = vsub.f32 1.0, %v1693_v14 }
 0x507   : > { %v1966_v41 = vpack.c.bf16 %v1934_v55, %v1934_v55  ;;  %v1695_v8 = vmul.f32 %v4758_v48, %v1694_v47 }
 0x509   : > { %1999 = vst.msk [vmem:[#allocation3 + $0x6c] sm:$0xf] %vm1971_vm10, %v1966_v41  ;;  %v1696_v3 = vadd.f32 %v4758_v48, %v1695_v8  ;;  %v3729_v2 = vpop.f32.mrf.mxu2 }
 0x50a   : > { %3500 = vst.msk [vmem:[#allocation3 + $0x6c] sm:$0xf] %vm3472_vm9, %v3431_v45  ;;  %v3730_v30 = vadd.f32 %v6372_v7, %v3729_v2 }
 0x50b   : > { %v1700_v18 = vsel %vm1699_vm5, %v4758_v48, %v1696_v3 }
 0x50c   : > { %v1705_v27 = vsel %vm1702_vm6, %v1704_v0, %v1700_v18  ;;  %3788 = vst.msk [vmem:[%s6379_s7 + $0x70] sm:$0xff] %vm460_vm0, %v3730_v30 }
 0x50d   : > { %v1937_v62 = vmul.f32 %v6362_v10, %v1705_v27 }
 0x50f   : > { %v1969_v28 = vpack.c.bf16 %v1937_v62, %v1937_v62 }
 0x511   : > { %2002 = vst.msk [vmem:[#allocation3 + $0x78] sm:$0xf] %vm1971_vm10, %v1969_v28  ;;  %v3731_v26 = vpop.f32.mrf.mxu2 }
 0x512   : > { %3503 = vst.msk [vmem:[#allocation3 + $0x78] sm:$0xf] %vm3472_vm9, %v3437_v5  ;;  %v3732_v24 = vadd.f32 %v6372_v7, %v3731_v26 }
 0x513   : > { %v3429_v53 = vpop.permute.xlu1 %3428 }
 0x514   : > { %3499 = vst.msk [vmem:[#allocation3 + $0x68] sm:$0xf] %vm3472_vm9, %v3429_v53 }
 0x515   : > { %3789 = vst.msk [vmem:[%s6379_s7 + $0x78] sm:$0xff] %vm460_vm0, %v3732_v24 }
 0x519   : > { %v3734_v22 = vpop.f32.mrf.mxu2 }
 0x51a   : > { %v3735_v25 = vadd.f32 %v6372_v7, %v3734_v22 }
 0x51b   : > { %v3435_v10 = vpop.permute.xlu1 %3434  ;;  %v4463_v39 = vld [vmem:[#allocation3 + $0x68] sm:$0xff] }
 0x51c   : > { %3502 = vst.msk [vmem:[#allocation3 + $0x74] sm:$0xf] %vm3472_vm9, %v3435_v10  ;;  %4375 = vmatmul.msk.bf16.gmra.mxu2 %vm460_vm0, %v4463_v39 }
 0x51d   : > { %3790 = vst.msk [vmem:[%s6379_s7 + $0x80] sm:$0xff] %vm460_vm0, %v3735_v25 }
 0x521   : > { %v3736_v49 = vpop.f32.mrf.mxu2 }
 0x522   : > { %v3737_v60 = vadd.f32 %v6372_v7, %v3736_v49 }
 0x523   : > { %v3439_v6 = vpop.permute.xlu1 %3438  ;;  %v4464_v58 = vld [vmem:[#allocation3 + $0x70] sm:$0xff] }
 0x524   : > { %3504 = vst.msk [vmem:[#allocation3 + $0x7c] sm:$0xf] %vm3472_vm9, %v3439_v6 }
 0x525   : > { %3791 = vst.msk [vmem:[%s6379_s7 + $0x88] sm:$0xff] %vm460_vm0, %v3737_v60 }
 0x52b   : > { %v4465_v43 = vld [vmem:[#allocation3 + $0x78] sm:$0xff] }
 0x52c   : > { %4376 = vmatmul.msk.bf16.gmra.mxu2 %vm460_vm0, %v4464_v58  ;;  %4377 = vmatmul.msk.bf16.vlgmr.msra.gmra.mxu3 %vm460_vm0, %v4465_v43 }
 0x54c   : > { %v3739_v17 = vpop.f32.mrf.mxu2 }
 0x54d   : > { %v3740_v36 = vadd.f32 %v6372_v7, %v3739_v17 }
 0x54f   : > { %3792 = vst.msk [vmem:[%s6379_s7 + $0x90] sm:$0xff] %vm460_vm0, %v3740_v36 }
 0x554   : > { %v3741_v59 = vpop.f32.mrf.mxu2 }
 0x555   : > { %v3742_v40 = vadd.f32 %v6372_v7, %v3741_v59 }
 0x557   : > { %3793 = vst.msk [vmem:[%s6379_s7 + $0x98] sm:$0xff] %vm460_vm0, %v3742_v40 }
 0x55c   : > { %v3744_v54 = vpop.f32.mrf.mxu2 }
 0x55d   : > { %v3745_v15 = vadd.f32 %v6372_v7, %v3744_v54 }
 0x55f   : > { %3794 = vst.msk [vmem:[%s6379_s7 + $0xa0] sm:$0xff] %vm460_vm0, %v3745_v15 }
 0x564   : > { %v3746_v29 = vpop.f32.mrf.mxu2 }
 0x565   : > { %v3747_v51 = vadd.f32 %v6372_v7, %v3746_v29 }
 0x567   : > { %3795 = vst.msk [vmem:[%s6379_s7 + $0xa8] sm:$0xff] %vm460_vm0, %v3747_v51 }
 0x56c   : > { %v3749_v12 = vpop.f32.mrf.mxu2 }
 0x56d   : > { %v3750_v38 = vadd.f32 %v6372_v7, %v3749_v12 }
 0x56f   : > { %3796 = vst.msk [vmem:[%s6379_s7 + $0xb0] sm:$0xff] %vm460_vm0, %v3750_v38 }
 0x574   : > { %v3751_v61 = vpop.f32.mrf.mxu2 }
 0x575   : > { %v3752_v44 = vadd.f32 %v6372_v7, %v3751_v61 }
 0x577   : > { %3797 = vst.msk [vmem:[%s6379_s7 + $0xb8] sm:$0xff] %vm460_vm0, %v3752_v44 }
 0x57c   : > { %v3754_v42 = vpop.f32.mrf.mxu2 }
 0x57d   : > { %v3755_v23 = vadd.f32 %v6372_v7, %v3754_v42 }
 0x57f   : > { %3798 = vst.msk [vmem:[%s6379_s7 + $0xc0] sm:$0xff] %vm460_vm0, %v3755_v23 }
 0x584   : > { %v3756_v4 = vpop.f32.mrf.mxu2 }
 0x585   : > { %v3757_v57 = vadd.f32 %v6372_v7, %v3756_v4 }
 0x587   : > { %3799 = vst.msk [vmem:[%s6379_s7 + $0xc8] sm:$0xff] %vm460_vm0, %v3757_v57 }
 0x59f   : > { %v3759_v50 = vpop.f32.mrf.mxu2 }
 0x5a0   : > { %v3760_v31 = vadd.f32 %v6372_v7, %v3759_v50 }
 0x5a2   : > { %3800 = vst.msk [vmem:[%s6379_s7 + $0xd0] sm:$0xff] %vm460_vm0, %v3760_v31 }
 0x5a7   : > { %v3761_v34 = vpop.f32.mrf.mxu2 }
 0x5a8   : > { %v3762_v52 = vadd.f32 %v6372_v7, %v3761_v34 }
 0x5aa   : > { %3801 = vst.msk [vmem:[%s6379_s7 + $0xd8] sm:$0xff] %vm460_vm0, %v3762_v52 }
 0x5af   : > { %v3764_v11 = vpop.f32.mrf.mxu2  ;;  %v3769_v20 = vpop.f32.mrf.mxu3 }
 0x5b0   : > { %v3765_v46 = vadd.f32 %v6372_v7, %v3764_v11  ;;  %v3770_v13 = vadd.f32 %v6372_v7, %v3769_v20 }
 0x5b2   : > { %3802 = vst.msk [vmem:[%s6379_s7 + $0xe0] sm:$0xff] %vm460_vm0, %v3765_v46 }
 0x5b3   : > { %3804 = vst.msk [vmem:[%s6379_s7 + $0xf0] sm:$0xff] %vm460_vm0, %v3770_v13 }
 0x5b7   : > { %v3766_v19 = vpop.f32.mrf.mxu2  ;;  %v3771_v1 = vpop.f32.mrf.mxu3 }
 0x5b8   : > { %v3767_v9 = vadd.f32 %v6372_v7, %v3766_v19  ;;  %v3772_v56 = vadd.f32 %v6372_v7, %v3771_v1 }
 0x5ba   : > { %3803 = vst.msk [vmem:[%s6379_s7 + $0xe8] sm:$0xff] %vm460_vm0, %v3767_v9 }
 0x5bb   : > { %3805 = vst.msk [vmem:[%s6379_s7 + $0xf8] sm:$0xff] %vm460_vm0, %v3772_v56 }
 0x5bc PF: > { %s16_s23 = sadd.s32 1, %s4781_s23   ;;  %s6657_s21 = smov %s4777_s22 }
 0x5bd   : > { %p13_p5 = scmp.ge.s32.totalorder %s16_s23, 4   ;;  %s6658_s22 = smov %s6660_s24 }
 0x5bf   :  { %15 = sbr.rel (!%p13_p5) target bundleno = 2 (0x2), region = 82 }

</bundles_post_ra>
